<compile_context>
chip_gen: v6e
topology: v6e:2x2x1
jax: 0.10.0
libtpu: 0.0.40
codegen_flags: <defaults>
</compile_context>

<pallas_src>
import jax
import jax.numpy as jnp
from jax import lax
from jax.experimental import pallas as pl
from jax.experimental.pallas import tpu as pltpu

BN_EPS = 1e-5
VMEM_LIMIT = 48 * 1024 * 1024      # sized against v7x's 64 MiB physical VMEM
MXU_DTYPE = jnp.bfloat16           # MXU input dtype (accumulation is f32)


# ----------------------------- Pallas kernels ------------------------------

def _mm_stats_kernel(p_ref, w_ref, y_ref, s_ref):
    """One M-tile of (patches @ weight) plus per-column BN partial statistics.

    p_ref : (TM, K)   bf16 im2col patches (rows = output positions)
    w_ref : (K, W)    bf16 weight matrix (W >= 128 lanes by construction)
    y_ref : (TM, W)   f32 pre-BN conv output tile
    s_ref : (1, 2, W) f32 per-tile [sum, sum-of-squares] per output column
    """
    y = jnp.dot(p_ref[...], w_ref[...], preferred_element_type=jnp.float32)
    y_ref[...] = y
    s_ref[0] = jnp.concatenate(
        [jnp.sum(y, axis=0, keepdims=True),
         jnp.sum(y * y, axis=0, keepdims=True)], axis=0)


def _bn_relu_kernel(y_ref, s_ref, b_ref, a_ref):
    """Lane-dense BatchNorm(train)+ReLU apply: a = max(y*scale + bias, 0).

    scale = gamma * rsqrt(var + eps) and bias = beta - mean*scale are folded
    per channel outside the kernel, so this is one FMA + one max per element.
    """
    a_ref[...] = jnp.maximum(
        y_ref[...] * s_ref[...] + b_ref[...], 0.0).astype(a_ref.dtype)


def _conv1x1_tanh_kernel(w_ref, x_ref, o_ref):
    """Final 1x1 conv + tanh, one image per grid step, lane-dense (H*W lanes).

    w_ref : (nc, C)      bf16
    x_ref : (1, C, H*W)  bf16 (cropped activation, channels-first)
    o_ref : (1, nc, H*W) f32  (already NCHW)
    """
    y = jnp.dot(w_ref[...], x_ref[0], preferred_element_type=jnp.float32)
    o_ref[0] = jnp.tanh(y)


# ------------------------------ call wrappers -------------------------------

def _pick_tile(n, target):
    """Largest divisor of n that is <= target and a multiple of 16 (sublane
    friendly for both f32 and bf16); falls back to one full block."""
    if n <= target:
        return n
    t = (target // 16) * 16
    while t >= 16:
        if n % t == 0:
            return t
        t -= 16
    return n


def _matmul_with_stats(p, wm, tile_m):
    """Tiled, pipelined (M, K) @ (K, W) with per-column partial BN stats."""
    p = p.astype(MXU_DTYPE)
    wm = wm.astype(MXU_DTYPE)
    m, k = p.shape
    w = wm.shape[1]
    tm = _pick_tile(m, tile_m)
    nt = m // tm
    flops = 2 * m * k * w
    bytes_accessed = p.size * 2 + wm.size * 2 + m * w * 4 + nt * 2 * w * 4
    y, st = pl.pallas_call(
        _mm_stats_kernel,
        grid=(nt,),
        in_specs=[pl.BlockSpec((tm, k), lambda i: (i, 0)),
                  pl.BlockSpec((k, w), lambda i: (0, 0))],
        out_specs=(pl.BlockSpec((tm, w), lambda i: (i, 0)),
                   pl.BlockSpec((1, 2, w), lambda i: (i, 0, 0))),
        out_shape=(jax.ShapeDtypeStruct((m, w), jnp.float32),
                   jax.ShapeDtypeStruct((nt, 2, w), jnp.float32)),
        compiler_params=pltpu.CompilerParams(
            dimension_semantics=("parallel",),   # v7x megacore shards row tiles
            vmem_limit_bytes=VMEM_LIMIT),
        cost_estimate=pl.CostEstimate(flops=flops, transcendentals=0,
                                      bytes_accessed=bytes_accessed),
    )(p, wm)
    return y, jnp.sum(st, axis=0)                # (M, W) f32, (2, W) f32


def _bn_scale_bias(col_sums, total_elems, gamma, beta):
    """Folded per-channel BN scale/bias from per-column (sum, sumsq)."""
    cout = gamma.shape[0]
    w = col_sums.shape[1]
    s = col_sums.reshape(2, w // cout, cout).sum(axis=1)   # column -> channel (col % cout)
    count = total_elems // cout                            # = N * Hout * Wout
    mean = s[0] / count
    # Biased variance (PyTorch training-mode normalization); f32 accumulation,
    # clamp guards the small E[y^2]-E[y]^2 cancellation error.
    var = jnp.maximum(s[1] / count - mean * mean, 0.0)
    scale = gamma * lax.rsqrt(var + BN_EPS)
    return scale, beta - mean * scale


def _bn_relu_apply(y, scale_cols, bias_cols, tile_r):
    """Tiled lane-dense BN+ReLU apply; writes the activation in bf16."""
    r, w = y.shape
    tr = _pick_tile(r, tile_r)
    nt = r // tr
    return pl.pallas_call(
        _bn_relu_kernel,
        grid=(nt,),
        in_specs=[pl.BlockSpec((tr, w), lambda i: (i, 0)),
                  pl.BlockSpec((1, w), lambda i: (0, 0)),
                  pl.BlockSpec((1, w), lambda i: (0, 0))],
        out_specs=pl.BlockSpec((tr, w), lambda i: (i, 0)),
        out_shape=jax.ShapeDtypeStruct((r, w), MXU_DTYPE),
        compiler_params=pltpu.CompilerParams(
            dimension_semantics=("parallel",), vmem_limit_bytes=VMEM_LIMIT),
        cost_estimate=pl.CostEstimate(flops=2 * r * w, transcendentals=0,
                                      bytes_accessed=r * w * 4 + r * w * 2 + 2 * w * 4),
    )(y, scale_cols.reshape(1, w).astype(jnp.float32),
      bias_cols.reshape(1, w).astype(jnp.float32))


# ------------------------------- layer glue ---------------------------------

def _im2col3_nhwc(xp):
    """3x3 stride-1 im2col of an NHWC tensor; columns ordered (dy, dx, c)."""
    n, hp, wp, c = xp.shape
    ho, wo = hp - 2, wp - 2
    cols = [xp[:, dy:dy + ho, dx:dx + wo, :] for dy in range(3) for dx in range(3)]
    return jnp.stack(cols, axis=3).reshape(n * ho * wo, 9 * c)


def _pixel_shuffle_weight(w):
    """ConvTranspose2d(k=4, s=2, p=1) weight (Cin, Cout, 4, 4) -> equivalent
    3x3 stride-1 conv weight of shape (9*Cin, 4*Cout).

    Rows ordered (dy, dx, ci) to match _im2col3_nhwc; columns ordered
    (py, px, co) where (py, px) is the output-pixel parity, so the matmul
    output pixel-shuffles into the 2x upsampled NHWC map.  Each output pixel
    only touches the 2x2 kernel taps that can reach it -> no dilation zeros.
    """
    cin, cout = w.shape[0], w.shape[1]
    zero = jnp.zeros((cin, cout), w.dtype)
    # TAP[parity][offset d in 0..2] -> original kernel index (None == zero tap)
    TAP = ((3, 1, None), (None, 2, 0))
    rows = []
    for dy in range(3):
        for dx in range(3):
            cols = []
            for py in range(2):
                for px in range(2):
                    iy, ix = TAP[py][dy], TAP[px][dx]
                    cols.append(zero if iy is None or ix is None
                                else w[:, :, iy, ix])
            rows.append(jnp.stack(cols, axis=1).reshape(cin, 4 * cout))
    return jnp.stack(rows, axis=0).reshape(9 * cin, 4 * cout)


def _fold_lane_dense(patches, wm):
    """If the output width is < 128 lanes, fold G row-groups with a block-
    diagonal weight so kernel output blocks are >= 128 lanes (dense stores)
    at no extra HBM traffic (same memory layout, reinterpreted)."""
    m, k = patches.shape
    wcols = wm.shape[1]
    g = 1
    if wcols < 128 and 128 % wcols == 0:
        g = 128 // wcols
        while g > 1 and m % g:
            g //= 2
    if g > 1:
        patches = patches.reshape(m // g, g * k)
        wm = jnp.kron(jnp.eye(g, dtype=wm.dtype), wm)
    return patches, wm


def deconv4x4_s1_bn_relu(x_nchw, w, gamma, beta, tile_m, tile_r):
    """ConvTranspose2d(nz->C, 4, 1, 0) on a 1x1 input + BN(train) + ReLU.

    y[n, oy, ox, c] = sum_ci x[n, ci] * w[ci, c, oy, ox]: a single matmul with
    output columns (oy, ox, c) -> reshape straight to NHWC."""
    n, cin = x_nchw.shape[0], x_nchw.shape[1]
    cout = w.shape[1]
    p = x_nchw.reshape(n, cin)
    wm = jnp.transpose(w, (0, 2, 3, 1)).reshape(cin, 16 * cout)
    y, col_sums = _matmul_with_stats(p, wm, tile_m)
    scale, bias = _bn_scale_bias(col_sums, y.size, gamma, beta)
    wk = y.shape[1]
    a = _bn_relu_apply(y, jnp.tile(scale, wk // cout),
                       jnp.tile(bias, wk // cout), tile_r)
    return a.reshape(n, 4, 4, cout)


def deconv4x4_s2_bn_relu(a, w, gamma, beta, tile_m, tile_r):
    """ConvTranspose2d(Cin->Cout, 4, 2, 1) + BN(train) + ReLU, NHWC -> NHWC."""
    n, h, wd, cin = a.shape
    cout = w.shape[1]
    # sub-pixel decomposition: pad-1 + 3x3 im2col + (9*Cin, 4*Cout) matmul.
    # TODO(synk): move this im2col gather in-kernel (halo'd manual DMA) to cut
    # the remaining patch HBM traffic on the stride-2 layers.
    patches = _im2col3_nhwc(jnp.pad(a, ((0, 0), (1, 1), (1, 1), (0, 0))))
    wm = _pixel_shuffle_weight(w)
    patches, wm = _fold_lane_dense(patches, wm)
    y, col_sums = _matmul_with_stats(patches, wm, tile_m)
    scale, bias = _bn_scale_bias(col_sums, y.size, gamma, beta)
    wk = y.shape[1]
    act = _bn_relu_apply(y, jnp.tile(scale, wk // cout),
                         jnp.tile(bias, wk // cout), tile_r)
    # un-fold + pixel-shuffle: (n, h, w, py, px, c) -> (n, 2h, 2w, c)
    act = act.reshape(n, h, wd, 2, 2, cout)
    return act.transpose(0, 1, 3, 2, 4, 5).reshape(n, 2 * h, 2 * wd, cout)


def conv1x1_pad2_tanh(a, w5):
    """ConvTranspose2d(C->nc, 1, 1, 2) + Tanh == center-crop-2 + 1x1 conv +
    tanh, computed as (nc, C) @ (C, H*W) per image so the kernel lane dim is
    H*W (dense) and the result is already NCHW."""
    n, h, wd, c = a.shape
    nc_out = w5.shape[1]
    ho, wo = h - 4, wd - 4
    xc = a[:, 2:h - 2, 2:wd - 2, :]
    xt = jnp.transpose(xc, (0, 3, 1, 2)).reshape(n, c, ho * wo).astype(MXU_DTYPE)
    wt = jnp.transpose(w5[:, :, 0, 0]).astype(MXU_DTYPE)         # (nc, C)
    out = pl.pallas_call(
        _conv1x1_tanh_kernel,
        grid=(n,),
        in_specs=[pl.BlockSpec((nc_out, c), lambda i: (0, 0)),
                  pl.BlockSpec((1, c, ho * wo), lambda i: (i, 0, 0))],
        out_specs=pl.BlockSpec((1, nc_out, ho * wo), lambda i: (i, 0, 0)),
        out_shape=jax.ShapeDtypeStruct((n, nc_out, ho * wo), jnp.float32),
        compiler_params=pltpu.CompilerParams(
            dimension_semantics=("parallel",), vmem_limit_bytes=VMEM_LIMIT),
        cost_estimate=pl.CostEstimate(
            flops=2 * n * nc_out * c * ho * wo,
            transcendentals=n * nc_out * ho * wo,
            bytes_accessed=xt.size * 2 + wt.size * 2 + n * nc_out * ho * wo * 4),
    )(wt, xt)
    return out.reshape(n, nc_out, ho, wo)


# ------------------------------- Generator ----------------------------------

class Generator:
    """JAX/Pallas port of the PyTorch DCGAN Generator (training-mode forward)."""

    def __init__(self, nc, nz, ngf, key, tile_m=512, tile_r=512):
        self.nc, self.nz, self.ngf = nc, nz, ngf
        self.tile_m, self.tile_r = tile_m, tile_r
        k1, k2, k3, k4, k5 = jax.random.split(key, 5)

        def w_init(k, cin, cout, ksz):
            # DCGAN-style N(0, 0.02) init, deterministic from PRNGKey.
            return 0.02 * jax.random.normal(k, (cin, cout, ksz, ksz), jnp.float32)

        self.w1 = w_init(k1, nz, ngf * 8, 4)
        self.w2 = w_init(k2, ngf * 8, ngf * 4, 4)
        self.w3 = w_init(k3, ngf * 4, ngf * 2, 4)
        self.w4 = w_init(k4, ngf * 2, ngf, 4)
        self.w5 = w_init(k5, ngf, nc, 1)
        # BatchNorm2d default init: weight=1, bias=0.
        self.g1, self.b1 = jnp.ones((ngf * 8,)), jnp.zeros((ngf * 8,))
        self.g2, self.b2 = jnp.ones((ngf * 4,)), jnp.zeros((ngf * 4,))
        self.g3, self.b3 = jnp.ones((ngf * 2,)), jnp.zeros((ngf * 2,))
        self.g4, self.b4 = jnp.ones((ngf,)), jnp.zeros((ngf,))

    def __call__(self, x):                      # x: (N, nz, 1, 1) NCHW
        tm, tr = self.tile_m, self.tile_r
        h = deconv4x4_s1_bn_relu(x, self.w1, self.g1, self.b1, tm, tr)
        h = deconv4x4_s2_bn_relu(h, self.w2, self.g2, self.b2, tm, tr)
        h = deconv4x4_s2_bn_relu(h, self.w3, self.g3, self.b3, tm, tr)
        h = deconv4x4_s2_bn_relu(h, self.w4, self.g4, self.b4, tm, tr)
        return conv1x1_pad2_tanh(h, self.w5)    # (N, nc, 28, 28) NCHW


# ----------------------- Pure-JAX reference (for check) ---------------------

def _ref_convT(x, w, stride, padding):
    k = w.shape[2]
    wc = jnp.flip(w, axis=(2, 3)).transpose(1, 0, 2, 3)          # OIHW
    return lax.conv_general_dilated(
        x, wc, window_strides=(1, 1),
        padding=[(k - 1 - padding, k - 1 - padding)] * 2,
        lhs_dilation=(stride, stride),
        dimension_numbers=('NCHW', 'OIHW', 'NCHW'))


def _ref_bn_relu(y, g, b):
    mu = jnp.mean(y, axis=(0, 2, 3), keepdims=True)
    var = jnp.mean(jnp.square(y - mu), axis=(0, 2, 3), keepdims=True)
    yh = (y - mu) / jnp.sqrt(var + BN_EPS)
    return jnp.maximum(yh * g.reshape(1, -1, 1, 1) + b.reshape(1, -1, 1, 1), 0.0)


def reference_forward(gen, x):
    h = _ref_bn_relu(_ref_convT(x, gen.w1, 1, 0), gen.g1, gen.b1)
    h = _ref_bn_relu(_ref_convT(h, gen.w2, 2, 1), gen.g2, gen.b2)
    h = _ref_bn_relu(_ref_convT(h, gen.w3, 2, 1), gen.g3, gen.b3)
    h = _ref_bn_relu(_ref_convT(h, gen.w4, 2, 1), gen.g4, gen.b4)
    xc = h[:, :, 2:-2, 2:-2]
    return jnp.tanh(jnp.einsum('nchw,co->nohw', xc, gen.w5[:, :, 0, 0]))


# ---------------------------------- main -------------------------------------

if __name__ == "__main__":
    nc, nz, ngf, batch = 3, 16, 8, 4
    key = jax.random.PRNGKey(0)
    kp, kx = jax.random.split(key)

    # Small tile targets so the toy shapes still exercise the multi-tile
    # pipelined grid and the cross-tile BN statistics reduction
    # (production default is 512-row tiles).
    gen = Generator(nc, nz, ngf, kp, tile_m=128, tile_r=64)
    x = jax.random.normal(kx, (batch, nz, 1, 1), jnp.float32)    # DCGAN latent

    fwd = jax.jit(gen.__call__)
    out = jax.block_until_ready(fwd(x))
    ref = jax.block_until_ready(reference_forward(gen, x))

    assert out.shape == (batch, nc, 28, 28), out.shape
    assert out.dtype == jnp.float32
    max_err = float(jnp.max(jnp.abs(out - ref)))
    # bf16 MXU inputs (f32 accumulation, f32 BN math) vs. an all-f32 reference:
    # expected error is ~1e-3 on tanh outputs whose pre-activation scale is
    # ~0.03; 1e-2 is a comfortable bound.
    assert max_err < 1e-2, f"max abs err {max_err}"

    print("KERNEL_OK")
</pallas_src>

<mosaic_0001>
module attributes {stable_mosaic.version = 11 : i64} {
  func.func @_mm_stats_kernel(%arg0: i32, %arg1: memref<4x16xbf16, #tpu.memory_space<vmem>>, %arg2: memref<16x1024xbf16, #tpu.memory_space<vmem>>, %arg3: memref<4x1024xf32, #tpu.memory_space<vmem>>, %arg4: memref<1x2x1024xf32, #tpu.memory_space<vmem>>) attributes {dimension_semantics = [#tpu.dimension_semantics<parallel>], iteration_bounds = array<i64: 1>, scalar_prefetch = 0 : i64, scratch_operands = 0 : i64, tpu.core_type = #tpu.core_type<tc>, window_params = [{transform_indices = @transform_0, window_bounds = array<i64: 4, 16>}, {pipeline_mode = #tpu.pipeline_mode<synchronous>, transform_indices = @transform_1, window_bounds = array<i64: 16, 1024>}, {transform_indices = @transform_2, window_bounds = array<i64: 4, 1024>}, {transform_indices = @transform_3, window_bounds = array<i64: 1, 2, 1024>}]} {
    %c0 = arith.constant 0 : index
    %c0_0 = arith.constant 0 : index
    %0 = vector.load %arg1[%c0, %c0_0] : memref<4x16xbf16, #tpu.memory_space<vmem>>, vector<4x16xbf16>
    %c0_1 = arith.constant 0 : index
    %c0_2 = arith.constant 0 : index
    %1 = vector.load %arg2[%c0_1, %c0_2] : memref<16x1024xbf16, #tpu.memory_space<vmem>>, vector<16x1024xbf16>
    %cst = arith.constant dense<0.000000e+00> : vector<4x1024xf32>
    %2 = tpu.matmul %0, %1, %cst {dimension_numbers = #tpu.dot_dimension_numbers<[1], [0], [0], [1], [0, 0, 1, 1], [], []>} : vector<4x16xbf16>, vector<16x1024xbf16>, vector<4x1024xf32> -> vector<4x1024xf32>
    %c0_3 = arith.constant 0 : index
    %c0_4 = arith.constant 0 : index
    %3 = vector.load %arg3[%c0_3, %c0_4] : memref<4x1024xf32, #tpu.memory_space<vmem>>, vector<4x1024xf32>
    tpu.vector_store %arg3[%c0_3, %c0_4], %2 {strides = array<i32>} : memref<4x1024xf32, #tpu.memory_space<vmem>>, vector<4x1024xf32>,
    %cst_5 = arith.constant dense<0.000000e+00> : vector<1024xf32>
    %4 = vector.multi_reduction <add>, %2, %cst_5 [0] : vector<4x1024xf32> to vector<1024xf32>
    %5 = vector.shape_cast %4 : vector<1024xf32> to vector<1x1024xf32>
    %6 = arith.mulf %2, %2 : vector<4x1024xf32>
    %cst_6 = arith.constant dense<0.000000e+00> : vector<1024xf32>
    %7 = vector.multi_reduction <add>, %6, %cst_6 [0] : vector<4x1024xf32> to vector<1024xf32>
    %8 = vector.shape_cast %7 : vector<1024xf32> to vector<1x1024xf32>
    %9 = tpu.concatenate %5, %8 in 0 : vector<1x1024xf32>, vector<1x1024xf32> -> vector<2x1024xf32>
    %c0_7 = arith.constant 0 : index
    %c0_8 = arith.constant 0 : index
    %c0_9 = arith.constant 0 : index
    %10 = vector.load %arg4[%c0_7, %c0_8, %c0_9] : memref<1x2x1024xf32, #tpu.memory_space<vmem>>, vector<1x2x1024xf32>
    %11 = vector.shape_cast %10 : vector<1x2x1024xf32> to vector<2x1024xf32>
    %12 = vector.shape_cast %9 : vector<2x1024xf32> to vector<1x2x1024xf32>
    tpu.vector_store %arg4[%c0_7, %c0_8, %c0_9], %12 {strides = array<i32>} : memref<1x2x1024xf32, #tpu.memory_space<vmem>>, vector<1x2x1024xf32>,
    return
  }
  func.func @transform_0(%arg0: i32) -> (i32, i32) {
    %c0_i32 = arith.constant 0 : i32
    %c0_i32_0 = arith.constant 0 : i32
    return %arg0, %c0_i32 : i32, i32
  }
  func.func @transform_1(%arg0: i32) -> (i32, i32) {
    %c0_i32 = arith.constant 0 : i32
    %c0_i32_0 = arith.constant 0 : i32
    %c0_i32_1 = arith.constant 0 : i32
    return %c0_i32, %c0_i32_0 : i32, i32
  }
  func.func @transform_2(%arg0: i32) -> (i32, i32) {
    %c0_i32 = arith.constant 0 : i32
    %c0_i32_0 = arith.constant 0 : i32
    return %arg0, %c0_i32 : i32, i32
  }
  func.func @transform_3(%arg0: i32) -> (i32, i32, i32) {
    %c0_i32 = arith.constant 0 : i32
    %c0_i32_0 = arith.constant 0 : i32
    %c0_i32_1 = arith.constant 0 : i32
    return %arg0, %c0_i32, %c0_i32_0 : i32, i32, i32
  }
}

module attributes {stable_mosaic.version = 11 : i64} {
  func.func @_bn_relu_kernel(%arg0: i32, %arg1: memref<4x1024xf32, #tpu.memory_space<vmem>>, %arg2: memref<1x1024xf32, #tpu.memory_space<vmem>>, %arg3: memref<1x1024xf32, #tpu.memory_space<vmem>>, %arg4: memref<4x1024xbf16, #tpu.memory_space<vmem>>) attributes {dimension_semantics = [#tpu.dimension_semantics<parallel>], iteration_bounds = array<i64: 1>, scalar_prefetch = 0 : i64, scratch_operands = 0 : i64, tpu.core_type = #tpu.core_type<tc>, window_params = [{transform_indices = @transform_0, window_bounds = array<i64: 4, 1024>}, {pipeline_mode = #tpu.pipeline_mode<synchronous>, transform_indices = @transform_1, window_bounds = array<i64: 1, 1024>}, {pipeline_mode = #tpu.pipeline_mode<synchronous>, transform_indices = @transform_2, window_bounds = array<i64: 1, 1024>}, {transform_indices = @transform_3, window_bounds = array<i64: 4, 1024>}]} {
    %c0 = arith.constant 0 : index
    %c0_0 = arith.constant 0 : index
    %0 = vector.load %arg1[%c0, %c0_0] : memref<4x1024xf32, #tpu.memory_space<vmem>>, vector<4x1024xf32>
    %c0_1 = arith.constant 0 : index
    %c0_2 = arith.constant 0 : index
    %1 = vector.load %arg2[%c0_1, %c0_2] : memref<1x1024xf32, #tpu.memory_space<vmem>>, vector<1x1024xf32>
    %2 = vector.broadcast %1 : vector<1x1024xf32> to vector<4x1024xf32>
    %3 = arith.mulf %0, %2 : vector<4x1024xf32>
    %c0_3 = arith.constant 0 : index
    %c0_4 = arith.constant 0 : index
    %4 = vector.load %arg3[%c0_3, %c0_4] : memref<1x1024xf32, #tpu.memory_space<vmem>>, vector<1x1024xf32>
    %5 = vector.broadcast %4 : vector<1x1024xf32> to vector<4x1024xf32>
    %6 = arith.addf %3, %5 : vector<4x1024xf32>
    %cst = arith.constant 0.000000e+00 : f32
    %7 = vector.broadcast %cst : f32 to vector<4x1024xf32>
    %8 = arith.maximumf %6, %7 : vector<4x1024xf32>
    %9 = arith.truncf %8 : vector<4x1024xf32> to vector<4x1024xbf16>
    %c0_5 = arith.constant 0 : index
    %c0_6 = arith.constant 0 : index
    %10 = vector.load %arg4[%c0_5, %c0_6] : memref<4x1024xbf16, #tpu.memory_space<vmem>>, vector<4x1024xbf16>
    tpu.vector_store %arg4[%c0_5, %c0_6], %9 {strides = array<i32>} : memref<4x1024xbf16, #tpu.memory_space<vmem>>, vector<4x1024xbf16>,
    return
  }
  func.func @transform_0(%arg0: i32) -> (i32, i32) {
    %c0_i32 = arith.constant 0 : i32
    %c0_i32_0 = arith.constant 0 : i32
    return %arg0, %c0_i32 : i32, i32
  }
  func.func @transform_1(%arg0: i32) -> (i32, i32) {
    %c0_i32 = arith.constant 0 : i32
    %c0_i32_0 = arith.constant 0 : i32
    %c0_i32_1 = arith.constant 0 : i32
    return %c0_i32, %c0_i32_0 : i32, i32
  }
  func.func @transform_2(%arg0: i32) -> (i32, i32) {
    %c0_i32 = arith.constant 0 : i32
    %c0_i32_0 = arith.constant 0 : i32
    %c0_i32_1 = arith.constant 0 : i32
    return %c0_i32, %c0_i32_0 : i32, i32
  }
  func.func @transform_3(%arg0: i32) -> (i32, i32) {
    %c0_i32 = arith.constant 0 : i32
    %c0_i32_0 = arith.constant 0 : i32
    return %arg0, %c0_i32 : i32, i32
  }
}

module attributes {stable_mosaic.version = 11 : i64} {
  func.func @_mm_stats_kernel(%arg0: i32, %arg1: memref<64x576xbf16, #tpu.memory_space<vmem>>, %arg2: memref<576x128xbf16, #tpu.memory_space<vmem>>, %arg3: memref<64x128xf32, #tpu.memory_space<vmem>>, %arg4: memref<1x2x128xf32, #tpu.memory_space<vmem>>) attributes {dimension_semantics = [#tpu.dimension_semantics<parallel>], iteration_bounds = array<i64: 1>, scalar_prefetch = 0 : i64, scratch_operands = 0 : i64, tpu.core_type = #tpu.core_type<tc>, window_params = [{transform_indices = @transform_0, window_bounds = array<i64: 64, 576>}, {pipeline_mode = #tpu.pipeline_mode<synchronous>, transform_indices = @transform_1, window_bounds = array<i64: 576, 128>}, {transform_indices = @transform_2, window_bounds = array<i64: 64, 128>}, {transform_indices = @transform_3, window_bounds = array<i64: 1, 2, 128>}]} {
    %c0 = arith.constant 0 : index
    %c0_0 = arith.constant 0 : index
    %0 = vector.load %arg1[%c0, %c0_0] : memref<64x576xbf16, #tpu.memory_space<vmem>>, vector<64x576xbf16>
    %c0_1 = arith.constant 0 : index
    %c0_2 = arith.constant 0 : index
    %1 = vector.load %arg2[%c0_1, %c0_2] : memref<576x128xbf16, #tpu.memory_space<vmem>>, vector<576x128xbf16>
    %cst = arith.constant dense<0.000000e+00> : vector<64x128xf32>
    %2 = tpu.matmul %0, %1, %cst {dimension_numbers = #tpu.dot_dimension_numbers<[1], [0], [0], [1], [0, 0, 1, 1], [], []>} : vector<64x576xbf16>, vector<576x128xbf16>, vector<64x128xf32> -> vector<64x128xf32>
    %c0_3 = arith.constant 0 : index
    %c0_4 = arith.constant 0 : index
    %3 = vector.load %arg3[%c0_3, %c0_4] : memref<64x128xf32, #tpu.memory_space<vmem>>, vector<64x128xf32>
    tpu.vector_store %arg3[%c0_3, %c0_4], %2 {strides = array<i32>} : memref<64x128xf32, #tpu.memory_space<vmem>>, vector<64x128xf32>,
    %cst_5 = arith.constant dense<0.000000e+00> : vector<128xf32>
    %4 = vector.multi_reduction <add>, %2, %cst_5 [0] : vector<64x128xf32> to vector<128xf32>
    %5 = vector.shape_cast %4 : vector<128xf32> to vector<1x128xf32>
    %6 = arith.mulf %2, %2 : vector<64x128xf32>
    %cst_6 = arith.constant dense<0.000000e+00> : vector<128xf32>
    %7 = vector.multi_reduction <add>, %6, %cst_6 [0] : vector<64x128xf32> to vector<128xf32>
    %8 = vector.shape_cast %7 : vector<128xf32> to vector<1x128xf32>
    %9 = tpu.concatenate %5, %8 in 0 : vector<1x128xf32>, vector<1x128xf32> -> vector<2x128xf32>
    %c0_7 = arith.constant 0 : index
    %c0_8 = arith.constant 0 : index
    %c0_9 = arith.constant 0 : index
    %10 = vector.load %arg4[%c0_7, %c0_8, %c0_9] : memref<1x2x128xf32, #tpu.memory_space<vmem>>, vector<1x2x128xf32>
    %11 = vector.shape_cast %10 : vector<1x2x128xf32> to vector<2x128xf32>
    %12 = vector.shape_cast %9 : vector<2x128xf32> to vector<1x2x128xf32>
    tpu.vector_store %arg4[%c0_7, %c0_8, %c0_9], %12 {strides = array<i32>} : memref<1x2x128xf32, #tpu.memory_space<vmem>>, vector<1x2x128xf32>,
    return
  }
  func.func @transform_0(%arg0: i32) -> (i32, i32) {
    %c0_i32 = arith.constant 0 : i32
    %c0_i32_0 = arith.constant 0 : i32
    return %arg0, %c0_i32 : i32, i32
  }
  func.func @transform_1(%arg0: i32) -> (i32, i32) {
    %c0_i32 = arith.constant 0 : i32
    %c0_i32_0 = arith.constant 0 : i32
    %c0_i32_1 = arith.constant 0 : i32
    return %c0_i32, %c0_i32_0 : i32, i32
  }
  func.func @transform_2(%arg0: i32) -> (i32, i32) {
    %c0_i32 = arith.constant 0 : i32
    %c0_i32_0 = arith.constant 0 : i32
    return %arg0, %c0_i32 : i32, i32
  }
  func.func @transform_3(%arg0: i32) -> (i32, i32, i32) {
    %c0_i32 = arith.constant 0 : i32
    %c0_i32_0 = arith.constant 0 : i32
    %c0_i32_1 = arith.constant 0 : i32
    return %arg0, %c0_i32, %c0_i32_0 : i32, i32, i32
  }
}

module attributes {stable_mosaic.version = 11 : i64} {
  func.func @_bn_relu_kernel(%arg0: i32, %arg1: memref<64x128xf32, #tpu.memory_space<vmem>>, %arg2: memref<1x128xf32, #tpu.memory_space<vmem>>, %arg3: memref<1x128xf32, #tpu.memory_space<vmem>>, %arg4: memref<64x128xbf16, #tpu.memory_space<vmem>>) attributes {dimension_semantics = [#tpu.dimension_semantics<parallel>], iteration_bounds = array<i64: 1>, scalar_prefetch = 0 : i64, scratch_operands = 0 : i64, tpu.core_type = #tpu.core_type<tc>, window_params = [{transform_indices = @transform_0, window_bounds = array<i64: 64, 128>}, {pipeline_mode = #tpu.pipeline_mode<synchronous>, transform_indices = @transform_1, window_bounds = array<i64: 1, 128>}, {pipeline_mode = #tpu.pipeline_mode<synchronous>, transform_indices = @transform_2, window_bounds = array<i64: 1, 128>}, {transform_indices = @transform_3, window_bounds = array<i64: 64, 128>}]} {
    %c0 = arith.constant 0 : index
    %c0_0 = arith.constant 0 : index
    %0 = vector.load %arg1[%c0, %c0_0] : memref<64x128xf32, #tpu.memory_space<vmem>>, vector<64x128xf32>
    %c0_1 = arith.constant 0 : index
    %c0_2 = arith.constant 0 : index
    %1 = vector.load %arg2[%c0_1, %c0_2] : memref<1x128xf32, #tpu.memory_space<vmem>>, vector<1x128xf32>
    %2 = vector.broadcast %1 : vector<1x128xf32> to vector<64x128xf32>
    %3 = arith.mulf %0, %2 : vector<64x128xf32>
    %c0_3 = arith.constant 0 : index
    %c0_4 = arith.constant 0 : index
    %4 = vector.load %arg3[%c0_3, %c0_4] : memref<1x128xf32, #tpu.memory_space<vmem>>, vector<1x128xf32>
    %5 = vector.broadcast %4 : vector<1x128xf32> to vector<64x128xf32>
    %6 = arith.addf %3, %5 : vector<64x128xf32>
    %cst = arith.constant 0.000000e+00 : f32
    %7 = vector.broadcast %cst : f32 to vector<64x128xf32>
    %8 = arith.maximumf %6, %7 : vector<64x128xf32>
    %9 = arith.truncf %8 : vector<64x128xf32> to vector<64x128xbf16>
    %c0_5 = arith.constant 0 : index
    %c0_6 = arith.constant 0 : index
    %10 = vector.load %arg4[%c0_5, %c0_6] : memref<64x128xbf16, #tpu.memory_space<vmem>>, vector<64x128xbf16>
    tpu.vector_store %arg4[%c0_5, %c0_6], %9 {strides = array<i32>} : memref<64x128xbf16, #tpu.memory_space<vmem>>, vector<64x128xbf16>,
    return
  }
  func.func @transform_0(%arg0: i32) -> (i32, i32) {
    %c0_i32 = arith.constant 0 : i32
    %c0_i32_0 = arith.constant 0 : i32
    return %arg0, %c0_i32 : i32, i32
  }
  func.func @transform_1(%arg0: i32) -> (i32, i32) {
    %c0_i32 = arith.constant 0 : i32
    %c0_i32_0 = arith.constant 0 : i32
    %c0_i32_1 = arith.constant 0 : i32
    return %c0_i32, %c0_i32_0 : i32, i32
  }
  func.func @transform_2(%arg0: i32) -> (i32, i32) {
    %c0_i32 = arith.constant 0 : i32
    %c0_i32_0 = arith.constant 0 : i32
    %c0_i32_1 = arith.constant 0 : i32
    return %c0_i32, %c0_i32_0 : i32, i32
  }
  func.func @transform_3(%arg0: i32) -> (i32, i32) {
    %c0_i32 = arith.constant 0 : i32
    %c0_i32_0 = arith.constant 0 : i32
    return %arg0, %c0_i32 : i32, i32
  }
}

module attributes {stable_mosaic.version = 11 : i64} {
  func.func @_mm_stats_kernel(%arg0: i32, %arg1: memref<128x576xbf16, #tpu.memory_space<vmem>>, %arg2: memref<576x128xbf16, #tpu.memory_space<vmem>>, %arg3: memref<128x128xf32, #tpu.memory_space<vmem>>, %arg4: memref<1x2x128xf32, #tpu.memory_space<vmem>>) attributes {dimension_semantics = [#tpu.dimension_semantics<parallel>], iteration_bounds = array<i64: 1>, scalar_prefetch = 0 : i64, scratch_operands = 0 : i64, tpu.core_type = #tpu.core_type<tc>, window_params = [{transform_indices = @transform_0, window_bounds = array<i64: 128, 576>}, {pipeline_mode = #tpu.pipeline_mode<synchronous>, transform_indices = @transform_1, window_bounds = array<i64: 576, 128>}, {transform_indices = @transform_2, window_bounds = array<i64: 128, 128>}, {transform_indices = @transform_3, window_bounds = array<i64: 1, 2, 128>}]} {
    %c0 = arith.constant 0 : index
    %c0_0 = arith.constant 0 : index
    %0 = vector.load %arg1[%c0, %c0_0] : memref<128x576xbf16, #tpu.memory_space<vmem>>, vector<128x576xbf16>
    %c0_1 = arith.constant 0 : index
    %c0_2 = arith.constant 0 : index
    %1 = vector.load %arg2[%c0_1, %c0_2] : memref<576x128xbf16, #tpu.memory_space<vmem>>, vector<576x128xbf16>
    %cst = arith.constant dense<0.000000e+00> : vector<128x128xf32>
    %2 = tpu.matmul %0, %1, %cst {dimension_numbers = #tpu.dot_dimension_numbers<[1], [0], [0], [1], [0, 0, 1, 1], [], []>} : vector<128x576xbf16>, vector<576x128xbf16>, vector<128x128xf32> -> vector<128x128xf32>
    %c0_3 = arith.constant 0 : index
    %c0_4 = arith.constant 0 : index
    %3 = vector.load %arg3[%c0_3, %c0_4] : memref<128x128xf32, #tpu.memory_space<vmem>>, vector<128x128xf32>
    tpu.vector_store %arg3[%c0_3, %c0_4], %2 {strides = array<i32>} : memref<128x128xf32, #tpu.memory_space<vmem>>, vector<128x128xf32>,
    %cst_5 = arith.constant dense<0.000000e+00> : vector<128xf32>
    %4 = vector.multi_reduction <add>, %2, %cst_5 [0] : vector<128x128xf32> to vector<128xf32>
    %5 = vector.shape_cast %4 : vector<128xf32> to vector<1x128xf32>
    %6 = arith.mulf %2, %2 : vector<128x128xf32>
    %cst_6 = arith.constant dense<0.000000e+00> : vector<128xf32>
    %7 = vector.multi_reduction <add>, %6, %cst_6 [0] : vector<128x128xf32> to vector<128xf32>
    %8 = vector.shape_cast %7 : vector<128xf32> to vector<1x128xf32>
    %9 = tpu.concatenate %5, %8 in 0 : vector<1x128xf32>, vector<1x128xf32> -> vector<2x128xf32>
    %c0_7 = arith.constant 0 : index
    %c0_8 = arith.constant 0 : index
    %c0_9 = arith.constant 0 : index
    %10 = vector.load %arg4[%c0_7, %c0_8, %c0_9] : memref<1x2x128xf32, #tpu.memory_space<vmem>>, vector<1x2x128xf32>
    %11 = vector.shape_cast %10 : vector<1x2x128xf32> to vector<2x128xf32>
    %12 = vector.shape_cast %9 : vector<2x128xf32> to vector<1x2x128xf32>
    tpu.vector_store %arg4[%c0_7, %c0_8, %c0_9], %12 {strides = array<i32>} : memref<1x2x128xf32, #tpu.memory_space<vmem>>, vector<1x2x128xf32>,
    return
  }
  func.func @transform_0(%arg0: i32) -> (i32, i32) {
    %c0_i32 = arith.constant 0 : i32
    %c0_i32_0 = arith.constant 0 : i32
    return %arg0, %c0_i32 : i32, i32
  }
  func.func @transform_1(%arg0: i32) -> (i32, i32) {
    %c0_i32 = arith.constant 0 : i32
    %c0_i32_0 = arith.constant 0 : i32
    %c0_i32_1 = arith.constant 0 : i32
    return %c0_i32, %c0_i32_0 : i32, i32
  }
  func.func @transform_2(%arg0: i32) -> (i32, i32) {
    %c0_i32 = arith.constant 0 : i32
    %c0_i32_0 = arith.constant 0 : i32
    return %arg0, %c0_i32 : i32, i32
  }
  func.func @transform_3(%arg0: i32) -> (i32, i32, i32) {
    %c0_i32 = arith.constant 0 : i32
    %c0_i32_0 = arith.constant 0 : i32
    %c0_i32_1 = arith.constant 0 : i32
    return %arg0, %c0_i32, %c0_i32_0 : i32, i32, i32
  }
}

module attributes {stable_mosaic.version = 11 : i64} {
  func.func @_bn_relu_kernel(%arg0: i32, %arg1: memref<64x128xf32, #tpu.memory_space<vmem>>, %arg2: memref<1x128xf32, #tpu.memory_space<vmem>>, %arg3: memref<1x128xf32, #tpu.memory_space<vmem>>, %arg4: memref<64x128xbf16, #tpu.memory_space<vmem>>) attributes {dimension_semantics = [#tpu.dimension_semantics<parallel>], iteration_bounds = array<i64: 2>, scalar_prefetch = 0 : i64, scratch_operands = 0 : i64, tpu.core_type = #tpu.core_type<tc>, window_params = [{transform_indices = @transform_0, window_bounds = array<i64: 64, 128>}, {pipeline_mode = #tpu.pipeline_mode<synchronous>, transform_indices = @transform_1, window_bounds = array<i64: 1, 128>}, {pipeline_mode = #tpu.pipeline_mode<synchronous>, transform_indices = @transform_2, window_bounds = array<i64: 1, 128>}, {transform_indices = @transform_3, window_bounds = array<i64: 64, 128>}]} {
    %c0 = arith.constant 0 : index
    %c0_0 = arith.constant 0 : index
    %0 = vector.load %arg1[%c0, %c0_0] : memref<64x128xf32, #tpu.memory_space<vmem>>, vector<64x128xf32>
    %c0_1 = arith.constant 0 : index
    %c0_2 = arith.constant 0 : index
    %1 = vector.load %arg2[%c0_1, %c0_2] : memref<1x128xf32, #tpu.memory_space<vmem>>, vector<1x128xf32>
    %2 = vector.broadcast %1 : vector<1x128xf32> to vector<64x128xf32>
    %3 = arith.mulf %0, %2 : vector<64x128xf32>
    %c0_3 = arith.constant 0 : index
    %c0_4 = arith.constant 0 : index
    %4 = vector.load %arg3[%c0_3, %c0_4] : memref<1x128xf32, #tpu.memory_space<vmem>>, vector<1x128xf32>
    %5 = vector.broadcast %4 : vector<1x128xf32> to vector<64x128xf32>
    %6 = arith.addf %3, %5 : vector<64x128xf32>
    %cst = arith.constant 0.000000e+00 : f32
    %7 = vector.broadcast %cst : f32 to vector<64x128xf32>
    %8 = arith.maximumf %6, %7 : vector<64x128xf32>
    %9 = arith.truncf %8 : vector<64x128xf32> to vector<64x128xbf16>
    %c0_5 = arith.constant 0 : index
    %c0_6 = arith.constant 0 : index
    %10 = vector.load %arg4[%c0_5, %c0_6] : memref<64x128xbf16, #tpu.memory_space<vmem>>, vector<64x128xbf16>
    tpu.vector_store %arg4[%c0_5, %c0_6], %9 {strides = array<i32>} : memref<64x128xbf16, #tpu.memory_space<vmem>>, vector<64x128xbf16>,
    return
  }
  func.func @transform_0(%arg0: i32) -> (i32, i32) {
    %c0_i32 = arith.constant 0 : i32
    %c0_i32_0 = arith.constant 0 : i32
    return %arg0, %c0_i32 : i32, i32
  }
  func.func @transform_1(%arg0: i32) -> (i32, i32) {
    %c0_i32 = arith.constant 0 : i32
    %c0_i32_0 = arith.constant 0 : i32
    %c0_i32_1 = arith.constant 0 : i32
    return %c0_i32, %c0_i32_0 : i32, i32
  }
  func.func @transform_2(%arg0: i32) -> (i32, i32) {
    %c0_i32 = arith.constant 0 : i32
    %c0_i32_0 = arith.constant 0 : i32
    %c0_i32_1 = arith.constant 0 : i32
    return %c0_i32, %c0_i32_0 : i32, i32
  }
  func.func @transform_3(%arg0: i32) -> (i32, i32) {
    %c0_i32 = arith.constant 0 : i32
    %c0_i32_0 = arith.constant 0 : i32
    return %arg0, %c0_i32 : i32, i32
  }
}

module attributes {stable_mosaic.version = 11 : i64} {
  func.func @_mm_stats_kernel(%arg0: i32, %arg1: memref<128x576xbf16, #tpu.memory_space<vmem>>, %arg2: memref<576x128xbf16, #tpu.memory_space<vmem>>, %arg3: memref<128x128xf32, #tpu.memory_space<vmem>>, %arg4: memref<1x2x128xf32, #tpu.memory_space<vmem>>) attributes {dimension_semantics = [#tpu.dimension_semantics<parallel>], iteration_bounds = array<i64: 2>, scalar_prefetch = 0 : i64, scratch_operands = 0 : i64, tpu.core_type = #tpu.core_type<tc>, window_params = [{transform_indices = @transform_0, window_bounds = array<i64: 128, 576>}, {pipeline_mode = #tpu.pipeline_mode<synchronous>, transform_indices = @transform_1, window_bounds = array<i64: 576, 128>}, {transform_indices = @transform_2, window_bounds = array<i64: 128, 128>}, {transform_indices = @transform_3, window_bounds = array<i64: 1, 2, 128>}]} {
    %c0 = arith.constant 0 : index
    %c0_0 = arith.constant 0 : index
    %0 = vector.load %arg1[%c0, %c0_0] : memref<128x576xbf16, #tpu.memory_space<vmem>>, vector<128x576xbf16>
    %c0_1 = arith.constant 0 : index
    %c0_2 = arith.constant 0 : index
    %1 = vector.load %arg2[%c0_1, %c0_2] : memref<576x128xbf16, #tpu.memory_space<vmem>>, vector<576x128xbf16>
    %cst = arith.constant dense<0.000000e+00> : vector<128x128xf32>
    %2 = tpu.matmul %0, %1, %cst {dimension_numbers = #tpu.dot_dimension_numbers<[1], [0], [0], [1], [0, 0, 1, 1], [], []>} : vector<128x576xbf16>, vector<576x128xbf16>, vector<128x128xf32> -> vector<128x128xf32>
    %c0_3 = arith.constant 0 : index
    %c0_4 = arith.constant 0 : index
    %3 = vector.load %arg3[%c0_3, %c0_4] : memref<128x128xf32, #tpu.memory_space<vmem>>, vector<128x128xf32>
    tpu.vector_store %arg3[%c0_3, %c0_4], %2 {strides = array<i32>} : memref<128x128xf32, #tpu.memory_space<vmem>>, vector<128x128xf32>,
    %cst_5 = arith.constant dense<0.000000e+00> : vector<128xf32>
    %4 = vector.multi_reduction <add>, %2, %cst_5 [0] : vector<128x128xf32> to vector<128xf32>
    %5 = vector.shape_cast %4 : vector<128xf32> to vector<1x128xf32>
    %6 = arith.mulf %2, %2 : vector<128x128xf32>
    %cst_6 = arith.constant dense<0.000000e+00> : vector<128xf32>
    %7 = vector.multi_reduction <add>, %6, %cst_6 [0] : vector<128x128xf32> to vector<128xf32>
    %8 = vector.shape_cast %7 : vector<128xf32> to vector<1x128xf32>
    %9 = tpu.concatenate %5, %8 in 0 : vector<1x128xf32>, vector<1x128xf32> -> vector<2x128xf32>
    %c0_7 = arith.constant 0 : index
    %c0_8 = arith.constant 0 : index
    %c0_9 = arith.constant 0 : index
    %10 = vector.load %arg4[%c0_7, %c0_8, %c0_9] : memref<1x2x128xf32, #tpu.memory_space<vmem>>, vector<1x2x128xf32>
    %11 = vector.shape_cast %10 : vector<1x2x128xf32> to vector<2x128xf32>
    %12 = vector.shape_cast %9 : vector<2x128xf32> to vector<1x2x128xf32>
    tpu.vector_store %arg4[%c0_7, %c0_8, %c0_9], %12 {strides = array<i32>} : memref<1x2x128xf32, #tpu.memory_space<vmem>>, vector<1x2x128xf32>,
    return
  }
  func.func @transform_0(%arg0: i32) -> (i32, i32) {
    %c0_i32 = arith.constant 0 : i32
    %c0_i32_0 = arith.constant 0 : i32
    return %arg0, %c0_i32 : i32, i32
  }
  func.func @transform_1(%arg0: i32) -> (i32, i32) {
    %c0_i32 = arith.constant 0 : i32
    %c0_i32_0 = arith.constant 0 : i32
    %c0_i32_1 = arith.constant 0 : i32
    return %c0_i32, %c0_i32_0 : i32, i32
  }
  func.func @transform_2(%arg0: i32) -> (i32, i32) {
    %c0_i32 = arith.constant 0 : i32
    %c0_i32_0 = arith.constant 0 : i32
    return %arg0, %c0_i32 : i32, i32
  }
  func.func @transform_3(%arg0: i32) -> (i32, i32, i32) {
    %c0_i32 = arith.constant 0 : i32
    %c0_i32_0 = arith.constant 0 : i32
    %c0_i32_1 = arith.constant 0 : i32
    return %arg0, %c0_i32, %c0_i32_0 : i32, i32, i32
  }
}

module attributes {stable_mosaic.version = 11 : i64} {
  func.func @_bn_relu_kernel(%arg0: i32, %arg1: memref<64x128xf32, #tpu.memory_space<vmem>>, %arg2: memref<1x128xf32, #tpu.memory_space<vmem>>, %arg3: memref<1x128xf32, #tpu.memory_space<vmem>>, %arg4: memref<64x128xbf16, #tpu.memory_space<vmem>>) attributes {dimension_semantics = [#tpu.dimension_semantics<parallel>], iteration_bounds = array<i64: 4>, scalar_prefetch = 0 : i64, scratch_operands = 0 : i64, tpu.core_type = #tpu.core_type<tc>, window_params = [{transform_indices = @transform_0, window_bounds = array<i64: 64, 128>}, {pipeline_mode = #tpu.pipeline_mode<synchronous>, transform_indices = @transform_1, window_bounds = array<i64: 1, 128>}, {pipeline_mode = #tpu.pipeline_mode<synchronous>, transform_indices = @transform_2, window_bounds = array<i64: 1, 128>}, {transform_indices = @transform_3, window_bounds = array<i64: 64, 128>}]} {
    %c0 = arith.constant 0 : index
    %c0_0 = arith.constant 0 : index
    %0 = vector.load %arg1[%c0, %c0_0] : memref<64x128xf32, #tpu.memory_space<vmem>>, vector<64x128xf32>
    %c0_1 = arith.constant 0 : index
    %c0_2 = arith.constant 0 : index
    %1 = vector.load %arg2[%c0_1, %c0_2] : memref<1x128xf32, #tpu.memory_space<vmem>>, vector<1x128xf32>
    %2 = vector.broadcast %1 : vector<1x128xf32> to vector<64x128xf32>
    %3 = arith.mulf %0, %2 : vector<64x128xf32>
    %c0_3 = arith.constant 0 : index
    %c0_4 = arith.constant 0 : index
    %4 = vector.load %arg3[%c0_3, %c0_4] : memref<1x128xf32, #tpu.memory_space<vmem>>, vector<1x128xf32>
    %5 = vector.broadcast %4 : vector<1x128xf32> to vector<64x128xf32>
    %6 = arith.addf %3, %5 : vector<64x128xf32>
    %cst = arith.constant 0.000000e+00 : f32
    %7 = vector.broadcast %cst : f32 to vector<64x128xf32>
    %8 = arith.maximumf %6, %7 : vector<64x128xf32>
    %9 = arith.truncf %8 : vector<64x128xf32> to vector<64x128xbf16>
    %c0_5 = arith.constant 0 : index
    %c0_6 = arith.constant 0 : index
    %10 = vector.load %arg4[%c0_5, %c0_6] : memref<64x128xbf16, #tpu.memory_space<vmem>>, vector<64x128xbf16>
    tpu.vector_store %arg4[%c0_5, %c0_6], %9 {strides = array<i32>} : memref<64x128xbf16, #tpu.memory_space<vmem>>, vector<64x128xbf16>,
    return
  }
  func.func @transform_0(%arg0: i32) -> (i32, i32) {
    %c0_i32 = arith.constant 0 : i32
    %c0_i32_0 = arith.constant 0 : i32
    return %arg0, %c0_i32 : i32, i32
  }
  func.func @transform_1(%arg0: i32) -> (i32, i32) {
    %c0_i32 = arith.constant 0 : i32
    %c0_i32_0 = arith.constant 0 : i32
    %c0_i32_1 = arith.constant 0 : i32
    return %c0_i32, %c0_i32_0 : i32, i32
  }
  func.func @transform_2(%arg0: i32) -> (i32, i32) {
    %c0_i32 = arith.constant 0 : i32
    %c0_i32_0 = arith.constant 0 : i32
    %c0_i32_1 = arith.constant 0 : i32
    return %c0_i32, %c0_i32_0 : i32, i32
  }
  func.func @transform_3(%arg0: i32) -> (i32, i32) {
    %c0_i32 = arith.constant 0 : i32
    %c0_i32_0 = arith.constant 0 : i32
    return %arg0, %c0_i32 : i32, i32
  }
}

module attributes {stable_mosaic.version = 11 : i64} {
  func.func @_conv1x1_tanh_kernel(%arg0: i32, %arg1: memref<3x8xbf16, #tpu.memory_space<vmem>>, %arg2: memref<1x8x784xbf16, #tpu.memory_space<vmem>>, %arg3: memref<1x3x784xf32, #tpu.memory_space<vmem>>) attributes {dimension_semantics = [#tpu.dimension_semantics<parallel>], iteration_bounds = array<i64: 4>, scalar_prefetch = 0 : i64, scratch_operands = 0 : i64, tpu.core_type = #tpu.core_type<tc>, window_params = [{pipeline_mode = #tpu.pipeline_mode<synchronous>, transform_indices = @transform_0, window_bounds = array<i64: 3, 8>}, {transform_indices = @transform_1, window_bounds = array<i64: 1, 8, 784>}, {transform_indices = @transform_2, window_bounds = array<i64: 1, 3, 784>}]} {
    %c0 = arith.constant 0 : index
    %c0_0 = arith.constant 0 : index
    %0 = vector.load %arg1[%c0, %c0_0] : memref<3x8xbf16, #tpu.memory_space<vmem>>, vector<3x8xbf16>
    %c0_1 = arith.constant 0 : index
    %c0_2 = arith.constant 0 : index
    %c0_3 = arith.constant 0 : index
    %1 = vector.load %arg2[%c0_1, %c0_2, %c0_3] : memref<1x8x784xbf16, #tpu.memory_space<vmem>>, vector<1x8x784xbf16>
    %2 = vector.shape_cast %1 : vector<1x8x784xbf16> to vector<8x784xbf16>
    %cst = arith.constant dense<0.000000e+00> : vector<3x784xf32>
    %3 = tpu.matmul %0, %2, %cst {dimension_numbers = #tpu.dot_dimension_numbers<[1], [0], [0], [1], [0, 0, 1, 1], [], []>} : vector<3x8xbf16>, vector<8x784xbf16>, vector<3x784xf32> -> vector<3x784xf32>
    %4 = math.tanh %3 : vector<3x784xf32>
    %c0_4 = arith.constant 0 : index
    %c0_5 = arith.constant 0 : index
    %c0_6 = arith.constant 0 : index
    %5 = vector.load %arg3[%c0_4, %c0_5, %c0_6] : memref<1x3x784xf32, #tpu.memory_space<vmem>>, vector<1x3x784xf32>
    %6 = vector.shape_cast %5 : vector<1x3x784xf32> to vector<3x784xf32>
    %7 = vector.shape_cast %4 : vector<3x784xf32> to vector<1x3x784xf32>
    tpu.vector_store %arg3[%c0_4, %c0_5, %c0_6], %7 {strides = array<i32>} : memref<1x3x784xf32, #tpu.memory_space<vmem>>, vector<1x3x784xf32>,
    return
  }
  func.func @transform_0(%arg0: i32) -> (i32, i32) {
    %c0_i32 = arith.constant 0 : i32
    %c0_i32_0 = arith.constant 0 : i32
    %c0_i32_1 = arith.constant 0 : i32
    return %c0_i32, %c0_i32_0 : i32, i32
  }
  func.func @transform_1(%arg0: i32) -> (i32, i32, i32) {
    %c0_i32 = arith.constant 0 : i32
    %c0_i32_0 = arith.constant 0 : i32
    %c0_i32_1 = arith.constant 0 : i32
    return %arg0, %c0_i32, %c0_i32_0 : i32, i32, i32
  }
  func.func @transform_2(%arg0: i32) -> (i32, i32, i32) {
    %c0_i32 = arith.constant 0 : i32
    %c0_i32_0 = arith.constant 0 : i32
    %c0_i32_1 = arith.constant 0 : i32
    return %arg0, %c0_i32, %c0_i32_0 : i32, i32, i32
  }
}

</mosaic_0001>

<bundles_post_ra>
// kernel: tile.43
= control target key start
LH: loop header
LB: loop body
LE: loop exit
PB: predicated region body
PF: predicated region fallthrough
CT: control target
= control target key end

     0   :  { %s28_s0 = inlined_call_operand.vmem [shape: f32[64], index: 0, kind: input, shape index: {}]   ;;  %s29_s1 = inlined_call_operand.vmem [shape: f32[16,64], index: 1, kind: output, shape index: {}]  }
   0x1   :  { %v4_v0 = vld [vmem:[%s28_s0] ss:$0 sm:$0xff] }
   0x2   :  { %5 = vst [vmem:[%s29_s1] sm:$0xff] %v4_v0  ;;  %8 = vst [vmem:[%s29_s1 + $0x8] sm:$0xff] %v4_v0 }

// kernel: tile.48
= control target key start
LH: loop header
LB: loop body
LE: loop exit
PB: predicated region body
PF: predicated region fallthrough
CT: control target
= control target key end

     0   :  { %vm3_vm0 = vcmask 523264   ;;  %vm10_vm1 = vcmask 1048064   ;;  %s125_s0 = inlined_call_operand.vmem [shape: f32[16,64], index: 0, kind: input, shape index: {}]   ;;  %s126_s1 = inlined_call_operand.vmem [shape: f32[1,1024], index: 1, kind: output, shape index: {}]  }
   0x1   :  { %v75_v0 = vld [vmem:[%s125_s0 + $0x1] ss:$2 sm:$0xff]   ;;  %v2_v1 = vld [vmem:[%s125_s0] ss:$2 sm:$0xff]   ;;  %s84_s0 = smov 64  }
   0x2   :  { %8 = vrot.lane.b32.xlu0 %v75_v0, %s84_s0  ;;  %4 = vst.msk [vmem:[#allocation0] ss:$8 sm:$0xf] %vm3_vm0, %v2_v1   ;;  %5 = vst.msk [vmem:[#allocation0] ss:$8 sm:$0xf0] %vm3_vm0, %v2_v1  }
  0x74   :  { %v9_v2 = vpop.permute.xlu0 %8  }
  0x75   :  { %11 = vst.msk [vmem:[#allocation0] ss:$8 sm:$0xf] %vm10_vm1, %v9_v2   ;;  %12 = vst.msk [vmem:[#allocation0] ss:$8 sm:$0xf0] %vm10_vm1, %v9_v2  }
  0x7c   :  { %v17_v3 = vld [vmem:[#allocation0] sm:$0x1]  ;;  %v22_v4 = vld [vmem:[#allocation0 + $0x8] sm:$0x1]  ;;  %v28_v5 = vld [vmem:[#allocation0 + $0x10] sm:$0x1] }
  0x7d   :  { %20 = vst [vmem:[%s126_s1] sm:$0x1] %v17_v3  ;;  %76 = vst [vmem:[%s126_s1 + $0x1] sm:$0x1] %v22_v4  ;;  %v35_v6 = vld [vmem:[#allocation0 + $0x18] sm:$0x1] }
  0x7e   :  { %77 = vst [vmem:[%s126_s1 + $0x2] sm:$0x1] %v28_v5  ;;  %v42_v7 = vld [vmem:[#allocation0 + $0x20] sm:$0x1]  ;;  %v49_v8 = vld [vmem:[#allocation0 + $0x28] sm:$0x1] }
  0x7f   :  { %78 = vst [vmem:[%s126_s1 + $0x3] sm:$0x1] %v35_v6  ;;  %79 = vst [vmem:[%s126_s1 + $0x4] sm:$0x1] %v42_v7  ;;  %v56_v9 = vld [vmem:[#allocation0 + $0x30] sm:$0x1] }
  0x80   :  { %80 = vst [vmem:[%s126_s1 + $0x5] sm:$0x1] %v49_v8  ;;  %v63_v10 = vld [vmem:[#allocation0 + $0x38] sm:$0x1]  ;;  %81 = vst [vmem:[%s126_s1 + $0x6] sm:$0x1] %v56_v9 }
  0x81   :  { %82 = vst [vmem:[%s126_s1 + $0x7] sm:$0x1] %v63_v10 }

// kernel: a_call__.9
= control target key start
LH: loop header
LB: loop body
LE: loop exit
PB: predicated region body
PF: predicated region fallthrough
CT: control target
= control target key end

     0   :  { %9 = vsyncpa [#allocation3], 0  ;;  %s489_s12 = smov [#allocation2]   ;;  %s583_s0 = inlined_call_operand.vmem [shape: bf16[4,16], index: 0, kind: input, shape index: {}]   ;;  %s584_s1 = inlined_call_operand.hbm [shape: bf16[16,1024], index: 1, kind: input, shape index: {}]   ;;  %s585_s2 = inlined_call_operand.vmem [shape: f32[4,1024], index: 2, kind: output, shape index: {0}]   ;;  %s586_s3 = inlined_call_operand.vmem [shape: f32[1,2,1024], index: 3, kind: output, shape index: {1}]  }
   0x1   :  { %s17_s13 = sshll.u32 %s489_s12, 4  ;;  %s18_s13 = int_to_ptr.vmem [resolvable:$true] %s17_s13 }
   0x2   :  { %s475_s14 = scalar_lea.vmem %s18_s13, 1024  ;;  %p480_p1 = scmp.lt.s32.totalorder %s18_s13, %s18_s13 }
   0x3   :  { %p476_p0 = scmp.ne.s32.totalorder %s18_s13, %s475_s14  ;;  %p481_p2 = scmp.lt.s32.totalorder %s475_s14, %s475_s14 }
   0x5   :  { %p482_p3 = por %p481_p2, %p480_p1 }
   0x7   :  { %p483_p4 = pnand %p482_p3, %p476_p0 }
   0x9   :  { %486 = shalt.err (!%p483_p4)
}
   0xa   :  { %s490_s15 = smov 512   ;;  %s491_s16 = smov 32  }
   0xb   :  { %23 = dma.hbm_to_vmem [thread:$0]  %s584_s1, 1024, %s18_s13, [#allocation3], %s490_s15, %s490_s15, %s491_s16  }
   0xc   :  { %487 = dma.done.wait [#allocation3], 1024  }
   0xd   :  { %488 = vsyncadd [#allocation3], 4294966272  ;;  %v492_v0 = vmov 0   ;;  %v29_v1 = vld [vmem:[#allocation2] sm:$0xff]  ;;  %v30_v3 = vld [vmem:[#allocation2 + $0x8] sm:$0xff]  ;;  %vm77_vm0 = vcmask 130048   ;;  %v408_v28 = vlaneseq }
   0xe   :  { %113 = vmatprep.mubr.bf16.mxu0 %v492_v0  ;;  %154 = vmatprep.mubr.bf16.mxu1 %v492_v0  ;;  %v33_v2 = vld [vmem:[#allocation2 + $0x20] sm:$0xff]  ;;  %v34_v5 = vld [vmem:[#allocation2 + $0x28] sm:$0xff]  ;;  %v31_v7 = vld [vmem:[#allocation2 + $0x10] sm:$0xff]  ;;  %vm265_vm1 = vcmask 1043456   ;;  %v493_v22 = vmov 1983009808  }
   0xf   :  { %v451_v4 = vcombine.high %v29_v1, %v33_v2  ;;  %v450_v6 = vcombine.low %v29_v1, %v33_v2  ;;  %v453_v8 = vcombine.high %v30_v3, %v34_v5  ;;  %v452_v9 = vcombine.low %v30_v3, %v34_v5  ;;  %v35_v10 = vld [vmem:[#allocation2 + $0x30] sm:$0xff]  ;;  %v32_v11 = vld [vmem:[#allocation2 + $0x18] sm:$0xff]  ;;  %v28_v15 = vld [vmem:[%s583_s0] sm:$0x3] }
  0x10   :  { %v36_v12 = vld [vmem:[#allocation2 + $0x38] sm:$0xff]  ;;  %v455_v13 = vcombine.high %v31_v7, %v35_v10  ;;  %v454_v16 = vcombine.low %v31_v7, %v35_v10  ;;  %v521_v23 = vunpack.c.l.s4 %v493_v22  ;;  %v409_v3 = vshrl.u32 %v408_v28, 7 }
  0x11   :  { %95 = vmatprep.subr.bf16.mxu0 %v451_v4  ;;  %v457_v14 = vcombine.high %v32_v11, %v36_v12  ;;  %136 = vmatprep.subr.bf16.mxu1 %v453_v8  ;;  %v456_v17 = vcombine.low %v32_v11, %v36_v12  ;;  %vm386_vm2 = vcmask 1040384  }
  0x12   :  { %96 = vmatpush1.bf16.msra.mxu0 %v450_v6  ;;  %137 = vmatpush1.bf16.msra.mxu1 %v452_v9  ;;  %v407_v60 = vunpack.c.0.s8 %v521_v23 }
  0x13   :  { %177 = vmatprep.subr.bf16.mxu0 %v455_v13  ;;  %218 = vmatprep.subr.bf16.mxu1 %v457_v14 }
  0x14   :  { %v542_v22 = vsub.s32 %v407_v60, %v409_v3 }
  0x15   :  { %458 = vmatmul.mubr.msk.bf16.vlgmr.msra.gmra.mxu0 %vm77_vm0, %v28_v15  ;;  %459 = vmatmul.mubr.msk.bf16.vlgmr.msra.gmra.mxu1 %vm77_vm0, %v28_v15 }
  0x16   :  { %178 = vmatpush1.bf16.msra.mxu0 %v454_v16  ;;  %219 = vmatpush1.bf16.msra.mxu1 %v456_v17 }
  0x17   :  { %195 = vmatprep.mubr.bf16.mxu0 %v492_v0  ;;  %236 = vmatprep.mubr.bf16.mxu1 %v492_v0 }
  0x1d   :  { %460 = vmatmul.mubr.msk.bf16.vlgmr.msra.gmra.mxu0 %vm77_vm0, %v28_v15  ;;  %461 = vmatmul.mubr.msk.bf16.vlgmr.msra.gmra.mxu1 %vm77_vm0, %v28_v15 }
  0xd5   :  { %v115_v18 = vpop.f32.mrf.mxu0  ;;  %v156_v21 = vpop.f32.mrf.mxu1 }
  0xd6   :  { %v266_v19 = vsel %vm265_vm1, %v115_v18, 0.0  ;;  %v322_v20 = vmul.f32 %v115_v18, %v115_v18  ;;  %v280_v25 = vsel %vm265_vm1, %v156_v21, 0.0  ;;  %v324_v26 = vmul.f32 %v156_v21, %v156_v21 }
  0xd7   :  { %v267_v24 = vrot.slane %v266_v19, 4  ;;  %v117_v27 = vpop.f32.mrf.mxu0  ;;  %v281_v30 = vrot.slane %v280_v25, 4  ;;  %v158_v33 = vpop.f32.mrf.mxu1 }
  0xd8   :  { %v330_v29 = vsel %vm265_vm1, %v322_v20, 0.0  ;;  %v253_v31 = vcombine.low %v115_v18, %v117_v27  ;;  %v273_v32 = vsel %vm265_vm1, %v117_v27, 0.0  ;;  %v344_v36 = vsel %vm265_vm1, %v324_v26, 0.0 }
  0xd9   :  { %v268_v34 = vadd.f32 %v267_v24, %v266_v19  ;;  %v331_v35 = vrot.slane %v330_v29, 4  ;;  %v274_v37 = vrot.slane %v273_v32, 4  ;;  %v119_v38 = vpop.f32.mrf.mxu0  ;;  %v282_v39 = vadd.f32 %v281_v30, %v280_v25  ;;  %v160_v43 = vpop.f32.mrf.mxu1 }
  0xda   :  { %v345_v40 = vrot.slane %v344_v36, 4  ;;  %261 = vst [vmem:[%s585_s2] sm:$0xff] %v253_v31  ;;  %v323_v41 = vmul.f32 %v117_v27, %v117_v27  ;;  %v254_v42 = vcombine.low %v156_v21, %v158_v33  ;;  %v287_v47 = vsel %vm265_vm1, %v158_v33, 0.0 }
  0xdb   :  { %v269_v44 = vrot.slane %v268_v34, 2  ;;  %v332_v45 = vadd.f32 %v331_v35, %v330_v29  ;;  %v275_v46 = vadd.f32 %v274_v37, %v273_v32  ;;  %v120_v48 = vpop.f32.mrf.mxu0  ;;  %v283_v49 = vrot.slane %v282_v39, 2  ;;  %v161_v53 = vpop.f32.mrf.mxu1 }
  0xdc   :  { %v346_v50 = vadd.f32 %v345_v40, %v344_v36  ;;  %v337_v51 = vsel %vm265_vm1, %v323_v41, 0.0  ;;  %262 = vst [vmem:[%s585_s2 + $0x8] sm:$0xff] %v254_v42  ;;  %v288_v52 = vrot.slane %v287_v47, 4  ;;  %v325_v62 = vmul.f32 %v158_v33, %v158_v33 }
  0xdd   :  { %v270_v54 = vadd.f32 %v269_v44, %v268_v34  ;;  %v333_v55 = vrot.slane %v332_v45, 2  ;;  %v276_v56 = vrot.slane %v275_v46, 2  ;;  %v338_v57 = vrot.slane %v337_v51, 4  ;;  %v197_v58 = vpop.f32.mrf.mxu0  ;;  %v536_v63 = vpop.f32.mrf.mxu1 }
  0xde   :  { %v347_v59 = vrot.slane %v346_v50, 2  ;;  %v289_v61 = vadd.f32 %v288_v52, %v287_v47  ;;  %v284_v5 = vadd.f32 %v283_v49, %v282_v39  ;;  %v351_v8 = vsel %vm265_vm1, %v325_v62, 0.0 }
  0xdf   :  { %v334_v0 = vadd.f32 %v333_v55, %v332_v45  ;;  %v277_v1 = vadd.f32 %v276_v56, %v275_v46  ;;  %v339_v2 = vadd.f32 %v338_v57, %v337_v51  ;;  %v199_v4 = vpop.f32.mrf.mxu0  ;;  %v539_v9 = vpop.f32.mrf.mxu1  ;;  %v271_v10 = vrot.slane %v270_v54, 1 }
  0xe0   :  { %v348_v6 = vadd.f32 %v347_v59, %v346_v50  ;;  %v290_v7 = vrot.slane %v289_v61, 2  ;;  %v352_v16 = vrot.slane %v351_v8, 4  ;;  %v294_v19 = vsel %vm265_vm1, %v197_v58, 0.0 }
  0xe1   :  { %v335_v11 = vrot.slane %v334_v0, 1  ;;  %v340_v12 = vrot.slane %v339_v2, 2  ;;  %v201_v13 = vpop.f32.mrf.mxu0  ;;  %v278_v15 = vrot.slane %v277_v1, 1  ;;  %v242_v17 = vpop.f32.mrf.mxu1  ;;  %v285_v21 = vrot.slane %v284_v5, 1 }
  0xe2   :  { %v349_v14 = vrot.slane %v348_v6, 1  ;;  %v291_v23 = vadd.f32 %v290_v7, %v289_v61  ;;  %v353_v24 = vadd.f32 %v352_v16, %v351_v8  ;;  %v272_v26 = vadd.f32 %v271_v10, %v270_v54 }
  0xe3   :  { %v341_v18 = vadd.f32 %v340_v12, %v339_v2  ;;  %v202_v20 = vpop.f32.mrf.mxu0  ;;  %v243_v25 = vpop.f32.mrf.mxu1  ;;  %v336_v27 = vadd.f32 %v335_v11, %v334_v0  ;;  %v326_v29 = vmul.f32 %v197_v58, %v197_v58  ;;  %v279_v31 = vadd.f32 %v278_v15, %v277_v1 }
  0xe4   :  { %v350_v30 = vadd.f32 %v349_v14, %v348_v6  ;;  %v354_v32 = vrot.slane %v353_v24, 2  ;;  %v295_v33 = vrot.slane %v294_v19, 4  ;;  %v308_v36 = vsel %vm265_vm1, %v536_v63, 0.0 }
  0xe5   :  { %v342_v28 = vrot.slane %v341_v18, 1  ;;  %v358_v35 = vsel %vm265_vm1, %v326_v29, 0.0  ;;  %v328_v37 = vmul.f32 %v536_v63, %v536_v63  ;;  %v292_v38 = vrot.slane %v291_v23, 1 }
  0xe6   :  { %v355_v39 = vadd.f32 %v354_v32, %v353_v24  ;;  %v359_v40 = vrot.slane %v358_v35, 4  ;;  %v255_v41 = vcombine.low %v197_v58, %v199_v4  ;;  %v387_v42 = vsel %vm386_vm2, %v272_v26, %v336_v27 }
  0xe7   :  { %v343_v34 = vadd.f32 %v342_v28, %v341_v18  ;;  %v372_v44 = vsel %vm265_vm1, %v328_v37, 0.0  ;;  %v301_v45 = vsel %vm265_vm1, %v199_v4, 0.0  ;;  %v296_v47 = vadd.f32 %v295_v33, %v294_v19 }
  0xe8   :  { %v356_v46 = vrot.slane %v355_v39, 1  ;;  %v360_v48 = vadd.f32 %v359_v40, %v358_v35  ;;  %v309_v49 = vrot.slane %v308_v36, 4  ;;  %263 = vst [vmem:[%s585_s2 + $0x10] sm:$0xff] %v255_v41  ;;  %v373_v51 = vrot.slane %v372_v44, 4 }
  0xe9   :  { %v388_v43 = vsel %vm386_vm2, %v279_v31, %v343_v34  ;;  %v302_v52 = vrot.slane %v301_v45, 4  ;;  %v327_v53 = vmul.f32 %v199_v4, %v199_v4  ;;  %v286_v54 = vadd.f32 %v285_v21, %v284_v5 }
  0xea   :  { %v403_v50 = vcombine.low %v387_v42, %v388_v43  ;;  %v293_v55 = vadd.f32 %v292_v38, %v291_v23  ;;  %v357_v56 = vadd.f32 %v356_v46, %v355_v39  ;;  %v361_v57 = vrot.slane %v360_v48, 2 }
  0xeb   :  { %v374_v58 = vadd.f32 %v373_v51, %v372_v44  ;;  %v303_v59 = vadd.f32 %v302_v52, %v301_v45  ;;  %v365_v60 = vsel %vm265_vm1, %v327_v53, 0.0  ;;  %v389_v61 = vsel %vm386_vm2, %v286_v54, %v350_v30 }
  0xec   :  { %v390_v62 = vsel %vm386_vm2, %v293_v55, %v357_v56  ;;  %v297_v0 = vrot.slane %v296_v47, 2  ;;  %v366_v1 = vrot.slane %v365_v60, 4  ;;  %v411_v2 = vrot.slane %v403_v50, %v542_v22 }
  0xed   :  { %v404_v3 = vcombine.low %v389_v61, %v390_v62  ;;  %v310_v6 = vadd.f32 %v309_v49, %v308_v36  ;;  %v304_v7 = vrot.slane %v303_v59, 2  ;;  %v256_v5 = vcombine.low %v536_v63, %v539_v9 }
  0xee   :  { %v367_v4 = vadd.f32 %v366_v1, %v365_v60  ;;  %v315_v8 = vsel %vm265_vm1, %v539_v9, 0.0  ;;  %v362_v11 = vadd.f32 %v361_v57, %v360_v48  ;;  %v375_v12 = vrot.slane %v374_v58, 2 }
  0xef   :  { %v418_v10 = vrot.slane %v404_v3, %v542_v22  ;;  %v305_v13 = vadd.f32 %v304_v7, %v303_v59  ;;  %v298_v14 = vadd.f32 %v297_v0, %v296_v47  ;;  %264 = vst [vmem:[%s585_s2 + $0x18] sm:$0xff] %v256_v5  ;;  %v316_v16 = vrot.slane %v315_v8, 4 }
  0xf0   :  { %v368_v15 = vrot.slane %v367_v4, 2  ;;  %v329_v17 = vmul.f32 %v539_v9, %v539_v9  ;;  %v311_v63 = vrot.slane %v310_v6, 2  ;;  %v363_v23 = vrot.slane %v362_v11, 1 }
  0xf1   :  { %v419_v18 = vcombine.low %v411_v2, %v418_v10  ;;  %v317_v20 = vadd.f32 %v316_v16, %v315_v8  ;;  %v376_v24 = vadd.f32 %v375_v12, %v374_v58  ;;  %v306_v25 = vrot.slane %v305_v13, 1 }
  0xf2   :  { %v369_v19 = vadd.f32 %v368_v15, %v367_v4  ;;  %v379_v21 = vsel %vm265_vm1, %v329_v17, 0.0  ;;  %v299_v27 = vrot.slane %v298_v14, 1  ;;  %v312_v30 = vadd.f32 %v311_v63, %v310_v6 }
  0xf3   :  { %439 = vst [vmem:[%s586_s3] sm:$0xff] %v419_v18  ;;  %v380_v26 = vrot.slane %v379_v21, 4  ;;  %v318_v29 = vrot.slane %v317_v20, 2  ;;  %v364_v33 = vadd.f32 %v363_v23, %v362_v11  ;;  %v377_v34 = vrot.slane %v376_v24, 1 }
  0xf4   :  { %v370_v28 = vrot.slane %v369_v19, 1  ;;  %v307_v35 = vadd.f32 %v306_v25, %v305_v13  ;;  %v300_v37 = vadd.f32 %v299_v27, %v298_v14  ;;  %v313_v38 = vrot.slane %v312_v30, 1 }
  0xf5   :  { %v381_v31 = vadd.f32 %v380_v26, %v379_v21  ;;  %v319_v32 = vadd.f32 %v318_v29, %v317_v20  ;;  %v378_v43 = vadd.f32 %v377_v34, %v376_v24 }
  0xf6   :  { %v371_v9 = vadd.f32 %v370_v28, %v369_v19  ;;  %v391_v42 = vsel %vm386_vm2, %v300_v37, %v364_v33  ;;  %v314_v46 = vadd.f32 %v313_v38, %v312_v30 }
  0xf7   :  { %v382_v36 = vrot.slane %v381_v31, 2  ;;  %v320_v40 = vrot.slane %v319_v32, 1 }
  0xf8   :  { %v392_v39 = vsel %vm386_vm2, %v307_v35, %v371_v9  ;;  %v393_v49 = vsel %vm386_vm2, %v314_v46, %v378_v43 }
  0xf9   :  { %v383_v41 = vadd.f32 %v382_v36, %v381_v31  ;;  %v420_v45 = vcombine.low %v391_v42, %v392_v39  ;;  %v321_v47 = vadd.f32 %v320_v40, %v319_v32 }
  0xfb   :  { %v384_v44 = vrot.slane %v383_v41, 1  ;;  %v428_v51 = vrot.slane %v420_v45, %v542_v22 }
  0xfd   :  { %v385_v48 = vadd.f32 %v384_v44, %v383_v41 }
  0xff   :  { %v394_v50 = vsel %vm386_vm2, %v321_v47, %v385_v48 }
 0x100   :  { %v421_v52 = vcombine.low %v393_v49, %v394_v50 }
 0x102   :  { %v435_v53 = vrot.slane %v421_v52, %v542_v22 }
 0x104   :  { %v436_v54 = vcombine.low %v428_v51, %v435_v53 }
 0x106   :  { %440 = vst [vmem:[%s586_s3 + $0x8] sm:$0xff] %v436_v54 }
 0x107   :  { %449 = vsyncpa [#allocation3], 1 }

// kernel: a_call__.10
= control target key start
LH: loop header
LB: loop body
LE: loop exit
PB: predicated region body
PF: predicated region fallthrough
CT: control target
= control target key end

     0   :  { %v20_v0 = vlaneseq  ;;  %v189_v8 = vmov 1983009808   ;;  %s234_s1 = inlined_call_operand.vmem [shape: f32[1,1024], index: 1, kind: input, shape index: {}]   ;;  %s235_s2 = inlined_call_operand.vmem [shape: f32[1,1024], index: 2, kind: input, shape index: {}]   ;;  %s236_s0 = inlined_call_operand.vmem [shape: f32[4,1024], index: 0, kind: input, shape index: {}]   ;;  %s237_s3 = inlined_call_operand.vmem [shape: bf16[4,1024], index: 3, kind: output, shape index: {}]  }
   0x1   :  { %v18_v2 = vld [vmem:[%s234_s1] sm:$0xff]  ;;  %v145_v9 = vunpack.c.l.s4 %v189_v8  ;;  %v15_v18 = vld [vmem:[%s236_s0 + $0x8] sm:$0xff]  ;;  %v16_v29 = vld [vmem:[%s236_s0 + $0x10] sm:$0xff] }
   0x2   :  { %v21_v1 = vshrl.u32 %v20_v0, 7  ;;  %v64_v7 = vld [vmem:[%s235_s2] sm:$0xff]  ;;  %v17_v43 = vld [vmem:[%s236_s0 + $0x18] sm:$0xff] }
   0x3   :  { %v14_v17 = vld [vmem:[%s236_s0] sm:$0xff]  ;;  %v146_v42 = vunpack.c.0.s8 %v145_v9 }
   0x4   :  { %v22_v3 = vsub.s32 0, %v21_v1  ;;  %v26_v4 = vsub.s32 1, %v21_v1  ;;  %v30_v5 = vsub.s32 2, %v21_v1  ;;  %v34_v6 = vsub.s32 3, %v21_v1 }
   0x5   :  { %v38_v10 = vsub.s32 4, %v21_v1  ;;  %v42_v11 = vsub.s32 5, %v21_v1  ;;  %v46_v12 = vsub.s32 6, %v21_v1  ;;  %v50_v31 = vsub.s32 7, %v21_v1 }
   0x6   :  { %v23_v13 = vrot.slane %v18_v2, %v22_v3  ;;  %v27_v14 = vrot.slane %v18_v2, %v26_v4  ;;  %v31_v15 = vrot.slane %v18_v2, %v30_v5  ;;  %v35_v16 = vrot.slane %v18_v2, %v34_v6 }
   0x7   :  { %v69_v19 = vrot.slane %v64_v7, %v22_v3  ;;  %v73_v20 = vrot.slane %v64_v7, %v26_v4  ;;  %v77_v21 = vrot.slane %v64_v7, %v30_v5  ;;  %v81_v22 = vrot.slane %v64_v7, %v34_v6 }
   0x8   :  { %v52_v23 = vcombine.low %v23_v13, %v27_v14  ;;  %v53_v24 = vcombine.low %v31_v15, %v35_v16  ;;  %v39_v25 = vrot.slane %v18_v2, %v38_v10  ;;  %v43_v26 = vrot.slane %v18_v2, %v42_v11 }
   0x9   :  { %v98_v27 = vcombine.low %v69_v19, %v73_v20  ;;  %v99_v28 = vcombine.low %v77_v21, %v81_v22  ;;  %v47_v30 = vrot.slane %v18_v2, %v46_v12  ;;  %v85_v35 = vrot.slane %v64_v7, %v38_v10 }
   0xa   :  { %v60_v32 = vmul.f32 %v52_v23, %v14_v17  ;;  %v61_v33 = vmul.f32 %v53_v24, %v15_v18  ;;  %v54_v34 = vcombine.low %v39_v25, %v43_v26  ;;  %v51_v36 = vrot.slane %v18_v2, %v50_v31 }
   0xb   :  { %v89_v37 = vrot.slane %v64_v7, %v42_v11  ;;  %v93_v38 = vrot.slane %v64_v7, %v46_v12  ;;  %v97_v39 = vrot.slane %v64_v7, %v50_v31  ;;  %v149_v54 = vsub.s32 %v146_v42, %v21_v1 }
   0xc   :  { %v106_v40 = vadd.f32 %v98_v27, %v60_v32  ;;  %v107_v41 = vadd.f32 %v99_v28, %v61_v33  ;;  %v62_v44 = vmul.f32 %v54_v34, %v16_v29  ;;  %v55_v45 = vcombine.low %v47_v30, %v51_v36 }
   0xd   :  { %v100_v46 = vcombine.low %v85_v35, %v89_v37  ;;  %v101_v47 = vcombine.low %v93_v38, %v97_v39 }
   0xe   :  { %v110_v48 = vmax.f32 %v106_v40, 0.0  ;;  %v111_v49 = vmax.f32 %v107_v41, 0.0  ;;  %v63_v50 = vmul.f32 %v55_v45, %v17_v43 }
   0xf   :  { %v108_v51 = vadd.f32 %v100_v46, %v62_v44 }
  0x10   :  { %v118_v52 = vcombine.high %v110_v48, %v110_v48  ;;  %v119_v53 = vcombine.high %v111_v49, %v111_v49  ;;  %v109_v55 = vadd.f32 %v101_v47, %v63_v50 }
  0x11   :  { %v112_v56 = vmax.f32 %v108_v51, 0.0 }
  0x12   :  { %v184_v57 = vpack.c.bf16 %v118_v52, %v110_v48  ;;  %v185_v58 = vpack.c.bf16 %v119_v53, %v111_v49  ;;  %v113_v59 = vmax.f32 %v109_v55, 0.0 }
  0x13   :  { %v120_v60 = vcombine.high %v112_v56, %v112_v56 }
  0x14   :  { %v150_v61 = vrot.slane %v184_v57, %v149_v54  ;;  %v157_v62 = vrot.slane %v185_v58, %v149_v54  ;;  %v121_v63 = vcombine.high %v113_v59, %v113_v59 }
  0x15   :  { %v186_v0 = vpack.c.bf16 %v120_v60, %v112_v56 }
  0x16   :  { %v158_v2 = vcombine.low %v150_v61, %v157_v62  ;;  %v187_v3 = vpack.c.bf16 %v121_v63, %v113_v59 }
  0x17   :  { %v167_v4 = vrot.slane %v186_v0, %v149_v54 }
  0x18   :  { %178 = vst [vmem:[%s237_s3] sm:$0xff] %v158_v2  ;;  %v174_v5 = vrot.slane %v187_v3, %v149_v54 }
  0x1a   :  { %v175_v6 = vcombine.low %v167_v4, %v174_v5 }
  0x1c   :  { %179 = vst [vmem:[%s237_s3 + $0x8] sm:$0xff] %v175_v6 }

// kernel: tile.53
= control target key start
LH: loop header
LB: loop body
LE: loop exit
PB: predicated region body
PF: predicated region fallthrough
CT: control target
= control target key end

     0   :  { %s22_s0 = inlined_call_operand.vmem [shape: f32[32], index: 0, kind: input, shape index: {}]   ;;  %s23_s1 = inlined_call_operand.vmem [shape: f32[4,32], index: 1, kind: output, shape index: {}]  }
   0x1   :  { %v4_v0 = vld [vmem:[%s22_s0] ss:$0 sm:$0xff] }
   0x2   :  { %5 = vst [vmem:[%s23_s1] sm:$0xf] %v4_v0 }

// kernel: tile.58
= control target key start
LH: loop header
LB: loop body
LE: loop exit
PB: predicated region body
PF: predicated region fallthrough
CT: control target
= control target key end

     0   :  { %vm8_vm0 = vcmask 261120   ;;  %s40_s8 = smov 32   ;;  %s41_s9 = smov 64   ;;  %vm14_vm1 = vcmask 1048320   ;;  %vm20_vm2 = vcmask 785920   ;;  %vm26_vm3 = vcmask 523520   ;;  %s58_s0 = inlined_call_operand.vmem [shape: f32[4,32], index: 0, kind: input, shape index: {}]   ;;  %s59_s1 = inlined_call_operand.vmem [shape: f32[1,128], index: 1, kind: output, shape index: {}]  }
   0x1   :  { %v5_v0 = vld [vmem:[%s58_s0] sm:$0xf]  ;;  %s39_s0 = smov 96  }
   0x2   :  { %6 = vst [vmem:[#allocation1] sm:$0xf] %v5_v0 }
   0x9   :  { %v11_v1 = vld [vmem:[#allocation1 + $0x3] sm:$0x1]   ;;  %v23_v2 = vld [vmem:[#allocation1 + $0x1] sm:$0x1]   ;;  %v7_v3 = vld [vmem:[#allocation1] sm:$0x1]  }
   0xa   :  { %12 = vrot.lane.b32.xlu0 %v11_v1, %s39_s0  ;;  %24 = vrot.lane.b32.xlu1 %v23_v2, %s40_s8  ;;  %v17_v4 = vld [vmem:[#allocation1 + $0x2] sm:$0x1]   ;;  %9 = vst.msk [vmem:[#allocation0] sm:$0x1] %vm8_vm0, %v7_v3  }
   0xe   :  { %18 = vrot.lane.b32.xlu0 %v17_v4, %s41_s9 }
  0x7c   :  { %v13_v5 = vpop.permute.xlu0 %12   ;;  %v25_v6 = vpop.permute.xlu1 %24  }
  0x7d   :  { %15 = vst.msk [vmem:[#allocation0] sm:$0x1] %vm14_vm1, %v13_v5  }
  0x80   :  { %v19_v7 = vpop.permute.xlu0 %18  }
  0x81   :  { %21 = vst.msk [vmem:[#allocation0] sm:$0x1] %vm20_vm2, %v19_v7  }
  0x82   :  { %27 = vst.msk [vmem:[#allocation0] sm:$0x1] %vm26_vm3, %v25_v6  }
  0x89   :  { %v32_v8 = vld [vmem:[#allocation0] sm:$0x1] }
  0x8a   :  { %35 = vst [vmem:[%s59_s1] sm:$0x1] %v32_v8 }

// kernel: a_call__.11
= control target key start
LH: loop header
LB: loop body
LE: loop exit
PB: predicated region body
PF: predicated region fallthrough
CT: control target
= control target key end

     0   :  { %9 = vsyncpa [#allocation3], 0  ;;  %s963_s12 = smov [#allocation2]   ;;  %s1076_s0 = inlined_call_operand.vmem [shape: bf16[64,576], index: 0, kind: input, shape index: {}]   ;;  %s1077_s1 = inlined_call_operand.hbm [shape: bf16[576,128], index: 1, kind: input, shape index: {}]   ;;  %s1078_s2 = inlined_call_operand.vmem [shape: f32[64,128], index: 2, kind: output, shape index: {0}]   ;;  %s1079_s3 = inlined_call_operand.vmem [shape: f32[1,2,128], index: 3, kind: output, shape index: {1}]  }
   0x1   :  { %s17_s13 = sshll.u32 %s963_s12, 4  ;;  %s18_s13 = int_to_ptr.vmem [resolvable:$true] %s17_s13 }
   0x2   :  { %s949_s14 = scalar_lea.vmem %s18_s13, 4608  ;;  %p954_p1 = scmp.lt.s32.totalorder %s18_s13, %s18_s13 }
   0x3   :  { %p950_p0 = scmp.ne.s32.totalorder %s18_s13, %s949_s14  ;;  %p955_p2 = scmp.lt.s32.totalorder %s949_s14, %s949_s14 }
   0x5   :  { %p956_p3 = por %p955_p2, %p954_p1 }
   0x7   :  { %p957_p4 = pnand %p956_p3, %p950_p0 }
   0x9   :  { %960 = shalt.err (!%p957_p4)
}
   0xa   :  { %s964_s15 = smov 64   ;;  %s965_s16 = smov 4  }
   0xb   :  { %23 = dma.hbm_to_vmem [thread:$0]  %s1077_s1, 4608, %s18_s13, [#allocation3], %s964_s15, %s964_s15, %s965_s16  }
   0xc   :  { %961 = dma.done.wait [#allocation3], 4608  }
   0xd   :  { %962 = vsyncadd [#allocation3], 4294962688  ;;  %v877_v0 = vld [vmem:[#allocation2 + $0x78] sm:$0xff]   ;;  %v881_v4 = vld [vmem:[#allocation2 + $0x70] sm:$0xff]   ;;  %vm440_vm0 = vcmask 523264   ;;  %vm690_vm1 = vcmask 1040384  }
   0xe   :  { %v878_v1 = vld [vmem:[#allocation2 + $0xf8] sm:$0xff]   ;;  %762 = vmatprep.subr.bf16.mxu0 %v877_v0  ;;  %v882_v5 = vld [vmem:[#allocation2 + $0xf0] sm:$0xff]   ;;  %v885_v8 = vld [vmem:[#allocation2 + $0x68] sm:$0xff]  }
   0xf   :  { %v879_v2 = vld [vmem:[#allocation2 + $0x38] sm:$0xff]   ;;  %802 = vmatprep.subr.bf16.mxu1 %v878_v1  ;;  %v883_v6 = vld [vmem:[#allocation2 + $0x30] sm:$0xff]   ;;  %v886_v9 = vld [vmem:[#allocation2 + $0xe8] sm:$0xff]  }
  0x10   :  { %v880_v3 = vld [vmem:[#allocation2 + $0xb8] sm:$0xff]   ;;  %763 = vmatpush3.bf16.msra.mxu0 %v879_v2  ;;  %v884_v7 = vld [vmem:[#allocation2 + $0xb0] sm:$0xff]   ;;  %v887_v10 = vld [vmem:[#allocation2 + $0x28] sm:$0xff]  }
  0x11   :  { %803 = vmatpush3.bf16.msra.mxu1 %v880_v3  ;;  %764 = vmatprep.subr.bf16.mxu0 %v881_v4  ;;  %v888_v11 = vld [vmem:[#allocation2 + $0xa8] sm:$0xff]   ;;  %v889_v12 = vld [vmem:[#allocation2 + $0x60] sm:$0xff]   ;;  %v893_v16 = vld [vmem:[#allocation2 + $0x58] sm:$0xff]  }
  0x12   :  { %804 = vmatprep.subr.bf16.mxu1 %v882_v5  ;;  %v890_v13 = vld [vmem:[#allocation2 + $0xe0] sm:$0xff]   ;;  %v894_v17 = vld [vmem:[#allocation2 + $0xd8] sm:$0xff]   ;;  %v897_v20 = vld [vmem:[#allocation2 + $0x50] sm:$0xff]  }
  0x13   :  { %v891_v14 = vld [vmem:[#allocation2 + $0x20] sm:$0xff]   ;;  %v895_v18 = vld [vmem:[#allocation2 + $0x18] sm:$0xff]   ;;  %v898_v21 = vld [vmem:[#allocation2 + $0xd0] sm:$0xff]  }
  0x14   :  { %765 = vmatpush3.bf16.msra.mxu0 %v883_v6  ;;  %v892_v15 = vld [vmem:[#allocation2 + $0xa0] sm:$0xff]   ;;  %v896_v19 = vld [vmem:[#allocation2 + $0x98] sm:$0xff]   ;;  %v899_v22 = vld [vmem:[#allocation2 + $0x10] sm:$0xff]  }
  0x15   :  { %805 = vmatpush3.bf16.msra.mxu1 %v884_v7  ;;  %766 = vmatprep.subr.bf16.mxu0 %v885_v8  ;;  %v900_v23 = vld [vmem:[#allocation2 + $0x90] sm:$0xff]   ;;  %v901_v24 = vld [vmem:[#allocation2 + $0x48] sm:$0xff]   ;;  %v905_v28 = vld [vmem:[#allocation2 + $0x40] sm:$0xff]  }
  0x16   :  { %806 = vmatprep.subr.bf16.mxu1 %v886_v9  ;;  %v902_v25 = vld [vmem:[#allocation2 + $0xc8] sm:$0xff]   ;;  %v906_v29 = vld [vmem:[#allocation2 + $0xc0] sm:$0xff]   ;;  %v915_v36 = vld [vmem:[#allocation2 + $0x118] sm:$0xff]  }
  0x17   :  { %v903_v26 = vld [vmem:[#allocation2 + $0x8] sm:$0xff]   ;;  %v907_v30 = vld [vmem:[#allocation2] sm:$0xff]   ;;  %v922_v39 = vld [vmem:[#allocation2 + $0x110] sm:$0xff]  }
  0x18   :  { %767 = vmatpush3.bf16.msra.mxu0 %v887_v10  ;;  %v904_v27 = vld [vmem:[#allocation2 + $0x88] sm:$0xff]   ;;  %v908_v31 = vld [vmem:[#allocation2 + $0x80] sm:$0xff]   ;;  %v925_v43 = vld [vmem:[%s1076_s0 + $0x5c] ss:$20 sps:$4 sm:$0xff]  }
  0x19   :  { %807 = vmatpush3.bf16.msra.mxu1 %v888_v11  ;;  %768 = vmatprep.subr.bf16.mxu0 %v889_v12  ;;  %v909_v32 = vld [vmem:[%s1076_s0] ss:$20 sps:$4 sm:$0xff]   ;;  %v911_v33 = vld [vmem:[%s1076_s0 + $0x4] ss:$20 sps:$4 sm:$0xff]   ;;  %v912_v34 = vld [vmem:[%s1076_s0 + $0x8] ss:$20 sps:$4 sm:$0xff]  }
  0x1a   :  { %808 = vmatprep.subr.bf16.mxu1 %v890_v13  ;;  %v914_v35 = vld [vmem:[%s1076_s0 + $0xc] ss:$20 sps:$4 sm:$0xff]   ;;  %485 = vmatprep.mubr.bf16.mxu0 %v911_v33  ;;  %v918_v38 = vld [vmem:[%s1076_s0 + $0x34] ss:$20 sps:$4 sm:$0xff]   ;;  %v921_v41 = vld [vmem:[%s1076_s0 + $0x30] ss:$20 sps:$4 sm:$0xff]  }
  0x1b   :  { %550 = vmatprep.mubr.bf16.mxu1 %v914_v35  ;;  %v916_v37 = vld [vmem:[%s1076_s0 + $0x2c] ss:$20 sps:$4 sm:$0xff]   ;;  %v920_v40 = vld [vmem:[%s1076_s0 + $0x28] ss:$20 sps:$4 sm:$0xff]   ;;  %v927_v46 = vld [vmem:[%s1076_s0 + $0x50] ss:$20 sps:$4 sm:$0xff]  }
  0x1c   :  { %769 = vmatpush3.bf16.msra.mxu0 %v891_v14  ;;  %v923_v42 = vld [vmem:[%s1076_s0 + $0x54] ss:$20 sps:$4 sm:$0xff]   ;;  %v936_v45 = vld [vmem:[#allocation2 + $0x100] sm:$0xff]   ;;  %v928_v47 = vld [vmem:[%s1076_s0 + $0x58] ss:$20 sps:$4 sm:$0xff]  }
  0x1d   :  { %809 = vmatpush3.bf16.msra.mxu1 %v892_v15  ;;  %770 = vmatprep.subr.bf16.mxu0 %v893_v16  ;;  %v929_v44 = vld [vmem:[#allocation2 + $0x108] sm:$0xff]   ;;  %v930_v48 = vld [vmem:[%s1076_s0 + $0x7c] ss:$20 sps:$4 sm:$0xff]   ;;  %v932_v49 = vld [vmem:[%s1076_s0 + $0x84] ss:$20 sps:$4 sm:$0xff]  }
  0x1e   :  { %810 = vmatprep.subr.bf16.mxu1 %v894_v17  ;;  %v934_v50 = vld [vmem:[%s1076_s0 + $0x78] ss:$20 sps:$4 sm:$0xff]   ;;  %v935_v51 = vld [vmem:[%s1076_s0 + $0x80] ss:$20 sps:$4 sm:$0xff]   ;;  %v937_v52 = vld [vmem:[%s1076_s0 + $0x10] ss:$20 sps:$4 sm:$0xff]  }
  0x1f   :  { %v938_v53 = vld [vmem:[%s1076_s0 + $0x60] ss:$20 sps:$4 sm:$0xff]   ;;  %v939_v54 = vld [vmem:[%s1076_s0 + $0x38] ss:$20 sps:$4 sm:$0xff]   ;;  %v940_v55 = vld [vmem:[%s1076_s0 + $0x88] ss:$20 sps:$4 sm:$0xff]  }
  0x20   :  { %771 = vmatpush3.bf16.msra.mxu0 %v895_v18 }
  0x21   :  { %811 = vmatpush3.bf16.msra.mxu1 %v896_v19  ;;  %772 = vmatprep.subr.bf16.mxu0 %v897_v20 }
  0x22   :  { %812 = vmatprep.subr.bf16.mxu1 %v898_v21 }
  0x24   :  { %773 = vmatpush3.bf16.msra.mxu0 %v899_v22 }
  0x25   :  { %813 = vmatpush3.bf16.msra.mxu1 %v900_v23  ;;  %774 = vmatprep.subr.bf16.mxu0 %v901_v24 }
  0x26   :  { %814 = vmatprep.subr.bf16.mxu1 %v902_v25 }
  0x28   :  { %775 = vmatpush3.bf16.msra.mxu0 %v903_v26 }
  0x29   :  { %815 = vmatpush3.bf16.msra.mxu1 %v904_v27  ;;  %776 = vmatprep.subr.bf16.mxu0 %v905_v28 }
  0x2a   :  { %816 = vmatprep.subr.bf16.mxu1 %v906_v29 }
  0x2c   :  { %777 = vmatpush3.bf16.msra.mxu0 %v907_v30 }
  0x2d   :  { %817 = vmatpush3.bf16.msra.mxu1 %v908_v31  ;;  %850 = vmatprep.subr.bf16.mxu0 %v915_v36 }
  0x2e   :  { %866 = vmatprep.subr.bf16.mxu1 %v915_v36 }
  0x2f   :  { %486 = vmatmul.mubr.bf16.vlgmr.msra.gmra.mxu0 %v909_v32 }
  0x30   :  { %551 = vmatmul.mubr.bf16.vlgmr.msra.gmra.mxu1 %v912_v34  ;;  %851 = vmatpush3.bf16.msra.mxu0 %v915_v36 }
  0x31   :  { %493 = vmatprep.mubr.bf16.mxu0 %v916_v37  ;;  %558 = vmatprep.mubr.bf16.mxu1 %v918_v38 }
  0x32   :  { %870 = vmatpush3.bf16.msra.mxu1 %v915_v36  ;;  %852 = vmatprep.subr.bf16.mxu0 %v922_v39 }
  0x33   :  { %867 = vmatprep.subr.bf16.mxu1 %v922_v39 }
  0x34   :  { %853 = vmatpush3.bf16.msra.mxu0 %v922_v39 }
  0x35   :  { %854 = vmatprep.subr.bf16.mxu0 %v929_v44 }
  0x36   :  { %871 = vmatpush3.bf16.msra.mxu1 %v922_v39 }
  0x37   :  { %494 = vmatmul.mubr.bf16.gmra.mxu0 %v920_v40  ;;  %868 = vmatprep.subr.bf16.mxu1 %v929_v44 }
  0x38   :  { %559 = vmatmul.mubr.bf16.gmra.mxu1 %v921_v41  ;;  %501 = vmatprep.mubr.bf16.mxu0 %v923_v42 }
  0x39   :  { %566 = vmatprep.mubr.bf16.mxu1 %v925_v43  ;;  %855 = vmatpush3.bf16.msra.mxu0 %v929_v44 }
  0x3a   :  { %856 = vmatprep.subr.bf16.mxu0 %v936_v45  ;;  %872 = vmatpush3.bf16.msra.mxu1 %v929_v44 }
  0x3b   :  { %869 = vmatprep.subr.bf16.mxu1 %v936_v45 }
  0x3d   :  { %857 = vmatpush3.bf16.msra.mxu0 %v936_v45 }
  0x3e   :  { %873 = vmatpush3.bf16.msra.mxu1 %v936_v45 }
  0x3f   :  { %502 = vmatmul.mubr.bf16.gmra.mxu0 %v927_v46 }
  0x40   :  { %567 = vmatmul.mubr.bf16.gmra.mxu1 %v928_v47  ;;  %509 = vmatprep.mubr.bf16.mxu0 %v930_v48 }
  0x41   :  { %574 = vmatprep.mubr.bf16.mxu1 %v932_v49 }
  0x47   :  { %510 = vmatmul.mubr.bf16.gmra.mxu0 %v934_v50 }
  0x48   :  { %575 = vmatmul.mubr.bf16.gmra.mxu1 %v935_v51  ;;  %858 = vmatprep.mubr.msk.bf16.mxu0 %vm440_vm0, %v937_v52 }
  0x49   :  { %862 = vmatprep.mubr.msk.bf16.mxu1 %vm440_vm0, %v938_v53 }
  0x4f   :  { %859 = vmatmul.mubr.msk.bf16.vlgmr.msra.gmra.mxu0 %vm440_vm0, %v939_v54 }
  0x50   :  { %863 = vmatmul.mubr.msk.bf16.vlgmr.msra.gmra.mxu1 %vm440_vm0, %v940_v55 }
  0xef   :  { %v778_v56 = vpop.f32.mrf.mxu0 }
  0xf0   :  { %v818_v57 = vpop.f32.mrf.mxu1 }
  0xf1   :  { %v779_v58 = vpop.f32.mrf.mxu0 }
  0xf2   :  { %v819_v59 = vpop.f32.mrf.mxu1  ;;  %v780_v25 = vadd.f32 %v779_v58, %v778_v56 }
  0xf3   :  { %v781_v60 = vpop.f32.mrf.mxu0  ;;  %v820_v26 = vadd.f32 %v819_v59, %v818_v57 }
  0xf4   :  { %v821_v61 = vpop.f32.mrf.mxu1 }
  0xf5   :  { %v782_v62 = vpop.f32.mrf.mxu0  ;;  %v553_v43 = vadd.f32 %v820_v26, %v780_v25 }
  0xf6   :  { %v822_v63 = vpop.f32.mrf.mxu1  ;;  %v783_v39 = vadd.f32 %v782_v62, %v781_v60 }
  0xf7   :  { %v784_v0 = vpop.f32.mrf.mxu0  ;;  %v823_v40 = vadd.f32 %v822_v63, %v821_v61 }
  0xf8   :  { %v824_v1 = vpop.f32.mrf.mxu1 }
  0xf9   :  { %v785_v2 = vpop.f32.mrf.mxu0  ;;  %v556_v57 = vadd.f32 %v823_v40, %v783_v39 }
  0xfa   :  { %v825_v3 = vpop.f32.mrf.mxu1  ;;  %v786_v19 = vadd.f32 %v785_v2, %v784_v0 }
  0xfb   :  { %v787_v4 = vpop.f32.mrf.mxu0  ;;  %v826_v20 = vadd.f32 %v825_v3, %v824_v1 }
  0xfc   :  { %v827_v5 = vpop.f32.mrf.mxu1 }
  0xfd   :  { %v788_v6 = vpop.f32.mrf.mxu0  ;;  %v561_v34 = vadd.f32 %v826_v20, %v786_v19 }
  0xfe   :  { %v828_v7 = vpop.f32.mrf.mxu1  ;;  %v789_v31 = vadd.f32 %v788_v6, %v787_v4 }
  0xff   :  { %v790_v8 = vpop.f32.mrf.mxu0  ;;  %v829_v32 = vadd.f32 %v828_v7, %v827_v5 }
 0x100   :  { %v830_v9 = vpop.f32.mrf.mxu1 }
 0x101   :  { %v791_v10 = vpop.f32.mrf.mxu0  ;;  %v564_v51 = vadd.f32 %v829_v32, %v789_v31 }
 0x102   :  { %v831_v11 = vpop.f32.mrf.mxu1  ;;  %v792_v28 = vadd.f32 %v791_v10, %v790_v8 }
 0x103   :  { %v793_v12 = vpop.f32.mrf.mxu0  ;;  %v832_v29 = vadd.f32 %v831_v11, %v830_v9 }
 0x104   :  { %v833_v13 = vpop.f32.mrf.mxu1 }
 0x105   :  { %v794_v14 = vpop.f32.mrf.mxu0  ;;  %v569_v48 = vadd.f32 %v832_v29, %v792_v28 }
 0x106   :  { %v834_v15 = vpop.f32.mrf.mxu1  ;;  %v795_v44 = vadd.f32 %v794_v14, %v793_v12 }
 0x107   :  { %v796_v16 = vpop.f32.mrf.mxu0  ;;  %v835_v45 = vadd.f32 %v834_v15, %v833_v13 }
 0x108   :  { %v836_v17 = vpop.f32.mrf.mxu1 }
 0x109   :  { %v797_v18 = vpop.f32.mrf.mxu0  ;;  %v572_v60 = vadd.f32 %v835_v45, %v795_v44 }
 0x10a   :  { %v837_v21 = vpop.f32.mrf.mxu1  ;;  %v798_v22 = vadd.f32 %v797_v18, %v796_v16 }
 0x10b   :  { %v838_v23 = vadd.f32 %v837_v21, %v836_v17  ;;  %v799_v24 = vpop.f32.mrf.mxu0 }
 0x10c   :  { %v839_v27 = vpop.f32.mrf.mxu1 }
 0x10d   :  { %v800_v30 = vpop.f32.mrf.mxu0  ;;  %v577_v38 = vadd.f32 %v838_v23, %v798_v22 }
 0x10e   :  { %v840_v33 = vpop.f32.mrf.mxu1  ;;  %v801_v35 = vadd.f32 %v800_v30, %v799_v24 }
 0x10f   :  { %v841_v36 = vadd.f32 %v840_v33, %v839_v27  ;;  %v860_v37 = vpop.f32.mrf.mxu0 }
 0x110   :  { %v626_v41 = vadd.f32 %v860_v37, %v561_v34  ;;  %v864_v42 = vpop.f32.mrf.mxu1 }
 0x111   :  { %v642_v46 = vadd.f32 %v864_v42, %v577_v38  ;;  %v617_v47 = vpop.f32.mrf.mxu0  ;;  %v580_v54 = vadd.f32 %v841_v36, %v801_v35 }
 0x112   :  { %650 = vst [vmem:[%s1078_s2 + $0x10] sm:$0xff] %v626_v41  ;;  %v618_v49 = vadd.f32 %v617_v47, %v553_v43  ;;  %v633_v50 = vpop.f32.mrf.mxu1  ;;  %v671_v3 = vmul.f32 %v626_v41, %v626_v41 }
 0x113   :  { %654 = vst [vmem:[%s1078_s2 + $0x30] sm:$0xff] %v642_v46  ;;  %v634_v52 = vadd.f32 %v633_v50, %v569_v48  ;;  %v861_v53 = vpop.f32.mrf.mxu0  ;;  %v675_v15 = vmul.f32 %v642_v46, %v642_v46 }
 0x114   :  { %648 = vst [vmem:[%s1078_s2] sm:$0xff] %v618_v49  ;;  %v629_v55 = vadd.f32 %v861_v53, %v564_v51  ;;  %v865_v56 = vpop.f32.mrf.mxu1  ;;  %v669_v0 = vmul.f32 %v618_v49, %v618_v49 }
 0x115   :  { %652 = vst [vmem:[%s1078_s2 + $0x20] sm:$0xff] %v634_v52  ;;  %v645_v58 = vadd.f32 %v865_v56, %v580_v54  ;;  %v620_v59 = vpop.f32.mrf.mxu0  ;;  %v673_v9 = vmul.f32 %v634_v52, %v634_v52 }
 0x116   :  { %651 = vst [vmem:[%s1078_s2 + $0x18] sm:$0xff] %v629_v55  ;;  %v621_v61 = vadd.f32 %v620_v59, %v556_v57  ;;  %v636_v62 = vpop.f32.mrf.mxu1  ;;  %v672_v6 = vmul.f32 %v629_v55, %v629_v55 }
 0x117   :  { %655 = vst [vmem:[%s1078_s2 + $0x38] sm:$0xff] %v645_v58  ;;  %v637_v63 = vadd.f32 %v636_v62, %v572_v60  ;;  %v676_v18 = vmul.f32 %v645_v58, %v645_v58 }
 0x118   :  { %649 = vst [vmem:[%s1078_s2 + $0x8] sm:$0xff] %v621_v61  ;;  %v656_v1 = vadd.f32 %v621_v61, %v618_v49  ;;  %v670_v2 = vmul.f32 %v621_v61, %v621_v61 }
 0x119   :  { %653 = vst [vmem:[%s1078_s2 + $0x28] sm:$0xff] %v637_v63  ;;  %v674_v13 = vmul.f32 %v637_v63, %v637_v63 }
 0x11a   :  { %v657_v4 = vadd.f32 %v656_v1, %v626_v41  ;;  %v677_v5 = vadd.f32 %v670_v2, %v669_v0 }
 0x11c   :  { %v678_v7 = vadd.f32 %v677_v5, %v671_v3  ;;  %v658_v8 = vadd.f32 %v657_v4, %v629_v55 }
 0x11e   :  { %v659_v10 = vadd.f32 %v658_v8, %v634_v52  ;;  %v679_v11 = vadd.f32 %v678_v7, %v672_v6 }
 0x120   :  { %v660_v12 = vadd.f32 %v659_v10, %v637_v63  ;;  %v680_v14 = vadd.f32 %v679_v11, %v673_v9 }
 0x122   :  { %v661_v16 = vadd.f32 %v660_v12, %v642_v46  ;;  %v681_v17 = vadd.f32 %v680_v14, %v674_v13 }
 0x124   :  { %v662_v19 = vadd.f32 %v661_v16, %v645_v58  ;;  %v682_v20 = vadd.f32 %v681_v17, %v675_v15 }
 0x126   :  { %v663_v21 = vrot.slane %v662_v19, 4  ;;  %v683_v22 = vadd.f32 %v682_v20, %v676_v18 }
 0x128   :  { %v664_v23 = vadd.f32 %v663_v21, %v662_v19  ;;  %v684_v24 = vrot.slane %v683_v22, 4 }
 0x12a   :  { %v665_v25 = vrot.slane %v664_v23, 2  ;;  %v685_v26 = vadd.f32 %v684_v24, %v683_v22 }
 0x12c   :  { %v666_v27 = vadd.f32 %v665_v25, %v664_v23  ;;  %v686_v28 = vrot.slane %v685_v26, 2 }
 0x12e   :  { %v667_v29 = vrot.slane %v666_v27, 1  ;;  %v687_v30 = vadd.f32 %v686_v28, %v685_v26 }
 0x130   :  { %v688_v31 = vrot.slane %v687_v30, 1  ;;  %v668_v32 = vadd.f32 %v667_v29, %v666_v27 }
 0x132   :  { %v689_v33 = vadd.f32 %v688_v31, %v687_v30 }
 0x134   :  { %v691_v34 = vsel %vm690_vm1, %v668_v32, %v689_v33 }
 0x135   :  { %692 = vst [vmem:[%s1079_s3] sm:$0x3] %v691_v34 }
 0x136   :  { %701 = vsyncpa [#allocation3], 1 }

// kernel: a_call__.12
= control target key start
LH: loop header
LB: loop body
LE: loop exit
PB: predicated region body
PF: predicated region fallthrough
CT: control target
= control target key end

     0   :  { %s207_s0 = inlined_call_operand.vmem [shape: f32[64,128], index: 0, kind: input, shape index: {}]   ;;  %s208_s1 = inlined_call_operand.vmem [shape: f32[1,128], index: 1, kind: input, shape index: {}]   ;;  %s209_s2 = inlined_call_operand.vmem [shape: f32[1,128], index: 2, kind: input, shape index: {}]   ;;  %s210_s3 = inlined_call_operand.vmem [shape: bf16[64,128], index: 3, kind: output, shape index: {}]  }
   0x1   :  { %v14_v0 = vld [vmem:[%s207_s0] sm:$0xff]  ;;  %v15_v1 = vld [vmem:[%s207_s0 + $0x8] sm:$0xff]  ;;  %v16_v6 = vld [vmem:[%s207_s0 + $0x10] sm:$0xff] }
   0x2   :  { %v104_v2 = vld [vmem:[%s208_s1] ss:$0 sm:$0xff]  ;;  %v17_v7 = vld [vmem:[%s207_s0 + $0x18] sm:$0xff]  ;;  %v19_v11 = vld [vmem:[%s207_s0 + $0x28] sm:$0xff] }
   0x3   :  { %v29_v3 = vmul.f32 %v104_v2, %v14_v0  ;;  %v30_v4 = vmul.f32 %v104_v2, %v15_v1  ;;  %v105_v5 = vld [vmem:[%s209_s2] ss:$0 sm:$0xff]  ;;  %v31_v8 = vmul.f32 %v104_v2, %v16_v6  ;;  %v32_v9 = vmul.f32 %v104_v2, %v17_v7  ;;  %v20_v12 = vld [vmem:[%s207_s0 + $0x30] sm:$0xff]  ;;  %v21_v17 = vld [vmem:[%s207_s0 + $0x38] sm:$0xff] }
   0x4   :  { %v18_v10 = vld [vmem:[%s207_s0 + $0x20] sm:$0xff]  ;;  %v34_v16 = vmul.f32 %v104_v2, %v19_v11  ;;  %v35_v20 = vmul.f32 %v104_v2, %v20_v12  ;;  %v36_v21 = vmul.f32 %v104_v2, %v21_v17 }
   0x5   :  { %v44_v13 = vadd.f32 %v105_v5, %v29_v3  ;;  %v45_v14 = vadd.f32 %v105_v5, %v30_v4  ;;  %v33_v15 = vmul.f32 %v104_v2, %v18_v10  ;;  %v46_v18 = vadd.f32 %v105_v5, %v31_v8 }
   0x6   :  { %v47_v19 = vadd.f32 %v105_v5, %v32_v9  ;;  %v49_v25 = vadd.f32 %v105_v5, %v34_v16  ;;  %v50_v28 = vadd.f32 %v105_v5, %v35_v20  ;;  %v51_v29 = vadd.f32 %v105_v5, %v36_v21 }
   0x7   :  { %v52_v22 = vmax.f32 %v44_v13, 0.0  ;;  %v53_v23 = vmax.f32 %v45_v14, 0.0  ;;  %v48_v24 = vadd.f32 %v105_v5, %v33_v15  ;;  %v54_v26 = vmax.f32 %v46_v18, 0.0 }
   0x8   :  { %v55_v27 = vmax.f32 %v47_v19, 0.0  ;;  %v57_v32 = vmax.f32 %v49_v25, 0.0  ;;  %v58_v34 = vmax.f32 %v50_v28, 0.0  ;;  %v59_v35 = vmax.f32 %v51_v29, 0.0 }
   0x9   :  { %v125_v30 = vpack.c.bf16 %v53_v23, %v52_v22  ;;  %v56_v31 = vmax.f32 %v48_v24, 0.0 }
   0xa   :  { %v130_v33 = vpack.c.bf16 %v55_v27, %v54_v26  ;;  %v140_v37 = vpack.c.bf16 %v59_v35, %v58_v34 }
   0xb   :  { %126 = vst [vmem:[%s210_s3] sm:$0xff] %v125_v30   ;;  %v135_v36 = vpack.c.bf16 %v57_v32, %v56_v31 }
   0xc   :  { %142 = vst [vmem:[%s210_s3 + $0x8] sm:$0xff] %v130_v33   ;;  %144 = vst [vmem:[%s210_s3 + $0x18] sm:$0xff] %v140_v37  }
   0xd   :  { %143 = vst [vmem:[%s210_s3 + $0x10] sm:$0xff] %v135_v36  }

// kernel: tile.63
= control target key start
LH: loop header
LB: loop body
LE: loop exit
PB: predicated region body
PF: predicated region fallthrough
CT: control target
= control target key end

     0   :  { %s22_s0 = inlined_call_operand.vmem [shape: f32[16], index: 0, kind: input, shape index: {}]   ;;  %s23_s1 = inlined_call_operand.vmem [shape: f32[8,16], index: 1, kind: output, shape index: {}]  }
   0x1   :  { %v4_v0 = vld [vmem:[%s22_s0] ss:$0 sm:$0xff] }
   0x2   :  { %5 = vst [vmem:[%s23_s1] sm:$0xff] %v4_v0 }

// kernel: tile.68
= control target key start
LH: loop header
LB: loop body
LE: loop exit
PB: predicated region body
PF: predicated region fallthrough
CT: control target
= control target key end

     0   :  { %s69_s10 = smov 112   ;;  %s70_s11 = smov 80   ;;  %vm3_vm0 = vcmask 130048   ;;  %vm9_vm1 = vcmask 1048448   ;;  %vm15_vm2 = vcmask 917248   ;;  %vm21_vm3 = vcmask 786048   ;;  %s113_s0 = inlined_call_operand.vmem [shape: f32[8,16], index: 0, kind: input, shape index: {}]   ;;  %s114_s1 = inlined_call_operand.vmem [shape: f32[1,128], index: 1, kind: output, shape index: {}]  }
   0x1   :  { %v55_v0 = vld [vmem:[%s113_s0 + $0x7] sm:$0x1]   ;;  %v57_v1 = vld [vmem:[%s113_s0 + $0x5] sm:$0x1]   ;;  %v56_v2 = vld [vmem:[%s113_s0 + $0x6] sm:$0x1]  }
   0x2   :  { %7 = vrot.lane.b32.xlu0 %v55_v0, %s69_s10  ;;  %19 = vrot.lane.b32.xlu1 %v57_v1, %s70_s11  ;;  %v58_v3 = vld [vmem:[%s113_s0 + $0x4] sm:$0x1]   ;;  %v2_v4 = vld [vmem:[%s113_s0] sm:$0x1]   ;;  %s71_s18 = smov 96   ;;  %s72_s19 = smov 64  }
   0x3   :  { %4 = vst.msk [vmem:[#allocation0] sm:$0x1] %vm3_vm0, %v2_v4   ;;  %v59_v5 = vld [vmem:[%s113_s0 + $0x3] sm:$0x1]   ;;  %v60_v6 = vld [vmem:[%s113_s0 + $0x2] sm:$0x1]  }
   0x4   :  { %s73_s24 = smov 48   ;;  %s74_s25 = smov 32   ;;  %v61_v7 = vld [vmem:[%s113_s0 + $0x1] sm:$0x1]   ;;  %vm27_vm4 = vcmask 654848   ;;  %vm33_vm5 = vcmask 523648  }
   0x5   :  { %s75_s0 = smov 16   ;;  %vm39_vm6 = vcmask 392448   ;;  %vm45_vm7 = vcmask 261248  }
   0x6   :  { %13 = vrot.lane.b32.xlu0 %v56_v2, %s71_s18  ;;  %25 = vrot.lane.b32.xlu1 %v58_v3, %s72_s19 }
   0xa   :  { %31 = vrot.lane.b32.xlu0 %v59_v5, %s73_s24  ;;  %37 = vrot.lane.b32.xlu1 %v60_v6, %s74_s25 }
   0xe   :  { %43 = vrot.lane.b32.xlu0 %v61_v7, %s75_s0 }
  0x74   :  { %v8_v8 = vpop.permute.xlu0 %7   ;;  %v20_v9 = vpop.permute.xlu1 %19  }
  0x75   :  { %10 = vst.msk [vmem:[#allocation0] sm:$0x1] %vm9_vm1, %v8_v8  }
  0x78   :  { %v14_v10 = vpop.permute.xlu0 %13   ;;  %v26_v11 = vpop.permute.xlu1 %25  }
  0x79   :  { %16 = vst.msk [vmem:[#allocation0] sm:$0x1] %vm15_vm2, %v14_v10  }
  0x7a   :  { %22 = vst.msk [vmem:[#allocation0] sm:$0x1] %vm21_vm3, %v20_v9  }
  0x7b   :  { %28 = vst.msk [vmem:[#allocation0] sm:$0x1] %vm27_vm4, %v26_v11  }
  0x7c   :  { %v32_v12 = vpop.permute.xlu0 %31   ;;  %v38_v13 = vpop.permute.xlu1 %37  }
  0x7d   :  { %34 = vst.msk [vmem:[#allocation0] sm:$0x1] %vm33_vm5, %v32_v12  }
  0x7e   :  { %40 = vst.msk [vmem:[#allocation0] sm:$0x1] %vm39_vm6, %v38_v13  }
  0x80   :  { %v44_v14 = vpop.permute.xlu0 %43  }
  0x81   :  { %46 = vst.msk [vmem:[#allocation0] sm:$0x1] %vm45_vm7, %v44_v14  }
  0x88   :  { %v51_v15 = vld [vmem:[#allocation0] sm:$0x1] }
  0x89   :  { %54 = vst [vmem:[%s114_s1] sm:$0x1] %v51_v15 }

// kernel: a_call__.13
= control target key start
LH: loop header
LB: loop body
LE: loop exit
PB: predicated region body
PF: predicated region fallthrough
CT: control target
= control target key end

     0   :  { %vm550_vm0 = vcmask 523264   ;;  %vm940_vm1 = vcmask 1040384   ;;  %s1696_s1 = inlined_call_operand.vmem [shape: bf16[576,128], index: 1, kind: input, shape index: {}]   ;;  %s1697_s0 = inlined_call_operand.vmem [shape: bf16[128,576], index: 0, kind: input, shape index: {}]   ;;  %s1698_s2 = inlined_call_operand.vmem [shape: f32[128,128], index: 2, kind: output, shape index: {0}]   ;;  %s1699_s3 = inlined_call_operand.vmem [shape: f32[1,2,128], index: 3, kind: output, shape index: {1}]  }
   0x1   :  { %v1207_v0 = vld [vmem:[%s1696_s1 + $0x78] sm:$0xff]   ;;  %v1211_v4 = vld [vmem:[%s1696_s1 + $0x70] sm:$0xff]   ;;  %v1215_v8 = vld [vmem:[%s1696_s1 + $0x68] sm:$0xff]  }
   0x2   :  { %v1208_v1 = vld [vmem:[%s1696_s1 + $0xf8] sm:$0xff]   ;;  %1035 = vmatprep.subr.bf16.mxu0 %v1207_v0  ;;  %v1212_v5 = vld [vmem:[%s1696_s1 + $0xf0] sm:$0xff]   ;;  %v1216_v9 = vld [vmem:[%s1696_s1 + $0xe8] sm:$0xff]  }
   0x3   :  { %v1209_v2 = vld [vmem:[%s1696_s1 + $0x38] sm:$0xff]   ;;  %1099 = vmatprep.subr.bf16.mxu1 %v1208_v1  ;;  %v1213_v6 = vld [vmem:[%s1696_s1 + $0x30] sm:$0xff]   ;;  %v1217_v10 = vld [vmem:[%s1696_s1 + $0x28] sm:$0xff]  }
   0x4   :  { %v1210_v3 = vld [vmem:[%s1696_s1 + $0xb8] sm:$0xff]   ;;  %1036 = vmatpush3.bf16.msra.mxu0 %v1209_v2  ;;  %v1214_v7 = vld [vmem:[%s1696_s1 + $0xb0] sm:$0xff]   ;;  %v1218_v11 = vld [vmem:[%s1696_s1 + $0xa8] sm:$0xff]  }
   0x5   :  { %1100 = vmatpush3.bf16.msra.mxu1 %v1210_v3  ;;  %1037 = vmatprep.subr.bf16.mxu0 %v1211_v4  ;;  %v1219_v12 = vld [vmem:[%s1696_s1 + $0x60] sm:$0xff]   ;;  %v1223_v16 = vld [vmem:[%s1696_s1 + $0x58] sm:$0xff]   ;;  %v1227_v20 = vld [vmem:[%s1696_s1 + $0x50] sm:$0xff]  }
   0x6   :  { %1101 = vmatprep.subr.bf16.mxu1 %v1212_v5  ;;  %v1220_v13 = vld [vmem:[%s1696_s1 + $0xe0] sm:$0xff]   ;;  %v1224_v17 = vld [vmem:[%s1696_s1 + $0xd8] sm:$0xff]   ;;  %v1228_v21 = vld [vmem:[%s1696_s1 + $0xd0] sm:$0xff]  }
   0x7   :  { %v1221_v14 = vld [vmem:[%s1696_s1 + $0x20] sm:$0xff]   ;;  %v1225_v18 = vld [vmem:[%s1696_s1 + $0x18] sm:$0xff]   ;;  %v1229_v22 = vld [vmem:[%s1696_s1 + $0x10] sm:$0xff]  }
   0x8   :  { %1038 = vmatpush3.bf16.msra.mxu0 %v1213_v6  ;;  %v1222_v15 = vld [vmem:[%s1696_s1 + $0xa0] sm:$0xff]   ;;  %v1226_v19 = vld [vmem:[%s1696_s1 + $0x98] sm:$0xff]   ;;  %v1230_v23 = vld [vmem:[%s1696_s1 + $0x90] sm:$0xff]  }
   0x9   :  { %1102 = vmatpush3.bf16.msra.mxu1 %v1214_v7  ;;  %1039 = vmatprep.subr.bf16.mxu0 %v1215_v8  ;;  %v1231_v24 = vld [vmem:[%s1696_s1 + $0x48] sm:$0xff]   ;;  %v1235_v28 = vld [vmem:[%s1696_s1 + $0x40] sm:$0xff]   ;;  %v1245_v36 = vld [vmem:[%s1696_s1 + $0x118] sm:$0xff]  }
   0xa   :  { %1103 = vmatprep.subr.bf16.mxu1 %v1216_v9  ;;  %v1232_v25 = vld [vmem:[%s1696_s1 + $0xc8] sm:$0xff]   ;;  %v1236_v29 = vld [vmem:[%s1696_s1 + $0xc0] sm:$0xff]   ;;  %v1258_v42 = vld [vmem:[%s1696_s1 + $0x110] sm:$0xff]  }
   0xb   :  { %v1233_v26 = vld [vmem:[%s1696_s1 + $0x8] sm:$0xff]   ;;  %v1237_v30 = vld [vmem:[%s1696_s1] sm:$0xff]   ;;  %v1254_v43 = vld [vmem:[%s1697_s0 + $0x5c] ss:$20 sps:$4 sm:$0xff]  }
   0xc   :  { %1040 = vmatpush3.bf16.msra.mxu0 %v1217_v10  ;;  %v1234_v27 = vld [vmem:[%s1696_s1 + $0x88] sm:$0xff]   ;;  %v1238_v31 = vld [vmem:[%s1696_s1 + $0x80] sm:$0xff]   ;;  %v1259_v47 = vld [vmem:[%s1697_s0 + $0x7c] ss:$20 sps:$4 sm:$0xff]  }
   0xd   :  { %1104 = vmatpush3.bf16.msra.mxu1 %v1218_v11  ;;  %1041 = vmatprep.subr.bf16.mxu0 %v1219_v12  ;;  %v1239_v32 = vld [vmem:[%s1697_s0] ss:$20 sps:$4 sm:$0xff]   ;;  %v1241_v33 = vld [vmem:[%s1697_s0 + $0x4] ss:$20 sps:$4 sm:$0xff]   ;;  %v1242_v34 = vld [vmem:[%s1697_s0 + $0x8] ss:$20 sps:$4 sm:$0xff]  }
   0xe   :  { %1105 = vmatprep.subr.bf16.mxu1 %v1220_v13  ;;  %v1244_v35 = vld [vmem:[%s1697_s0 + $0xc] ss:$20 sps:$4 sm:$0xff]   ;;  %607 = vmatprep.mubr.bf16.mxu0 %v1241_v33  ;;  %v1248_v38 = vld [vmem:[%s1697_s0 + $0x34] ss:$20 sps:$4 sm:$0xff]   ;;  %v1251_v40 = vld [vmem:[%s1697_s0 + $0x30] ss:$20 sps:$4 sm:$0xff]  }
   0xf   :  { %704 = vmatprep.mubr.bf16.mxu1 %v1244_v35  ;;  %v1246_v37 = vld [vmem:[%s1697_s0 + $0x2c] ss:$20 sps:$4 sm:$0xff]   ;;  %v1250_v39 = vld [vmem:[%s1697_s0 + $0x28] ss:$20 sps:$4 sm:$0xff]   ;;  %v1256_v44 = vld [vmem:[%s1697_s0 + $0x50] ss:$20 sps:$4 sm:$0xff]  }
  0x10   :  { %1042 = vmatpush3.bf16.msra.mxu0 %v1221_v14  ;;  %v1252_v41 = vld [vmem:[%s1697_s0 + $0x54] ss:$20 sps:$4 sm:$0xff]   ;;  %v1257_v45 = vld [vmem:[%s1697_s0 + $0x58] ss:$20 sps:$4 sm:$0xff]   ;;  %v1284_v49 = vld [vmem:[%s1696_s1 + $0x100] sm:$0xff]  }
  0x11   :  { %1106 = vmatpush3.bf16.msra.mxu1 %v1222_v15  ;;  %1043 = vmatprep.subr.bf16.mxu0 %v1223_v16  ;;  %v1271_v46 = vld [vmem:[%s1696_s1 + $0x108] sm:$0xff]   ;;  %v1261_v48 = vld [vmem:[%s1697_s0 + $0x84] ss:$20 sps:$4 sm:$0xff]   ;;  %v1264_v51 = vld [vmem:[%s1697_s0 + $0x80] ss:$20 sps:$4 sm:$0xff]  }
  0x12   :  { %1107 = vmatprep.subr.bf16.mxu1 %v1224_v17  ;;  %v1263_v50 = vld [vmem:[%s1697_s0 + $0x78] ss:$20 sps:$4 sm:$0xff]   ;;  %v1269_v54 = vld [vmem:[%s1697_s0 + $0xa0] ss:$20 sps:$4 sm:$0xff]   ;;  %v1270_v55 = vld [vmem:[%s1697_s0 + $0xa8] ss:$20 sps:$4 sm:$0xff]  }
  0x13   :  { %v1265_v52 = vld [vmem:[%s1697_s0 + $0xa4] ss:$20 sps:$4 sm:$0xff]   ;;  %v1267_v53 = vld [vmem:[%s1697_s0 + $0xac] ss:$20 sps:$4 sm:$0xff]   ;;  %v1274_v57 = vld [vmem:[%s1697_s0 + $0xd4] ss:$20 sps:$4 sm:$0xff]  }
  0x14   :  { %1044 = vmatpush3.bf16.msra.mxu0 %v1225_v18  ;;  %v1272_v56 = vld [vmem:[%s1697_s0 + $0xcc] ss:$20 sps:$4 sm:$0xff]   ;;  %v1276_v58 = vld [vmem:[%s1697_s0 + $0xc8] ss:$20 sps:$4 sm:$0xff]   ;;  %v1277_v59 = vld [vmem:[%s1697_s0 + $0xd0] ss:$20 sps:$4 sm:$0xff]  }
  0x15   :  { %1108 = vmatpush3.bf16.msra.mxu1 %v1226_v19  ;;  %1045 = vmatprep.subr.bf16.mxu0 %v1227_v20  ;;  %v1278_v60 = vld [vmem:[%s1697_s0 + $0xf4] ss:$20 sps:$4 sm:$0xff]   ;;  %v1280_v61 = vld [vmem:[%s1697_s0 + $0xfc] ss:$20 sps:$4 sm:$0xff]   ;;  %v1283_v63 = vld [vmem:[%s1697_s0 + $0xf8] ss:$20 sps:$4 sm:$0xff]  }
  0x16   :  { %1109 = vmatprep.subr.bf16.mxu1 %v1228_v21  ;;  %v1282_v62 = vld [vmem:[%s1697_s0 + $0xf0] ss:$20 sps:$4 sm:$0xff]   ;;  %v1289_v2 = vld [vmem:[%s1697_s0 + $0x118] ss:$20 sps:$4 sm:$0xff]   ;;  %v1290_v3 = vld [vmem:[%s1697_s0 + $0x120] ss:$20 sps:$4 sm:$0xff]  }
  0x17   :  { %v1285_v0 = vld [vmem:[%s1697_s0 + $0x11c] ss:$20 sps:$4 sm:$0xff]   ;;  %v1287_v1 = vld [vmem:[%s1697_s0 + $0x124] ss:$20 sps:$4 sm:$0xff]   ;;  %v1295_v8 = vld [vmem:[%s1697_s0 + $0x60] ss:$20 sps:$4 sm:$0xff]  }
  0x18   :  { %1046 = vmatpush3.bf16.msra.mxu0 %v1229_v22  ;;  %v1291_v4 = vld [vmem:[%s1697_s0 + $0x10] ss:$20 sps:$4 sm:$0xff]   ;;  %v1293_v6 = vld [vmem:[%s1697_s0 + $0x38] ss:$20 sps:$4 sm:$0xff]   ;;  %v1296_v9 = vld [vmem:[%s1697_s0 + $0x100] ss:$20 sps:$4 sm:$0xff]  }
  0x19   :  { %1110 = vmatpush3.bf16.msra.mxu1 %v1230_v23  ;;  %1047 = vmatprep.subr.bf16.mxu0 %v1231_v24  ;;  %v1292_v5 = vld [vmem:[%s1697_s0 + $0xb0] ss:$20 sps:$4 sm:$0xff]   ;;  %v1294_v7 = vld [vmem:[%s1697_s0 + $0xd8] ss:$20 sps:$4 sm:$0xff]   ;;  %v1297_v10 = vld [vmem:[%s1697_s0 + $0x88] ss:$20 sps:$4 sm:$0xff]  }
  0x1a   :  { %1111 = vmatprep.subr.bf16.mxu1 %v1232_v25  ;;  %v1298_v11 = vld [vmem:[%s1697_s0 + $0x128] ss:$20 sps:$4 sm:$0xff]  }
  0x1c   :  { %1048 = vmatpush3.bf16.msra.mxu0 %v1233_v26 }
  0x1d   :  { %1112 = vmatpush3.bf16.msra.mxu1 %v1234_v27  ;;  %1049 = vmatprep.subr.bf16.mxu0 %v1235_v28 }
  0x1e   :  { %1113 = vmatprep.subr.bf16.mxu1 %v1236_v29 }
  0x20   :  { %1050 = vmatpush3.bf16.msra.mxu0 %v1237_v30 }
  0x21   :  { %1114 = vmatpush3.bf16.msra.mxu1 %v1238_v31  ;;  %1175 = vmatprep.subr.bf16.mxu0 %v1245_v36 }
  0x22   :  { %1199 = vmatprep.subr.bf16.mxu1 %v1245_v36 }
  0x23   :  { %608 = vmatmul.mubr.bf16.vlgmr.msra.gmra.mxu0 %v1239_v32 }
  0x24   :  { %705 = vmatmul.mubr.bf16.vlgmr.msra.gmra.mxu1 %v1242_v34  ;;  %1176 = vmatpush3.bf16.msra.mxu0 %v1245_v36 }
  0x25   :  { %615 = vmatprep.mubr.bf16.mxu0 %v1246_v37  ;;  %712 = vmatprep.mubr.bf16.mxu1 %v1248_v38 }
  0x26   :  { %1203 = vmatpush3.bf16.msra.mxu1 %v1245_v36  ;;  %1177 = vmatprep.subr.bf16.mxu0 %v1258_v42 }
  0x27   :  { %1200 = vmatprep.subr.bf16.mxu1 %v1258_v42 }
  0x28   :  { %1178 = vmatpush3.bf16.msra.mxu0 %v1258_v42 }
  0x29   :  { %1179 = vmatprep.subr.bf16.mxu0 %v1271_v46 }
  0x2a   :  { %1204 = vmatpush3.bf16.msra.mxu1 %v1258_v42 }
  0x2b   :  { %616 = vmatmul.mubr.bf16.gmra.mxu0 %v1250_v39  ;;  %1201 = vmatprep.subr.bf16.mxu1 %v1271_v46 }
  0x2c   :  { %713 = vmatmul.mubr.bf16.gmra.mxu1 %v1251_v40  ;;  %623 = vmatprep.mubr.bf16.mxu0 %v1252_v41 }
  0x2d   :  { %720 = vmatprep.mubr.bf16.mxu1 %v1254_v43  ;;  %1180 = vmatpush3.bf16.msra.mxu0 %v1271_v46 }
  0x2e   :  { %1205 = vmatpush3.bf16.msra.mxu1 %v1271_v46  ;;  %1181 = vmatprep.subr.bf16.mxu0 %v1284_v49 }
  0x2f   :  { %1202 = vmatprep.subr.bf16.mxu1 %v1284_v49 }
  0x31   :  { %1182 = vmatpush3.bf16.msra.mxu0 %v1284_v49 }
  0x32   :  { %1206 = vmatpush3.bf16.msra.mxu1 %v1284_v49 }
  0x33   :  { %624 = vmatmul.mubr.bf16.gmra.mxu0 %v1256_v44 }
  0x34   :  { %721 = vmatmul.mubr.bf16.gmra.mxu1 %v1257_v45  ;;  %631 = vmatprep.mubr.bf16.mxu0 %v1259_v47 }
  0x35   :  { %728 = vmatprep.mubr.bf16.mxu1 %v1261_v48 }
  0x3b   :  { %632 = vmatmul.mubr.bf16.gmra.mxu0 %v1263_v50 }
  0x3c   :  { %729 = vmatmul.mubr.bf16.gmra.mxu1 %v1264_v51  ;;  %639 = vmatprep.mubr.bf16.mxu0 %v1265_v52 }
  0x3d   :  { %736 = vmatprep.mubr.bf16.mxu1 %v1267_v53 }
  0x43   :  { %640 = vmatmul.mubr.bf16.gmra.mxu0 %v1269_v54 }
  0x44   :  { %737 = vmatmul.mubr.bf16.gmra.mxu1 %v1270_v55  ;;  %647 = vmatprep.mubr.bf16.mxu0 %v1272_v56 }
  0x45   :  { %744 = vmatprep.mubr.bf16.mxu1 %v1274_v57 }
  0x4b   :  { %648 = vmatmul.mubr.bf16.gmra.mxu0 %v1276_v58 }
  0x4c   :  { %745 = vmatmul.mubr.bf16.gmra.mxu1 %v1277_v59  ;;  %655 = vmatprep.mubr.bf16.mxu0 %v1278_v60 }
  0x4d   :  { %752 = vmatprep.mubr.bf16.mxu1 %v1280_v61 }
  0x53   :  { %656 = vmatmul.mubr.bf16.gmra.mxu0 %v1282_v62 }
  0x54   :  { %753 = vmatmul.mubr.bf16.gmra.mxu1 %v1283_v63  ;;  %663 = vmatprep.mubr.bf16.mxu0 %v1285_v0 }
  0x55   :  { %760 = vmatprep.mubr.bf16.mxu1 %v1287_v1 }
  0x5b   :  { %664 = vmatmul.mubr.bf16.gmra.mxu0 %v1289_v2 }
  0x5c   :  { %761 = vmatmul.mubr.bf16.gmra.mxu1 %v1290_v3  ;;  %1183 = vmatprep.mubr.msk.bf16.mxu0 %vm550_vm0, %v1291_v4 }
  0x5d   :  { %1191 = vmatprep.mubr.msk.bf16.mxu1 %vm550_vm0, %v1292_v5 }
  0x63   :  { %1184 = vmatmul.mubr.msk.bf16.vlgmr.msra.gmra.mxu0 %vm550_vm0, %v1293_v6 }
  0x64   :  { %1192 = vmatmul.mubr.msk.bf16.vlgmr.msra.gmra.mxu1 %vm550_vm0, %v1294_v7  ;;  %1187 = vmatprep.mubr.msk.bf16.mxu0 %vm550_vm0, %v1295_v8 }
  0x65   :  { %1195 = vmatprep.mubr.msk.bf16.mxu1 %vm550_vm0, %v1296_v9 }
  0x6b   :  { %1188 = vmatmul.mubr.msk.bf16.gmra.mxu0 %vm550_vm0, %v1297_v10 }
  0x6c   :  { %1196 = vmatmul.mubr.msk.bf16.gmra.mxu1 %vm550_vm0, %v1298_v11 }
  0xe3   :  { %v1051_v12 = vpop.f32.mrf.mxu0 }
  0xe4   :  { %v1115_v13 = vpop.f32.mrf.mxu1 }
  0xe5   :  { %v1052_v14 = vpop.f32.mrf.mxu0 }
  0xe6   :  { %v1116_v15 = vpop.f32.mrf.mxu1  ;;  %v1053_v7 = vadd.f32 %v1052_v14, %v1051_v12 }
  0xe7   :  { %v1555_v16 = vpop.f32.mrf.mxu0  ;;  %v1117_v8 = vadd.f32 %v1116_v15, %v1115_v13 }
  0xe8   :  { %v1557_v17 = vpop.f32.mrf.mxu1 }
  0xe9   :  { %v1559_v18 = vpop.f32.mrf.mxu0  ;;  %v707_v14 = vadd.f32 %v1117_v8, %v1053_v7 }
  0xea   :  { %v1561_v19 = vpop.f32.mrf.mxu1 }
  0xeb   :  { %v1057_v20 = vpop.f32.mrf.mxu0 }
  0xec   :  { %v1121_v21 = vpop.f32.mrf.mxu1 }
  0xed   :  { %v1058_v22 = vpop.f32.mrf.mxu0 }
  0xee   :  { %v1122_v23 = vpop.f32.mrf.mxu1  ;;  %v1059_v9 = vadd.f32 %v1058_v22, %v1057_v20 }
  0xef   :  { %v1060_v24 = vpop.f32.mrf.mxu0  ;;  %v1123_v10 = vadd.f32 %v1122_v23, %v1121_v21 }
  0xf0   :  { %v1124_v25 = vpop.f32.mrf.mxu1 }
  0xf1   :  { %v1061_v26 = vpop.f32.mrf.mxu0  ;;  %v715_v13 = vadd.f32 %v1123_v10, %v1059_v9 }
  0xf2   :  { %v1125_v27 = vpop.f32.mrf.mxu1 }
  0xf3   :  { %v1563_v28 = vpop.f32.mrf.mxu0 }
  0xf4   :  { %v1565_v29 = vpop.f32.mrf.mxu1 }
  0xf5   :  { %v1567_v30 = vpop.f32.mrf.mxu0 }
  0xf6   :  { %v1569_v31 = vpop.f32.mrf.mxu1 }
  0xf7   :  { %v1571_v32 = vpop.f32.mrf.mxu0 }
  0xf8   :  { %1700 = vst [vmem:[#allocation2_spill] sm:$0xff] %v1571_v32  ;;  %v1573_v33 = vpop.f32.mrf.mxu1 }
  0xf9   :  { %1701 = vst [vmem:[#allocation3_spill] sm:$0xff] %v1573_v33  ;;  %v1575_v34 = vpop.f32.mrf.mxu0  ;;  %v1126_v33 = vadd.f32 %v1125_v27, %v1124_v25  ;;  %v1129_v25 = vadd.f32 %v1569_v31, %v1565_v29 }
  0xfa   :  { %1702 = vst [vmem:[#allocation4_spill] sm:$0xff] %v1575_v34  ;;  %v1577_v35 = vpop.f32.mrf.mxu1 }
  0xfb   :  { %1703 = vst [vmem:[#allocation5_spill] sm:$0xff] %v1577_v35  ;;  %v1069_v36 = vpop.f32.mrf.mxu0  ;;  %v1062_v35 = vadd.f32 %v1061_v26, %v1060_v24  ;;  %v1065_v24 = vadd.f32 %v1567_v30, %v1563_v28 }
  0xfc   :  { %v1579_v37 = vpop.f32.mrf.mxu1 }
  0xfd   :  { %v1070_v38 = vpop.f32.mrf.mxu0  ;;  %v718_v23 = vadd.f32 %v1126_v33, %v1062_v35 }
  0xfe   :  { %v1581_v39 = vpop.f32.mrf.mxu1  ;;  %v1071_v26 = vadd.f32 %v1070_v38, %v1069_v36 }
  0xff   :  { %v1583_v40 = vpop.f32.mrf.mxu0 }
 0x100   :  { %v1585_v41 = vpop.f32.mrf.mxu1 }
 0x101   :  { %v1587_v42 = vpop.f32.mrf.mxu0 }
 0x102   :  { %v1589_v43 = vpop.f32.mrf.mxu1  ;;  %v1074_v33 = vadd.f32 %v1587_v42, %v1583_v40  ;;  %v1713_v40 = vld [vmem:[#allocation4_spill] sm:$0xff] }
 0x103   :  { %1704 = vst [vmem:[#allocation6_spill] sm:$0xff] %v1589_v43  ;;  %v1075_v44 = vpop.f32.mrf.mxu0 }
 0x104   :  { %v1139_v45 = vpop.f32.mrf.mxu1 }
 0x105   :  { %v1076_v46 = vpop.f32.mrf.mxu0 }
 0x106   :  { %v1140_v47 = vpop.f32.mrf.mxu1  ;;  %v1077_v32 = vadd.f32 %v1076_v46, %v1075_v44  ;;  %v1135_v46 = vadd.f32 %v1581_v39, %v1579_v37  ;;  %v1712_v39 = vld [vmem:[#allocation2_spill] sm:$0xff] }
 0x107   :  { %v1078_v48 = vpop.f32.mrf.mxu0 }
 0x108   :  { %v1142_v49 = vpop.f32.mrf.mxu1 }
 0x109   :  { %v1079_v50 = vpop.f32.mrf.mxu0 }
 0x10a   :  { %v1143_v51 = vpop.f32.mrf.mxu1  ;;  %v1711_v28 = vld [vmem:[#allocation6_spill] sm:$0xff] }
 0x10b   :  { %v1081_v52 = vpop.f32.mrf.mxu0  ;;  %v1144_v44 = vadd.f32 %v1143_v51, %v1142_v49  ;;  %v1138_v30 = vadd.f32 %v1711_v28, %v1585_v41  ;;  %v1068_v41 = vadd.f32 %v1713_v40, %v1712_v39  ;;  %v723_v49 = vadd.f32 %v1129_v25, %v1065_v24 }
 0x10c   :  { %v1145_v53 = vpop.f32.mrf.mxu1 }
 0x10d   :  { %v1082_v54 = vpop.f32.mrf.mxu0 }
 0x10e   :  { %v1146_v55 = vpop.f32.mrf.mxu1 }
 0x10f   :  { %v1084_v56 = vpop.f32.mrf.mxu0 }
 0x110   :  { %v1148_v57 = vpop.f32.mrf.mxu1 }
 0x111   :  { %v1085_v58 = vpop.f32.mrf.mxu0 }
 0x112   :  { %v1149_v59 = vpop.f32.mrf.mxu1  ;;  %v1086_v15 = vadd.f32 %v1085_v58, %v1084_v56  ;;  %v1717_v58 = vld [vmem:[#allocation5_spill] sm:$0xff] }
 0x113   :  { %v1591_v60 = vpop.f32.mrf.mxu0  ;;  %v1150_v20 = vadd.f32 %v1149_v59, %v1148_v57  ;;  %v1716_v57 = vld [vmem:[#allocation3_spill] sm:$0xff] }
 0x114   :  { %1705 = vst [vmem:[#allocation7_spill] sm:$0xff] %v1591_v60  ;;  %v1593_v61 = vpop.f32.mrf.mxu1  ;;  %v1147_v60 = vadd.f32 %v1146_v55, %v1145_v53  ;;  %v1132_v59 = vadd.f32 %v1717_v58, %v1716_v57 }
 0x115   :  { %1706 = vst [vmem:[#allocation8_spill] sm:$0xff] %v1593_v61  ;;  %v1088_v62 = vpop.f32.mrf.mxu0  ;;  %v1083_v61 = vadd.f32 %v1082_v54, %v1081_v52  ;;  %v750_v38 = vadd.f32 %v1150_v20, %v1086_v15 }
 0x116   :  { %v1152_v63 = vpop.f32.mrf.mxu1 }
 0x117   :  { %v1595_v0 = vpop.f32.mrf.mxu0  ;;  %v747_v22 = vadd.f32 %v1147_v60, %v1083_v61 }
 0x118   :  { %1707 = vst [vmem:[#allocation9_spill] sm:$0xff] %v1595_v0  ;;  %v1597_v1 = vpop.f32.mrf.mxu1 }
 0x119   :  { %1708 = vst [vmem:[#allocation10_spill] sm:$0xff] %v1597_v1  ;;  %v1599_v2 = vpop.f32.mrf.mxu0  ;;  %v1141_v1 = vadd.f32 %v1140_v47, %v1139_v45 }
 0x11a   :  { %1709 = vst [vmem:[#allocation11_spill] sm:$0xff] %v1599_v2  ;;  %v1601_v3 = vpop.f32.mrf.mxu1  ;;  %v1120_v2 = vadd.f32 %v1561_v19, %v1557_v17 }
 0x11b   :  { %1710 = vst [vmem:[#allocation12_spill] sm:$0xff] %v1601_v3  ;;  %v1093_v4 = vpop.f32.mrf.mxu0  ;;  %v1056_v3 = vadd.f32 %v1559_v18, %v1555_v16  ;;  %v1080_v18 = vadd.f32 %v1079_v50, %v1078_v48  ;;  %v739_v45 = vadd.f32 %v1141_v1, %v1077_v32  ;;  %v1714_v50 = vld [vmem:[#allocation7_spill] sm:$0xff] }
 0x11c   :  { %v1157_v5 = vpop.f32.mrf.mxu1  ;;  %v1089_v51 = vadd.f32 %v1088_v62, %v1714_v50  ;;  %v1715_v52 = vld [vmem:[#allocation8_spill] sm:$0xff]  ;;  %v731_v62 = vadd.f32 %v1135_v46, %v1071_v26 }
 0x11d   :  { %v1094_v6 = vpop.f32.mrf.mxu0  ;;  %v710_v48 = vadd.f32 %v1120_v2, %v1056_v3  ;;  %v1153_v53 = vadd.f32 %v1152_v63, %v1715_v52  ;;  %v742_v56 = vadd.f32 %v1144_v44, %v1080_v18  ;;  %v734_v63 = vadd.f32 %v1138_v30, %v1074_v33 }
 0x11e   :  { %v1158_v11 = vpop.f32.mrf.mxu1  ;;  %v1095_v35 = vadd.f32 %v1094_v6, %v1093_v4  ;;  %v726_v44 = vadd.f32 %v1132_v59, %v1068_v41 }
 0x11f   :  { %v1096_v34 = vpop.f32.mrf.mxu0  ;;  %v1159_v36 = vadd.f32 %v1158_v11, %v1157_v5  ;;  %v1718_v11 = vld [vmem:[#allocation9_spill] sm:$0xff]  ;;  %v755_v20 = vadd.f32 %v1153_v53, %v1089_v51 }
 0x120   :  { %v1160_v0 = vpop.f32.mrf.mxu1 }
 0x121   :  { %v1097_v43 = vpop.f32.mrf.mxu0  ;;  %v763_v5 = vadd.f32 %v1159_v36, %v1095_v35 }
 0x122   :  { %v1161_v12 = vpop.f32.mrf.mxu1  ;;  %v1098_v1 = vadd.f32 %v1097_v43, %v1096_v34  ;;  %v1719_v34 = vld [vmem:[#allocation11_spill] sm:$0xff] }
 0x123   :  { %v1185_v21 = vpop.f32.mrf.mxu0  ;;  %v1162_v2 = vadd.f32 %v1161_v12, %v1160_v0  ;;  %v1092_v43 = vadd.f32 %v1719_v34, %v1718_v11  ;;  %v1720_v0 = vld [vmem:[#allocation10_spill] sm:$0xff]  ;;  %v1721_v12 = vld [vmem:[#allocation12_spill] sm:$0xff] }
 0x124   :  { %v812_v27 = vadd.f32 %v1185_v21, %v715_v13  ;;  %v1193_v16 = vpop.f32.mrf.mxu1  ;;  %v1156_v13 = vadd.f32 %v1721_v12, %v1720_v0 }
 0x125   :  { %v1611_v17 = vadd.f32 %v1193_v16, %v747_v22  ;;  %v803_v19 = vpop.f32.mrf.mxu0  ;;  %v766_v18 = vadd.f32 %v1162_v2, %v1098_v1 }
 0x126   :  { %868 = vst [vmem:[%s1698_s2 + $0x10] sm:$0xff] %v812_v27  ;;  %v804_v29 = vadd.f32 %v803_v19, %v707_v14  ;;  %v835_v31 = vpop.f32.mrf.mxu1  ;;  %v905_v21 = vmul.f32 %v812_v27, %v812_v27 }
 0x127   :  { %876 = vst [vmem:[%s1698_s2 + $0x50] sm:$0xff] %v1611_v17  ;;  %v1626_v32 = vadd.f32 %v835_v31, %v739_v45  ;;  %v1186_v37 = vpop.f32.mrf.mxu0 }
 0x128   :  { %866 = vst [vmem:[%s1698_s2] sm:$0xff] %v804_v29  ;;  %v815_v42 = vadd.f32 %v1186_v37, %v718_v23  ;;  %v1194_v47 = vpop.f32.mrf.mxu1  ;;  %v903_v6 = vmul.f32 %v804_v29, %v804_v29 }
 0x129   :  { %874 = vst [vmem:[%s1698_s2 + $0x40] sm:$0xff] %v1626_v32  ;;  %v1639_v54 = vadd.f32 %v1194_v47, %v750_v38  ;;  %v806_v55 = vpop.f32.mrf.mxu0  ;;  %v911_v53 = vmul.f32 %v1626_v32, %v1626_v32 }
 0x12a   :  { %869 = vst [vmem:[%s1698_s2 + $0x18] sm:$0xff] %v815_v42  ;;  %v807_v60 = vadd.f32 %v806_v55, %v710_v48  ;;  %v838_v61 = vpop.f32.mrf.mxu1  ;;  %v906_v19 = vmul.f32 %v815_v42, %v815_v42 }
 0x12b   :  { %877 = vst [vmem:[%s1698_s2 + $0x58] sm:$0xff] %v1639_v54  ;;  %v839_v3 = vadd.f32 %v838_v61, %v742_v56  ;;  %v1189_v4 = vpop.f32.mrf.mxu0 }
 0x12c   :  { %867 = vst [vmem:[%s1698_s2 + $0x8] sm:$0xff] %v807_v60  ;;  %v882_v7 = vadd.f32 %v807_v60, %v804_v29  ;;  %v904_v8 = vmul.f32 %v807_v60, %v807_v60  ;;  %v828_v9 = vadd.f32 %v1189_v4, %v731_v62  ;;  %v1197_v10 = vpop.f32.mrf.mxu1  ;;  %v758_v29 = vadd.f32 %v1156_v13, %v1092_v43 }
 0x12d   :  { %875 = vst [vmem:[%s1698_s2 + $0x48] sm:$0xff] %v839_v3  ;;  %v860_v14 = vadd.f32 %v1197_v10, %v763_v5  ;;  %v819_v15 = vpop.f32.mrf.mxu0  ;;  %v912_v57 = vmul.f32 %v839_v3, %v839_v3  ;;  %v913_v60 = vmul.f32 %v1611_v17, %v1611_v17 }
 0x12e   :  { %v883_v22 = vadd.f32 %v882_v7, %v812_v27  ;;  %v919_v23 = vadd.f32 %v904_v8, %v903_v6  ;;  %872 = vst [vmem:[%s1698_s2 + $0x30] sm:$0xff] %v828_v9  ;;  %v820_v24 = vadd.f32 %v819_v15, %v723_v49  ;;  %v851_v25 = vpop.f32.mrf.mxu1  ;;  %v909_v47 = vmul.f32 %v828_v9, %v828_v9 }
 0x12f   :  { %880 = vst [vmem:[%s1698_s2 + $0x70] sm:$0xff] %v860_v14  ;;  %v852_v26 = vadd.f32 %v851_v25, %v755_v20  ;;  %v1190_v16 = vpop.f32.mrf.mxu0 }
 0x130   :  { %v920_v45 = vadd.f32 %v919_v23, %v905_v21  ;;  %870 = vst [vmem:[%s1698_s2 + $0x20] sm:$0xff] %v820_v24  ;;  %v884_v27 = vadd.f32 %v883_v22, %v815_v42  ;;  %v831_v46 = vadd.f32 %v1190_v16, %v734_v63  ;;  %v1198_v33 = vpop.f32.mrf.mxu1  ;;  %v907_v35 = vmul.f32 %v820_v24, %v820_v24 }
 0x131   :  { %878 = vst [vmem:[%s1698_s2 + $0x60] sm:$0xff] %v852_v26  ;;  %v863_v28 = vadd.f32 %v1198_v33, %v766_v18  ;;  %v822_v30 = vpop.f32.mrf.mxu0  ;;  %v914_v63 = vmul.f32 %v1639_v54, %v1639_v54  ;;  %v915_v4 = vmul.f32 %v852_v26, %v852_v26 }
 0x132   :  { %v885_v31 = vadd.f32 %v884_v27, %v820_v24  ;;  %v921_v36 = vadd.f32 %v920_v45, %v906_v19  ;;  %873 = vst [vmem:[%s1698_s2 + $0x38] sm:$0xff] %v831_v46  ;;  %v823_v37 = vadd.f32 %v822_v30, %v726_v44  ;;  %v854_v38 = vpop.f32.mrf.mxu1  ;;  %v910_v50 = vmul.f32 %v831_v46, %v831_v46 }
 0x133   :  { %881 = vst [vmem:[%s1698_s2 + $0x78] sm:$0xff] %v863_v28  ;;  %v855_v39 = vadd.f32 %v854_v38, %v758_v29  ;;  %v918_v11 = vmul.f32 %v863_v28, %v863_v28 }
 0x134   :  { %v922_v40 = vadd.f32 %v921_v36, %v907_v35  ;;  %871 = vst [vmem:[%s1698_s2 + $0x28] sm:$0xff] %v823_v37  ;;  %v886_v41 = vadd.f32 %v885_v31, %v823_v37  ;;  %v908_v42 = vmul.f32 %v823_v37, %v823_v37 }
 0x135   :  { %879 = vst [vmem:[%s1698_s2 + $0x68] sm:$0xff] %v855_v39  ;;  %v916_v7 = vmul.f32 %v855_v39, %v855_v39 }
 0x136   :  { %v887_v48 = vadd.f32 %v886_v41, %v828_v9  ;;  %v923_v49 = vadd.f32 %v922_v40, %v908_v42  ;;  %v917_v9 = vmul.f32 %v860_v14, %v860_v14 }
 0x138   :  { %v888_v51 = vadd.f32 %v887_v48, %v831_v46  ;;  %v924_v52 = vadd.f32 %v923_v49, %v909_v47 }
 0x13a   :  { %v889_v55 = vadd.f32 %v888_v51, %v1626_v32  ;;  %v925_v56 = vadd.f32 %v924_v52, %v910_v50 }
 0x13c   :  { %v926_v58 = vadd.f32 %v925_v56, %v911_v53  ;;  %v890_v59 = vadd.f32 %v889_v55, %v839_v3 }
 0x13e   :  { %v891_v61 = vadd.f32 %v890_v59, %v1611_v17  ;;  %v927_v62 = vadd.f32 %v926_v58, %v912_v57 }
 0x140   :  { %v892_v1 = vadd.f32 %v891_v61, %v1639_v54  ;;  %v928_v2 = vadd.f32 %v927_v62, %v913_v60 }
 0x142   :  { %v893_v5 = vadd.f32 %v892_v1, %v852_v26  ;;  %v929_v6 = vadd.f32 %v928_v2, %v914_v63 }
 0x144   :  { %v894_v32 = vadd.f32 %v893_v5, %v855_v39  ;;  %v930_v8 = vadd.f32 %v929_v6, %v915_v4 }
 0x146   :  { %v895_v3 = vadd.f32 %v894_v32, %v860_v14  ;;  %v931_v10 = vadd.f32 %v930_v8, %v916_v7 }
 0x148   :  { %v896_v34 = vadd.f32 %v895_v3, %v863_v28  ;;  %v932_v43 = vadd.f32 %v931_v10, %v917_v9 }
 0x14a   :  { %v897_v17 = vrot.slane %v896_v34, 4  ;;  %v933_v0 = vadd.f32 %v932_v43, %v918_v11 }
 0x14c   :  { %v898_v12 = vadd.f32 %v897_v17, %v896_v34  ;;  %v934_v13 = vrot.slane %v933_v0, 4 }
 0x14e   :  { %v899_v15 = vrot.slane %v898_v12, 2  ;;  %v935_v20 = vadd.f32 %v934_v13, %v933_v0 }
 0x150   :  { %v900_v54 = vadd.f32 %v899_v15, %v898_v12  ;;  %v936_v21 = vrot.slane %v935_v20, 2 }
 0x152   :  { %v901_v22 = vrot.slane %v900_v54, 1  ;;  %v937_v23 = vadd.f32 %v936_v21, %v935_v20 }
 0x154   :  { %v938_v24 = vrot.slane %v937_v23, 1  ;;  %v902_v25 = vadd.f32 %v901_v22, %v900_v54 }
 0x156   :  { %v939_v26 = vadd.f32 %v938_v24, %v937_v23 }
 0x158   :  { %v941_v16 = vsel %vm940_vm1, %v902_v25, %v939_v26 }
 0x159   :  { %942 = vst [vmem:[%s1699_s3] sm:$0x3] %v941_v16 }

// kernel: a_call__.14
= control target key start
LH: loop header
LB: loop body
LE: loop exit
PB: predicated region body
PF: predicated region fallthrough
CT: control target
= control target key end

     0   :  { %s404_s12 = smov 0   ;;  %s431_s0 = inlined_call_operand.vmem [shape: f32[128,128], index: 0, kind: input, shape index: {}]   ;;  %s432_s1 = inlined_call_operand.vmem [shape: f32[1,128], index: 1, kind: input, shape index: {}]   ;;  %s433_s2 = inlined_call_operand.vmem [shape: f32[1,128], index: 2, kind: input, shape index: {}]   ;;  %s434_s3 = inlined_call_operand.vmem [shape: bf16[128,128], index: 3, kind: output, shape index: {}]  }
   0x1 LB: > { %s316_s13 = sadd.s32 4294967295, %s382_s12   ;;  %p320_p0 = scmp.ge.s32.totalorder %s382_s12, 1  ;;  %s382_s12 = sphi %s404_s12, %s13_s12  }
   0x2   : > { %p138_p1 = scmp.lt.s32.totalorder %s382_s12, 3 }
   0x4   : > { %p139_p2 = pnand %p320_p0, %p138_p1 }
   0x5   : > { %s321_s14 = sshll.u32 (!%p139_p2), %s316_s13, 3 }
   0x6   : > { %142 = sbr.rel (%p139_p2) target bundleno = 27 (0x1b), region = 32  ;;  %p163_p3 = scmp.lt.s32.totalorder (!%p139_p2), %s321_s14, 15 }
   0xb   : > { %s436_s14 = smov (!%p163_p3, %s321_s14), 15  ;;  %v325_v0 = vld [vmem:[%s432_s1] ss:$0 sm:$0xff] }
   0xc   : > { %s322_s15 = sshll.u32 %s436_s14, 3  ;;  %v326_v1 = vld [vmem:[%s433_s2] ss:$0 sm:$0xff]  ;;  %s324_s23 = sshll.u32 %s436_s14, 2 }
   0xd   : > { %s166_s20 = scalar_lea.vmem %s431_s0, %s322_s15  ;;  %s172_s26 = scalar_lea.vmem %s434_s3, %s324_s23 }
   0xe   : > { %v174_v2 = vld [vmem:[%s166_s20] sm:$0xff]  ;;  %v175_v3 = vld [vmem:[%s166_s20 + $0x8] sm:$0xff]  ;;  %v176_v4 = vld [vmem:[%s166_s20 + $0x10] sm:$0xff] }
   0xf   : > { %v189_v5 = vmul.f32 %v325_v0, %v174_v2  ;;  %v190_v6 = vmul.f32 %v325_v0, %v175_v3  ;;  %v177_v7 = vld [vmem:[%s166_s20 + $0x18] sm:$0xff]  ;;  %v191_v8 = vmul.f32 %v325_v0, %v176_v4  ;;  %v178_v9 = vld [vmem:[%s166_s20 + $0x20] sm:$0xff]  ;;  %v179_v10 = vld [vmem:[%s166_s20 + $0x28] sm:$0xff] }
  0x10   : > { %v192_v11 = vmul.f32 %v325_v0, %v177_v7  ;;  %v193_v12 = vmul.f32 %v325_v0, %v178_v9  ;;  %v194_v13 = vmul.f32 %v325_v0, %v179_v10  ;;  %v180_v14 = vld [vmem:[%s166_s20 + $0x30] sm:$0xff]  ;;  %v181_v15 = vld [vmem:[%s166_s20 + $0x38] sm:$0xff] }
  0x11   : > { %v204_v16 = vadd.f32 %v326_v1, %v189_v5  ;;  %v205_v17 = vadd.f32 %v326_v1, %v190_v6  ;;  %v206_v18 = vadd.f32 %v326_v1, %v191_v8  ;;  %v195_v19 = vmul.f32 %v325_v0, %v180_v14 }
  0x12   : > { %v207_v20 = vadd.f32 %v326_v1, %v192_v11  ;;  %v208_v21 = vadd.f32 %v326_v1, %v193_v12  ;;  %v209_v22 = vadd.f32 %v326_v1, %v194_v13  ;;  %v196_v23 = vmul.f32 %v325_v0, %v181_v15 }
  0x13   : > { %v212_v24 = vmax.f32 %v204_v16, 0.0  ;;  %v213_v25 = vmax.f32 %v205_v17, 0.0  ;;  %v214_v26 = vmax.f32 %v206_v18, 0.0  ;;  %v210_v27 = vadd.f32 %v326_v1, %v195_v19 }
  0x14   : > { %v215_v28 = vmax.f32 %v207_v20, 0.0  ;;  %v216_v29 = vmax.f32 %v208_v21, 0.0  ;;  %v217_v30 = vmax.f32 %v209_v22, 0.0  ;;  %v211_v31 = vadd.f32 %v326_v1, %v196_v23 }
  0x15   : > { %v348_v32 = vpack.c.bf16 %v213_v25, %v212_v24  ;;  %v218_v33 = vmax.f32 %v210_v27, 0.0 }
  0x16   : > { %v353_v34 = vpack.c.bf16 %v215_v28, %v214_v26  ;;  %v358_v35 = vpack.c.bf16 %v217_v30, %v216_v29  ;;  %v219_v36 = vmax.f32 %v211_v31, 0.0 }
  0x17   : > { %349 = vst [vmem:[%s172_s26] sm:$0xff] %v348_v32  }
  0x18   : > { %365 = vst [vmem:[%s172_s26 + $0x8] sm:$0xff] %v353_v34   ;;  %366 = vst [vmem:[%s172_s26 + $0x10] sm:$0xff] %v358_v35   ;;  %v363_v37 = vpack.c.bf16 %v219_v36, %v218_v33 }
  0x1a   : > { %367 = vst [vmem:[%s172_s26 + $0x18] sm:$0xff] %v363_v37  }
  0x1b PF: > { %s13_s12 = sadd.s32 1, %s382_s12  }
  0x1c   : > { %p10_p4 = scmp.ge.s32.totalorder %s13_s12, 4  }
  0x1e   :  { %12 = sbr.rel (!%p10_p4) target bundleno = 1 (0x1), region = 62 }

// kernel: a_call__.15
= control target key start
LH: loop header
LB: loop body
LE: loop exit
PB: predicated region body
PF: predicated region fallthrough
CT: control target
= control target key end

     0   :  { %s1602_s12 = smov 0   ;;  %s1906_s0 = inlined_call_operand.vmem [shape: bf16[256,576], index: 0, kind: input, shape index: {}]   ;;  %s1907_s1 = inlined_call_operand.vmem [shape: bf16[576,128], index: 1, kind: input, shape index: {}]   ;;  %s1908_s2 = inlined_call_operand.vmem [shape: f32[256,128], index: 2, kind: output, shape index: {0}]   ;;  %s1909_s3 = inlined_call_operand.vmem [shape: f32[2,2,128], index: 3, kind: output, shape index: {1}]  }
   0x1 LB: > { %s1608_s13 = sadd.s32 4294967295, %s1580_s12   ;;  %p1209_p0 = scmp.ge.s32.totalorder %s1580_s12, 1  ;;  %s1580_s12 = sphi %s1602_s12, %s14_s12  }
   0x2   : > { %p142_p1 = scmp.lt.s32.totalorder %s1580_s12, 3 }
   0x4   : > { %p143_p2 = pnand %p1209_p0, %p142_p1 }
   0x6   : > { %146 = sbr.rel (%p143_p2) target bundleno = 356 (0x164), region = 28 }
   0xb   : > { %v1482_v0 = vld [vmem:[%s1907_s1 + $0x78] sm:$0xff]   ;;  %v1486_v4 = vld [vmem:[%s1907_s1 + $0x70] sm:$0xff]   ;;  %v1490_v8 = vld [vmem:[%s1907_s1 + $0x68] sm:$0xff]   ;;  %s1210_s19 = sshll.u32 %s1608_s13, 4  ;;  %vm725_vm0 = vcmask 523264   ;;  %p184_p4 = scmp.lt.s32.totalorder %s1608_s13, 1 }
   0xc   : > { %v1483_v1 = vld [vmem:[%s1907_s1 + $0xf8] sm:$0xff]   ;;  %1301 = vmatprep.subr.bf16.mxu0 %v1482_v0  ;;  %v1487_v5 = vld [vmem:[%s1907_s1 + $0xf0] sm:$0xff]   ;;  %v1491_v9 = vld [vmem:[%s1907_s1 + $0xe8] sm:$0xff]   ;;  %p172_p3 = scmp.lt.s32.totalorder %s1210_s19, 31  ;;  %vm1115_vm1 = vcmask 1040384  }
   0xd   : > { %v1484_v2 = vld [vmem:[%s1907_s1 + $0x38] sm:$0xff]   ;;  %1365 = vmatprep.subr.bf16.mxu1 %v1483_v1  ;;  %v1488_v6 = vld [vmem:[%s1907_s1 + $0x30] sm:$0xff]   ;;  %v1492_v10 = vld [vmem:[%s1907_s1 + $0x28] sm:$0xff]   ;;  %s1933_s13 = smov (!%p184_p4, %s1608_s13), 1 }
   0xe   : > { %v1485_v3 = vld [vmem:[%s1907_s1 + $0xb8] sm:$0xff]   ;;  %1302 = vmatpush3.bf16.msra.mxu0 %v1484_v2  ;;  %v1489_v7 = vld [vmem:[%s1907_s1 + $0xb0] sm:$0xff]   ;;  %v1493_v11 = vld [vmem:[%s1907_s1 + $0xa8] sm:$0xff]   ;;  %s1931_s19 = smov (!%p172_p3, %s1210_s19), 31 }
   0xf   : > { %1366 = vmatpush3.bf16.msra.mxu1 %v1485_v3  ;;  %1303 = vmatprep.subr.bf16.mxu0 %v1486_v4  ;;  %v1494_v12 = vld [vmem:[%s1907_s1 + $0x60] sm:$0xff]   ;;  %v1498_v16 = vld [vmem:[%s1907_s1 + $0x58] sm:$0xff]   ;;  %v1502_v20 = vld [vmem:[%s1907_s1 + $0x50] sm:$0xff]   ;;  %s1473_s17 = smul.u32 20, %s1931_s19 }
  0x10   : > { %1367 = vmatprep.subr.bf16.mxu1 %v1487_v5  ;;  %v1495_v13 = vld [vmem:[%s1907_s1 + $0xe0] sm:$0xff]   ;;  %v1499_v17 = vld [vmem:[%s1907_s1 + $0xd8] sm:$0xff]   ;;  %v1503_v21 = vld [vmem:[%s1907_s1 + $0xd0] sm:$0xff]  }
  0x11   : > { %v1496_v14 = vld [vmem:[%s1907_s1 + $0x20] sm:$0xff]   ;;  %v1500_v18 = vld [vmem:[%s1907_s1 + $0x18] sm:$0xff]   ;;  %v1504_v22 = vld [vmem:[%s1907_s1 + $0x10] sm:$0xff]   ;;  %s1709_s29 = scalar_lea.vmem %s1906_s0, %s1473_s17  ;;  %s1213_s17 = sshll.u32 %s1931_s19, 3 }
  0x12   : > { %1304 = vmatpush3.bf16.msra.mxu0 %v1488_v6  ;;  %v1497_v15 = vld [vmem:[%s1907_s1 + $0xa0] sm:$0xff]   ;;  %v1501_v19 = vld [vmem:[%s1907_s1 + $0x98] sm:$0xff]   ;;  %v1505_v23 = vld [vmem:[%s1907_s1 + $0x90] sm:$0xff]   ;;  %s1839_s21 = scalar_lea.vmem %s1908_s2, %s1213_s17  ;;  %s1214_s19 = sshll.u32 %s1933_s13, 1 }
  0x13   : > { %1368 = vmatpush3.bf16.msra.mxu1 %v1489_v7  ;;  %1305 = vmatprep.subr.bf16.mxu0 %v1490_v8  ;;  %v1506_v24 = vld [vmem:[%s1907_s1 + $0x48] sm:$0xff]   ;;  %v1510_v28 = vld [vmem:[%s1907_s1 + $0x40] sm:$0xff]   ;;  %v1520_v36 = vld [vmem:[%s1907_s1 + $0x118] sm:$0xff]   ;;  %s187_s24 = scalar_lea.vmem %s1909_s3, %s1214_s19 }
  0x14   : > { %1369 = vmatprep.subr.bf16.mxu1 %v1491_v9  ;;  %v1507_v25 = vld [vmem:[%s1907_s1 + $0xc8] sm:$0xff]   ;;  %v1511_v29 = vld [vmem:[%s1907_s1 + $0xc0] sm:$0xff]   ;;  %v1533_v42 = vld [vmem:[%s1907_s1 + $0x110] sm:$0xff]  }
  0x15   : > { %v1508_v26 = vld [vmem:[%s1907_s1 + $0x8] sm:$0xff]   ;;  %v1512_v30 = vld [vmem:[%s1907_s1] sm:$0xff]   ;;  %v1529_v43 = vld [vmem:[%s1709_s29 + $0x5c] ss:$20 sps:$4 sm:$0xff]  }
  0x16   : > { %1306 = vmatpush3.bf16.msra.mxu0 %v1492_v10  ;;  %v1509_v27 = vld [vmem:[%s1907_s1 + $0x88] sm:$0xff]   ;;  %v1513_v31 = vld [vmem:[%s1907_s1 + $0x80] sm:$0xff]   ;;  %v1534_v47 = vld [vmem:[%s1709_s29 + $0x7c] ss:$20 sps:$4 sm:$0xff]  }
  0x17   : > { %1370 = vmatpush3.bf16.msra.mxu1 %v1493_v11  ;;  %1307 = vmatprep.subr.bf16.mxu0 %v1494_v12  ;;  %v1514_v32 = vld [vmem:[%s1709_s29] ss:$20 sps:$4 sm:$0xff]   ;;  %v1516_v33 = vld [vmem:[%s1709_s29 + $0x4] ss:$20 sps:$4 sm:$0xff]   ;;  %v1517_v34 = vld [vmem:[%s1709_s29 + $0x8] ss:$20 sps:$4 sm:$0xff]  }
  0x18   : > { %1371 = vmatprep.subr.bf16.mxu1 %v1495_v13  ;;  %v1519_v35 = vld [vmem:[%s1709_s29 + $0xc] ss:$20 sps:$4 sm:$0xff]   ;;  %782 = vmatprep.mubr.bf16.mxu0 %v1516_v33  ;;  %v1523_v38 = vld [vmem:[%s1709_s29 + $0x34] ss:$20 sps:$4 sm:$0xff]   ;;  %v1526_v40 = vld [vmem:[%s1709_s29 + $0x30] ss:$20 sps:$4 sm:$0xff]  }
  0x19   : > { %879 = vmatprep.mubr.bf16.mxu1 %v1519_v35  ;;  %v1521_v37 = vld [vmem:[%s1709_s29 + $0x2c] ss:$20 sps:$4 sm:$0xff]   ;;  %v1525_v39 = vld [vmem:[%s1709_s29 + $0x28] ss:$20 sps:$4 sm:$0xff]   ;;  %v1531_v44 = vld [vmem:[%s1709_s29 + $0x50] ss:$20 sps:$4 sm:$0xff]  }
  0x1a   : > { %1308 = vmatpush3.bf16.msra.mxu0 %v1496_v14  ;;  %v1527_v41 = vld [vmem:[%s1709_s29 + $0x54] ss:$20 sps:$4 sm:$0xff]   ;;  %v1532_v45 = vld [vmem:[%s1709_s29 + $0x58] ss:$20 sps:$4 sm:$0xff]   ;;  %v1559_v49 = vld [vmem:[%s1907_s1 + $0x100] sm:$0xff]  }
  0x1b   : > { %1372 = vmatpush3.bf16.msra.mxu1 %v1497_v15  ;;  %1309 = vmatprep.subr.bf16.mxu0 %v1498_v16  ;;  %v1546_v46 = vld [vmem:[%s1907_s1 + $0x108] sm:$0xff]   ;;  %v1536_v48 = vld [vmem:[%s1709_s29 + $0x84] ss:$20 sps:$4 sm:$0xff]   ;;  %v1539_v51 = vld [vmem:[%s1709_s29 + $0x80] ss:$20 sps:$4 sm:$0xff]  }
  0x1c   : > { %1373 = vmatprep.subr.bf16.mxu1 %v1499_v17  ;;  %v1538_v50 = vld [vmem:[%s1709_s29 + $0x78] ss:$20 sps:$4 sm:$0xff]   ;;  %v1544_v54 = vld [vmem:[%s1709_s29 + $0xa0] ss:$20 sps:$4 sm:$0xff]   ;;  %v1545_v55 = vld [vmem:[%s1709_s29 + $0xa8] ss:$20 sps:$4 sm:$0xff]  }
  0x1d   : > { %v1540_v52 = vld [vmem:[%s1709_s29 + $0xa4] ss:$20 sps:$4 sm:$0xff]   ;;  %v1542_v53 = vld [vmem:[%s1709_s29 + $0xac] ss:$20 sps:$4 sm:$0xff]   ;;  %v1549_v57 = vld [vmem:[%s1709_s29 + $0xd4] ss:$20 sps:$4 sm:$0xff]  }
  0x1e   : > { %1310 = vmatpush3.bf16.msra.mxu0 %v1500_v18  ;;  %v1547_v56 = vld [vmem:[%s1709_s29 + $0xcc] ss:$20 sps:$4 sm:$0xff]   ;;  %v1551_v58 = vld [vmem:[%s1709_s29 + $0xc8] ss:$20 sps:$4 sm:$0xff]   ;;  %v1552_v59 = vld [vmem:[%s1709_s29 + $0xd0] ss:$20 sps:$4 sm:$0xff]  }
  0x1f   : > { %1374 = vmatpush3.bf16.msra.mxu1 %v1501_v19  ;;  %1311 = vmatprep.subr.bf16.mxu0 %v1502_v20  ;;  %v1553_v60 = vld [vmem:[%s1709_s29 + $0xf4] ss:$20 sps:$4 sm:$0xff]   ;;  %v1555_v61 = vld [vmem:[%s1709_s29 + $0xfc] ss:$20 sps:$4 sm:$0xff]   ;;  %v1558_v63 = vld [vmem:[%s1709_s29 + $0xf8] ss:$20 sps:$4 sm:$0xff]  }
  0x20   : > { %1375 = vmatprep.subr.bf16.mxu1 %v1503_v21  ;;  %v1557_v62 = vld [vmem:[%s1709_s29 + $0xf0] ss:$20 sps:$4 sm:$0xff]   ;;  %v1564_v2 = vld [vmem:[%s1709_s29 + $0x118] ss:$20 sps:$4 sm:$0xff]   ;;  %v1565_v3 = vld [vmem:[%s1709_s29 + $0x120] ss:$20 sps:$4 sm:$0xff]  }
  0x21   : > { %v1560_v0 = vld [vmem:[%s1709_s29 + $0x11c] ss:$20 sps:$4 sm:$0xff]   ;;  %v1562_v1 = vld [vmem:[%s1709_s29 + $0x124] ss:$20 sps:$4 sm:$0xff]   ;;  %v1570_v8 = vld [vmem:[%s1709_s29 + $0x60] ss:$20 sps:$4 sm:$0xff]  }
  0x22   : > { %1312 = vmatpush3.bf16.msra.mxu0 %v1504_v22  ;;  %v1566_v4 = vld [vmem:[%s1709_s29 + $0x10] ss:$20 sps:$4 sm:$0xff]   ;;  %v1568_v6 = vld [vmem:[%s1709_s29 + $0x38] ss:$20 sps:$4 sm:$0xff]   ;;  %v1571_v9 = vld [vmem:[%s1709_s29 + $0x100] ss:$20 sps:$4 sm:$0xff]  }
  0x23   : > { %1376 = vmatpush3.bf16.msra.mxu1 %v1505_v23  ;;  %1313 = vmatprep.subr.bf16.mxu0 %v1506_v24  ;;  %v1567_v5 = vld [vmem:[%s1709_s29 + $0xb0] ss:$20 sps:$4 sm:$0xff]   ;;  %v1569_v7 = vld [vmem:[%s1709_s29 + $0xd8] ss:$20 sps:$4 sm:$0xff]   ;;  %v1572_v10 = vld [vmem:[%s1709_s29 + $0x88] ss:$20 sps:$4 sm:$0xff]  }
  0x24   : > { %1377 = vmatprep.subr.bf16.mxu1 %v1507_v25  ;;  %v1573_v11 = vld [vmem:[%s1709_s29 + $0x128] ss:$20 sps:$4 sm:$0xff]  }
  0x26   : > { %1314 = vmatpush3.bf16.msra.mxu0 %v1508_v26 }
  0x27   : > { %1378 = vmatpush3.bf16.msra.mxu1 %v1509_v27  ;;  %1315 = vmatprep.subr.bf16.mxu0 %v1510_v28 }
  0x28   : > { %1379 = vmatprep.subr.bf16.mxu1 %v1511_v29 }
  0x2a   : > { %1316 = vmatpush3.bf16.msra.mxu0 %v1512_v30 }
  0x2b   : > { %1380 = vmatpush3.bf16.msra.mxu1 %v1513_v31  ;;  %1441 = vmatprep.subr.bf16.mxu0 %v1520_v36 }
  0x2c   : > { %1465 = vmatprep.subr.bf16.mxu1 %v1520_v36 }
  0x2d   : > { %783 = vmatmul.mubr.bf16.vlgmr.msra.gmra.mxu0 %v1514_v32 }
  0x2e   : > { %880 = vmatmul.mubr.bf16.vlgmr.msra.gmra.mxu1 %v1517_v34  ;;  %1442 = vmatpush3.bf16.msra.mxu0 %v1520_v36 }
  0x2f   : > { %790 = vmatprep.mubr.bf16.mxu0 %v1521_v37  ;;  %887 = vmatprep.mubr.bf16.mxu1 %v1523_v38 }
  0x30   : > { %1469 = vmatpush3.bf16.msra.mxu1 %v1520_v36  ;;  %1443 = vmatprep.subr.bf16.mxu0 %v1533_v42 }
  0x31   : > { %1466 = vmatprep.subr.bf16.mxu1 %v1533_v42 }
  0x32   : > { %1444 = vmatpush3.bf16.msra.mxu0 %v1533_v42 }
  0x33   : > { %1445 = vmatprep.subr.bf16.mxu0 %v1546_v46 }
  0x34   : > { %1470 = vmatpush3.bf16.msra.mxu1 %v1533_v42 }
  0x35   : > { %791 = vmatmul.mubr.bf16.gmra.mxu0 %v1525_v39  ;;  %1467 = vmatprep.subr.bf16.mxu1 %v1546_v46 }
  0x36   : > { %888 = vmatmul.mubr.bf16.gmra.mxu1 %v1526_v40  ;;  %798 = vmatprep.mubr.bf16.mxu0 %v1527_v41 }
  0x37   : > { %895 = vmatprep.mubr.bf16.mxu1 %v1529_v43  ;;  %1446 = vmatpush3.bf16.msra.mxu0 %v1546_v46 }
  0x38   : > { %1471 = vmatpush3.bf16.msra.mxu1 %v1546_v46  ;;  %1447 = vmatprep.subr.bf16.mxu0 %v1559_v49 }
  0x39   : > { %1468 = vmatprep.subr.bf16.mxu1 %v1559_v49 }
  0x3b   : > { %1448 = vmatpush3.bf16.msra.mxu0 %v1559_v49 }
  0x3c   : > { %1472 = vmatpush3.bf16.msra.mxu1 %v1559_v49 }
  0x3d   : > { %799 = vmatmul.mubr.bf16.gmra.mxu0 %v1531_v44 }
  0x3e   : > { %896 = vmatmul.mubr.bf16.gmra.mxu1 %v1532_v45  ;;  %806 = vmatprep.mubr.bf16.mxu0 %v1534_v47 }
  0x3f   : > { %903 = vmatprep.mubr.bf16.mxu1 %v1536_v48 }
  0x45   : > { %807 = vmatmul.mubr.bf16.gmra.mxu0 %v1538_v50 }
  0x46   : > { %904 = vmatmul.mubr.bf16.gmra.mxu1 %v1539_v51  ;;  %814 = vmatprep.mubr.bf16.mxu0 %v1540_v52 }
  0x47   : > { %911 = vmatprep.mubr.bf16.mxu1 %v1542_v53 }
  0x4d   : > { %815 = vmatmul.mubr.bf16.gmra.mxu0 %v1544_v54 }
  0x4e   : > { %912 = vmatmul.mubr.bf16.gmra.mxu1 %v1545_v55  ;;  %822 = vmatprep.mubr.bf16.mxu0 %v1547_v56 }
  0x4f   : > { %919 = vmatprep.mubr.bf16.mxu1 %v1549_v57 }
  0x55   : > { %823 = vmatmul.mubr.bf16.gmra.mxu0 %v1551_v58 }
  0x56   : > { %920 = vmatmul.mubr.bf16.gmra.mxu1 %v1552_v59  ;;  %830 = vmatprep.mubr.bf16.mxu0 %v1553_v60 }
  0x57   : > { %927 = vmatprep.mubr.bf16.mxu1 %v1555_v61 }
  0x5d   : > { %831 = vmatmul.mubr.bf16.gmra.mxu0 %v1557_v62 }
  0x5e   : > { %928 = vmatmul.mubr.bf16.gmra.mxu1 %v1558_v63  ;;  %838 = vmatprep.mubr.bf16.mxu0 %v1560_v0 }
  0x5f   : > { %935 = vmatprep.mubr.bf16.mxu1 %v1562_v1 }
  0x65   : > { %839 = vmatmul.mubr.bf16.gmra.mxu0 %v1564_v2 }
  0x66   : > { %936 = vmatmul.mubr.bf16.gmra.mxu1 %v1565_v3  ;;  %1449 = vmatprep.mubr.msk.bf16.mxu0 %vm725_vm0, %v1566_v4 }
  0x67   : > { %1457 = vmatprep.mubr.msk.bf16.mxu1 %vm725_vm0, %v1567_v5 }
  0x6d   : > { %1450 = vmatmul.mubr.msk.bf16.vlgmr.msra.gmra.mxu0 %vm725_vm0, %v1568_v6 }
  0x6e   : > { %1458 = vmatmul.mubr.msk.bf16.vlgmr.msra.gmra.mxu1 %vm725_vm0, %v1569_v7  ;;  %1453 = vmatprep.mubr.msk.bf16.mxu0 %vm725_vm0, %v1570_v8 }
  0x6f   : > { %1461 = vmatprep.mubr.msk.bf16.mxu1 %vm725_vm0, %v1571_v9 }
  0x75   : > { %1454 = vmatmul.mubr.msk.bf16.gmra.mxu0 %vm725_vm0, %v1572_v10 }
  0x76   : > { %1462 = vmatmul.mubr.msk.bf16.gmra.mxu1 %vm725_vm0, %v1573_v11 }
  0xed   : > { %v1317_v12 = vpop.f32.mrf.mxu0 }
  0xee   : > { %v1381_v13 = vpop.f32.mrf.mxu1 }
  0xef   : > { %v1318_v14 = vpop.f32.mrf.mxu0 }
  0xf0   : > { %v1382_v15 = vpop.f32.mrf.mxu1  ;;  %v1319_v7 = vadd.f32 %v1318_v14, %v1317_v12 }
  0xf1   : > { %v1777_v16 = vpop.f32.mrf.mxu0  ;;  %v1383_v8 = vadd.f32 %v1382_v15, %v1381_v13 }
  0xf2   : > { %v1779_v17 = vpop.f32.mrf.mxu1 }
  0xf3   : > { %v1781_v18 = vpop.f32.mrf.mxu0  ;;  %v882_v15 = vadd.f32 %v1383_v8, %v1319_v7 }
  0xf4   : > { %v1783_v19 = vpop.f32.mrf.mxu1 }
  0xf5   : > { %v1323_v20 = vpop.f32.mrf.mxu0  ;;  %v1386_v12 = vadd.f32 %v1783_v19, %v1779_v17 }
  0xf6   : > { %v1387_v21 = vpop.f32.mrf.mxu1 }
  0xf7   : > { %v1324_v22 = vpop.f32.mrf.mxu0 }
  0xf8   : > { %v1388_v23 = vpop.f32.mrf.mxu1  ;;  %v1325_v9 = vadd.f32 %v1324_v22, %v1323_v20 }
  0xf9   : > { %v1326_v24 = vpop.f32.mrf.mxu0  ;;  %v1389_v10 = vadd.f32 %v1388_v23, %v1387_v21 }
  0xfa   : > { %v1390_v25 = vpop.f32.mrf.mxu1 }
  0xfb   : > { %v1327_v26 = vpop.f32.mrf.mxu0  ;;  %v890_v14 = vadd.f32 %v1389_v10, %v1325_v9 }
  0xfc   : > { %v1391_v27 = vpop.f32.mrf.mxu1 }
  0xfd   : > { %v1785_v28 = vpop.f32.mrf.mxu0 }
  0xfe   : > { %v1787_v29 = vpop.f32.mrf.mxu1 }
  0xff   : > { %v1789_v30 = vpop.f32.mrf.mxu0 }
 0x100   : > { %v1791_v31 = vpop.f32.mrf.mxu1 }
 0x101   : > { %v1793_v32 = vpop.f32.mrf.mxu0  ;;  %v1395_v17 = vadd.f32 %v1791_v31, %v1787_v29 }
 0x102   : > { %v1795_v33 = vpop.f32.mrf.mxu1 }
 0x103   : > { %1910 = vst [vmem:[#allocation2_spill] sm:$0xff] %v1795_v33  ;;  %v1797_v34 = vpop.f32.mrf.mxu0  ;;  %v1392_v33 = vadd.f32 %v1391_v27, %v1390_v25 }
 0x104   : > { %v1799_v35 = vpop.f32.mrf.mxu1 }
 0x105   : > { %1911 = vst [vmem:[#allocation3_spill] sm:$0xff] %v1799_v35  ;;  %v1801_v36 = vpop.f32.mrf.mxu0  ;;  %v1328_v35 = vadd.f32 %v1327_v26, %v1326_v24 }
 0x106   : > { %v1803_v37 = vpop.f32.mrf.mxu1 }
 0x107   : > { %v1336_v38 = vpop.f32.mrf.mxu0  ;;  %v893_v24 = vadd.f32 %v1392_v33, %v1328_v35 }
 0x108   : > { %v1805_v39 = vpop.f32.mrf.mxu1 }
 0x109   : > { %v1807_v40 = vpop.f32.mrf.mxu0  ;;  %v1401_v33 = vadd.f32 %v1805_v39, %v1803_v37  ;;  %v1334_v37 = vadd.f32 %v1797_v34, %v1793_v32 }
 0x10a   : > { %v1809_v41 = vpop.f32.mrf.mxu1  ;;  %v1924_v32 = vld [vmem:[#allocation2_spill] sm:$0xff] }
 0x10b   : > { %v1811_v42 = vpop.f32.mrf.mxu0 }
 0x10c   : > { %v1813_v43 = vpop.f32.mrf.mxu1  ;;  %v1925_v34 = vld [vmem:[#allocation3_spill] sm:$0xff] }
 0x10d   : > { %v1341_v44 = vpop.f32.mrf.mxu0  ;;  %v1404_v29 = vadd.f32 %v1813_v43, %v1809_v41 }
 0x10e   : > { %v1405_v45 = vpop.f32.mrf.mxu1 }
 0x10f   : > { %v1342_v46 = vpop.f32.mrf.mxu0 }
 0x110   : > { %v1406_v47 = vpop.f32.mrf.mxu1 }
 0x111   : > { %v1344_v48 = vpop.f32.mrf.mxu0 }
 0x112   : > { %v1408_v49 = vpop.f32.mrf.mxu1 }
 0x113   : > { %v1345_v50 = vpop.f32.mrf.mxu0 }
 0x114   : > { %v1409_v51 = vpop.f32.mrf.mxu1  ;;  %v1346_v26 = vadd.f32 %v1345_v50, %v1344_v48 }
 0x115   : > { %v1347_v52 = vpop.f32.mrf.mxu0  ;;  %v1410_v27 = vadd.f32 %v1409_v51, %v1408_v49 }
 0x116   : > { %v1411_v53 = vpop.f32.mrf.mxu1 }
 0x117   : > { %v1348_v54 = vpop.f32.mrf.mxu0 }
 0x118   : > { %v1412_v55 = vpop.f32.mrf.mxu1 }
 0x119   : > { %v1350_v56 = vpop.f32.mrf.mxu0 }
 0x11a   : > { %v1414_v57 = vpop.f32.mrf.mxu1 }
 0x11b   : > { %v1351_v58 = vpop.f32.mrf.mxu0 }
 0x11c   : > { %v1415_v59 = vpop.f32.mrf.mxu1  ;;  %v1352_v20 = vadd.f32 %v1351_v58, %v1350_v56  ;;  %v917_v56 = vadd.f32 %v1410_v27, %v1346_v26 }
 0x11d   : > { %v1815_v60 = vpop.f32.mrf.mxu0  ;;  %v1416_v21 = vadd.f32 %v1415_v59, %v1414_v57  ;;  %v1398_v57 = vadd.f32 %v1925_v34, %v1924_v32 }
 0x11e   : > { %1912 = vst [vmem:[#allocation4_spill] sm:$0xff] %v1815_v60  ;;  %v1817_v61 = vpop.f32.mrf.mxu1 }
 0x11f   : > { %1913 = vst [vmem:[#allocation5_spill] sm:$0xff] %v1817_v61  ;;  %v1819_v62 = vpop.f32.mrf.mxu0  ;;  %v1413_v61 = vadd.f32 %v1412_v55, %v1411_v53  ;;  %v925_v48 = vadd.f32 %v1416_v21, %v1352_v20  ;;  %v901_v26 = vadd.f32 %v1398_v57, %v1334_v37 }
 0x120   : > { %1914 = vst [vmem:[#allocation6_spill] sm:$0xff] %v1819_v62  ;;  %v1821_v63 = vpop.f32.mrf.mxu1 }
 0x121   : > { %1915 = vst [vmem:[#allocation7_spill] sm:$0xff] %v1821_v63  ;;  %v1823_v0 = vpop.f32.mrf.mxu0  ;;  %v1349_v63 = vadd.f32 %v1348_v54, %v1347_v52 }
 0x122   : > { %1916 = vst [vmem:[#allocation8_spill] sm:$0xff] %v1823_v0  ;;  %v1825_v1 = vpop.f32.mrf.mxu1 }
 0x123   : > { %1917 = vst [vmem:[#allocation9_spill] sm:$0xff] %v1825_v1  ;;  %v1827_v2 = vpop.f32.mrf.mxu0  ;;  %v1343_v1 = vadd.f32 %v1342_v46, %v1341_v44  ;;  %v922_v23 = vadd.f32 %v1413_v61, %v1349_v63 }
 0x124   : > { %1918 = vst [vmem:[#allocation10_spill] sm:$0xff] %v1827_v2  ;;  %v1829_v3 = vpop.f32.mrf.mxu1  ;;  %v1407_v2 = vadd.f32 %v1406_v47, %v1405_v45 }
 0x125   : > { %1919 = vst [vmem:[#allocation11_spill] sm:$0xff] %v1829_v3  ;;  %v1359_v4 = vpop.f32.mrf.mxu0  ;;  %v1322_v3 = vadd.f32 %v1781_v18, %v1777_v16  ;;  %v1331_v16 = vadd.f32 %v1789_v30, %v1785_v28  ;;  %v1337_v18 = vadd.f32 %v1336_v38, %v1801_v36  ;;  %v1340_v28 = vadd.f32 %v1811_v42, %v1807_v40  ;;  %v1920_v43 = vld [vmem:[#allocation4_spill] sm:$0xff] }
 0x126   : > { %v1423_v5 = vpop.f32.mrf.mxu1  ;;  %v914_v46 = vadd.f32 %v1407_v2, %v1343_v1  ;;  %v1922_v51 = vld [vmem:[#allocation5_spill] sm:$0xff] }
 0x127   : > { %v1360_v6 = vpop.f32.mrf.mxu0  ;;  %v885_v41 = vadd.f32 %v1386_v12, %v1322_v3  ;;  %v898_v42 = vadd.f32 %v1395_v17, %v1331_v16  ;;  %v1921_v49 = vld [vmem:[#allocation6_spill] sm:$0xff]  ;;  %v906_v61 = vadd.f32 %v1401_v33, %v1337_v18  ;;  %v909_v63 = vadd.f32 %v1404_v29, %v1340_v28 }
 0x128   : > { %v1424_v11 = vpop.f32.mrf.mxu1  ;;  %v1361_v35 = vadd.f32 %v1360_v6, %v1359_v4  ;;  %v1355_v50 = vadd.f32 %v1921_v49, %v1920_v43  ;;  %v1923_v52 = vld [vmem:[#allocation7_spill] sm:$0xff] }
 0x129   : > { %v1362_v0 = vpop.f32.mrf.mxu0  ;;  %v1425_v36 = vadd.f32 %v1424_v11, %v1423_v5  ;;  %v1419_v53 = vadd.f32 %v1923_v52, %v1922_v51  ;;  %v1926_v11 = vld [vmem:[#allocation8_spill] sm:$0xff] }
 0x12a   : > { %v1426_v62 = vpop.f32.mrf.mxu1 }
 0x12b   : > { %v1363_v60 = vpop.f32.mrf.mxu0  ;;  %v938_v5 = vadd.f32 %v1425_v36, %v1361_v35  ;;  %v1927_v12 = vld [vmem:[#allocation10_spill] sm:$0xff] }
 0x12c   : > { %v1427_v13 = vpop.f32.mrf.mxu1  ;;  %v1364_v1 = vadd.f32 %v1363_v60, %v1362_v0  ;;  %v1929_v20 = vld [vmem:[#allocation11_spill] sm:$0xff] }
 0x12d   : > { %v1451_v22 = vpop.f32.mrf.mxu0  ;;  %v1428_v2 = vadd.f32 %v1427_v13, %v1426_v62  ;;  %v930_v13 = vadd.f32 %v1419_v53, %v1355_v50 }
 0x12e   : > { %v987_v19 = vadd.f32 %v1451_v22, %v890_v14  ;;  %v1459_v25 = vpop.f32.mrf.mxu1  ;;  %v1358_v14 = vadd.f32 %v1927_v12, %v1926_v11 }
 0x12f   : > { %v1846_v44 = vadd.f32 %v1459_v25, %v922_v23  ;;  %v978_v45 = vpop.f32.mrf.mxu0  ;;  %v941_v25 = vadd.f32 %v1428_v2, %v1364_v1 }
 0x130   : > { %1043 = vst [vmem:[%s1839_s21 + $0x10] sm:$0xff] %v987_v19  ;;  %v979_v30 = vadd.f32 %v978_v45, %v882_v15  ;;  %v1010_v31 = vpop.f32.mrf.mxu1  ;;  %v1928_v15 = vld [vmem:[#allocation9_spill] sm:$0xff]  ;;  %v1080_v21 = vmul.f32 %v987_v19, %v987_v19 }
 0x131   : > { %1051 = vst [vmem:[%s1839_s21 + $0x50] sm:$0xff] %v1846_v44  ;;  %v1857_v38 = vadd.f32 %v1010_v31, %v914_v46  ;;  %v1452_v47 = vpop.f32.mrf.mxu0  ;;  %v1422_v60 = vadd.f32 %v1929_v20, %v1928_v15 }
 0x132   : > { %1041 = vst [vmem:[%s1839_s21] sm:$0xff] %v979_v30  ;;  %v990_v39 = vadd.f32 %v1452_v47, %v893_v24  ;;  %v1460_v40 = vpop.f32.mrf.mxu1  ;;  %v1078_v6 = vmul.f32 %v979_v30, %v979_v30 }
 0x133   : > { %1049 = vst [vmem:[%s1839_s21 + $0x40] sm:$0xff] %v1857_v38  ;;  %v1868_v54 = vadd.f32 %v1460_v40, %v925_v48  ;;  %v981_v55 = vpop.f32.mrf.mxu0  ;;  %v1086_v53 = vmul.f32 %v1857_v38, %v1857_v38 }
 0x134   : > { %1044 = vst [vmem:[%s1839_s21 + $0x18] sm:$0xff] %v990_v39  ;;  %v982_v58 = vadd.f32 %v981_v55, %v885_v41  ;;  %v1013_v59 = vpop.f32.mrf.mxu1  ;;  %v1081_v27 = vmul.f32 %v990_v39, %v990_v39 }
 0x135   : > { %1052 = vst [vmem:[%s1839_s21 + $0x58] sm:$0xff] %v1868_v54  ;;  %v1014_v3 = vadd.f32 %v1013_v59, %v917_v56  ;;  %v1455_v4 = vpop.f32.mrf.mxu0 }
 0x136   : > { %1042 = vst [vmem:[%s1839_s21 + $0x8] sm:$0xff] %v982_v58  ;;  %v1057_v7 = vadd.f32 %v982_v58, %v979_v30  ;;  %v1079_v8 = vmul.f32 %v982_v58, %v982_v58  ;;  %v1003_v9 = vadd.f32 %v1455_v4, %v906_v61  ;;  %v1463_v10 = vpop.f32.mrf.mxu1  ;;  %v933_v30 = vadd.f32 %v1422_v60, %v1358_v14 }
 0x137   : > { %1050 = vst [vmem:[%s1839_s21 + $0x48] sm:$0xff] %v1014_v3  ;;  %v1035_v62 = vadd.f32 %v1463_v10, %v938_v5  ;;  %v994_v0 = vpop.f32.mrf.mxu0  ;;  %v1087_v32 = vmul.f32 %v1014_v3, %v1014_v3  ;;  %v1088_v58 = vmul.f32 %v1846_v44, %v1846_v44 }
 0x138   : > { %v1058_v22 = vadd.f32 %v1057_v7, %v987_v19  ;;  %v1094_v23 = vadd.f32 %v1079_v8, %v1078_v6  ;;  %1047 = vst [vmem:[%s1839_s21 + $0x30] sm:$0xff] %v1003_v9  ;;  %v995_v24 = vadd.f32 %v994_v0, %v898_v42  ;;  %v1026_v16 = vpop.f32.mrf.mxu1  ;;  %v1084_v42 = vmul.f32 %v1003_v9, %v1003_v9 }
 0x139   : > { %1055 = vst [vmem:[%s1839_s21 + $0x70] sm:$0xff] %v1035_v62  ;;  %v1027_v17 = vadd.f32 %v1026_v16, %v930_v13  ;;  %v1456_v18 = vpop.f32.mrf.mxu0  ;;  %v1092_v8 = vmul.f32 %v1035_v62, %v1035_v62 }
 0x13a   : > { %v1095_v45 = vadd.f32 %v1094_v23, %v1080_v21  ;;  %1045 = vst [vmem:[%s1839_s21 + $0x20] sm:$0xff] %v995_v24  ;;  %v1059_v46 = vadd.f32 %v1058_v22, %v990_v39  ;;  %v1006_v33 = vadd.f32 %v1456_v18, %v909_v63  ;;  %v1464_v28 = vpop.f32.mrf.mxu1  ;;  %v1082_v35 = vmul.f32 %v995_v24, %v995_v24 }
 0x13b   : > { %1053 = vst [vmem:[%s1839_s21 + $0x60] sm:$0xff] %v1027_v17  ;;  %v1038_v19 = vadd.f32 %v1464_v28, %v941_v25  ;;  %v997_v29 = vpop.f32.mrf.mxu0  ;;  %v1089_v63 = vmul.f32 %v1868_v54, %v1868_v54  ;;  %v1090_v4 = vmul.f32 %v1027_v17, %v1027_v17 }
 0x13c   : > { %v1060_v31 = vadd.f32 %v1059_v46, %v995_v24  ;;  %v1096_v36 = vadd.f32 %v1095_v45, %v1081_v27  ;;  %1048 = vst [vmem:[%s1839_s21 + $0x38] sm:$0xff] %v1006_v33  ;;  %v998_v47 = vadd.f32 %v997_v29, %v901_v26  ;;  %v1029_v48 = vpop.f32.mrf.mxu1  ;;  %v1085_v50 = vmul.f32 %v1006_v33, %v1006_v33 }
 0x13d   : > { %1056 = vst [vmem:[%s1839_s21 + $0x78] sm:$0xff] %v1038_v19  ;;  %v1030_v37 = vadd.f32 %v1029_v48, %v933_v30  ;;  %v1093_v11 = vmul.f32 %v1038_v19, %v1038_v19 }
 0x13e   : > { %v1097_v40 = vadd.f32 %v1096_v36, %v1082_v35  ;;  %1046 = vst [vmem:[%s1839_s21 + $0x28] sm:$0xff] %v998_v47  ;;  %v1061_v41 = vadd.f32 %v1060_v31, %v998_v47  ;;  %v1083_v39 = vmul.f32 %v998_v47, %v998_v47 }
 0x13f   : > { %1054 = vst [vmem:[%s1839_s21 + $0x68] sm:$0xff] %v1030_v37  ;;  %v1091_v7 = vmul.f32 %v1030_v37, %v1030_v37 }
 0x140   : > { %v1062_v43 = vadd.f32 %v1061_v41, %v1003_v9  ;;  %v1098_v49 = vadd.f32 %v1097_v40, %v1083_v39 }
 0x142   : > { %v1063_v51 = vadd.f32 %v1062_v43, %v1006_v33  ;;  %v1099_v52 = vadd.f32 %v1098_v49, %v1084_v42 }
 0x144   : > { %v1064_v55 = vadd.f32 %v1063_v51, %v1857_v38  ;;  %v1100_v56 = vadd.f32 %v1099_v52, %v1085_v50 }
 0x146   : > { %v1101_v34 = vadd.f32 %v1100_v56, %v1086_v53  ;;  %v1065_v57 = vadd.f32 %v1064_v55, %v1014_v3 }
 0x148   : > { %v1066_v59 = vadd.f32 %v1065_v57, %v1846_v44  ;;  %v1102_v61 = vadd.f32 %v1101_v34, %v1087_v32 }
 0x14a   : > { %v1067_v1 = vadd.f32 %v1066_v59, %v1868_v54  ;;  %v1103_v2 = vadd.f32 %v1102_v61, %v1088_v58 }
 0x14c   : > { %v1068_v5 = vadd.f32 %v1067_v1, %v1027_v17  ;;  %v1104_v38 = vadd.f32 %v1103_v2, %v1089_v63 }
 0x14e   : > { %v1069_v6 = vadd.f32 %v1068_v5, %v1030_v37  ;;  %v1105_v3 = vadd.f32 %v1104_v38, %v1090_v4 }
 0x150   : > { %v1070_v9 = vadd.f32 %v1069_v6, %v1035_v62  ;;  %v1106_v10 = vadd.f32 %v1105_v3, %v1091_v7 }
 0x152   : > { %v1071_v44 = vadd.f32 %v1070_v9, %v1038_v19  ;;  %v1107_v12 = vadd.f32 %v1106_v10, %v1092_v8 }
 0x154   : > { %v1072_v14 = vrot.slane %v1071_v44, 4  ;;  %v1108_v15 = vadd.f32 %v1107_v12, %v1093_v11 }
 0x156   : > { %v1073_v20 = vadd.f32 %v1072_v14, %v1071_v44  ;;  %v1109_v54 = vrot.slane %v1108_v15, 4 }
 0x158   : > { %v1074_v60 = vrot.slane %v1073_v20, 2  ;;  %v1110_v0 = vadd.f32 %v1109_v54, %v1108_v15 }
 0x15a   : > { %v1075_v13 = vadd.f32 %v1074_v60, %v1073_v20  ;;  %v1111_v21 = vrot.slane %v1110_v0, 2 }
 0x15c   : > { %v1076_v22 = vrot.slane %v1075_v13, 1  ;;  %v1112_v23 = vadd.f32 %v1111_v21, %v1110_v0 }
 0x15e   : > { %v1113_v24 = vrot.slane %v1112_v23, 1  ;;  %v1077_v62 = vadd.f32 %v1076_v22, %v1075_v13 }
 0x160   : > { %v1114_v16 = vadd.f32 %v1113_v24, %v1112_v23 }
 0x162   : > { %v1116_v17 = vsel %vm1115_vm1, %v1077_v62, %v1114_v16 }
 0x163   : > { %1117 = vst [vmem:[%s187_s24] sm:$0x3] %v1116_v17 }
 0x164 PF: > { %s14_s12 = sadd.s32 1, %s1580_s12  }
 0x165   : > { %p11_p5 = scmp.ge.s32.totalorder %s14_s12, 4  }
 0x167   :  { %13 = sbr.rel (!%p11_p5) target bundleno = 1 (0x1), region = 70 }

// kernel: tile.73
= control target key start
LH: loop header
LB: loop body
LE: loop exit
PB: predicated region body
PF: predicated region fallthrough
CT: control target
= control target key end

     0   :  { %s28_s0 = inlined_call_operand.vmem [shape: f32[8], index: 0, kind: input, shape index: {}]   ;;  %s29_s1 = inlined_call_operand.vmem [shape: f32[16,8], index: 1, kind: output, shape index: {}]  }
   0x1   :  { %v4_v0 = vld [vmem:[%s28_s0] ss:$0 sm:$0xff] }
   0x2   :  { %5 = vst [vmem:[%s29_s1] sm:$0xff] %v4_v0  ;;  %8 = vst [vmem:[%s29_s1 + $0x8] sm:$0xff] %v4_v0 }

// kernel: tile.78
= control target key start
LH: loop header
LB: loop body
LE: loop exit
PB: predicated region body
PF: predicated region fallthrough
CT: control target
= control target key end

     0   :  { %s133_s10 = smov 120   ;;  %s134_s11 = smov 104   ;;  %vm3_vm0 = vcmask 64512   ;;  %vm9_vm1 = vcmask 1048512   ;;  %vm15_vm2 = vcmask 982912   ;;  %vm21_vm3 = vcmask 917312   ;;  %s209_s0 = inlined_call_operand.vmem [shape: f32[16,8], index: 0, kind: input, shape index: {}]   ;;  %s210_s1 = inlined_call_operand.vmem [shape: f32[1,128], index: 1, kind: output, shape index: {}]  }
   0x1   :  { %v103_v0 = vld [vmem:[%s209_s0 + $0xf] sm:$0x1]   ;;  %v105_v1 = vld [vmem:[%s209_s0 + $0xd] sm:$0x1]   ;;  %v104_v2 = vld [vmem:[%s209_s0 + $0xe] sm:$0x1]  }
   0x2   :  { %7 = vrot.lane.b32.xlu0 %v103_v0, %s133_s10  ;;  %19 = vrot.lane.b32.xlu1 %v105_v1, %s134_s11  ;;  %v106_v3 = vld [vmem:[%s209_s0 + $0xc] sm:$0x1]   ;;  %s135_s16 = smov 112   ;;  %s136_s17 = smov 96   ;;  %v107_v4 = vld [vmem:[%s209_s0 + $0xb] sm:$0x1]  }
   0x3   :  { %v108_v5 = vld [vmem:[%s209_s0 + $0xa] sm:$0x1]   ;;  %v2_v6 = vld [vmem:[%s209_s0] sm:$0x1]   ;;  %s137_s24 = smov 88   ;;  %s138_s25 = smov 80  }
   0x4   :  { %4 = vst.msk [vmem:[#allocation0] sm:$0x1] %vm3_vm0, %v2_v6   ;;  %v109_v7 = vld [vmem:[%s209_s0 + $0x9] sm:$0x1]   ;;  %v110_v8 = vld [vmem:[%s209_s0 + $0x8] sm:$0x1]  }
   0x5   :  { %s139_s30 = smov 72   ;;  %s140_s2 = smov 64   ;;  %v111_v9 = vld [vmem:[%s209_s0 + $0x7] sm:$0x1]   ;;  %v112_v10 = vld [vmem:[%s209_s0 + $0x6] sm:$0x1]  }
   0x6   :  { %13 = vrot.lane.b32.xlu0 %v104_v2, %s135_s16  ;;  %25 = vrot.lane.b32.xlu1 %v106_v3, %s136_s17  ;;  %s141_s7 = smov 56   ;;  %s142_s8 = smov 48   ;;  %v113_v11 = vld [vmem:[%s209_s0 + $0x5] sm:$0x1]   ;;  %v114_v12 = vld [vmem:[%s209_s0 + $0x4] sm:$0x1]  }
   0x7   :  { %s143_s13 = smov 40   ;;  %s144_s14 = smov 32   ;;  %v115_v13 = vld [vmem:[%s209_s0 + $0x3] sm:$0x1]   ;;  %v116_v14 = vld [vmem:[%s209_s0 + $0x2] sm:$0x1]  }
   0x8   :  { %s145_s19 = smov 24   ;;  %s146_s20 = smov 16   ;;  %v117_v15 = vld [vmem:[%s209_s0 + $0x1] sm:$0x1]   ;;  %vm27_vm4 = vcmask 851712   ;;  %vm33_vm5 = vcmask 786112  }
   0x9   :  { %s147_s0 = smov 8   ;;  %vm39_vm6 = vcmask 720512   ;;  %vm45_vm7 = vcmask 654912   ;;  %vm51_vm8 = vcmask 589312   ;;  %vm57_vm9 = vcmask 523712  }
   0xa   :  { %31 = vrot.lane.b32.xlu0 %v107_v4, %s137_s24  ;;  %37 = vrot.lane.b32.xlu1 %v108_v5, %s138_s25  ;;  %vm63_vm10 = vcmask 458112   ;;  %vm69_vm11 = vcmask 392512   ;;  %vm75_vm12 = vcmask 326912   ;;  %vm81_vm13 = vcmask 261312  }
   0xb   :  { %vm87_vm14 = vcmask 195712   ;;  %vm93_vm15 = vcmask 130112  }
   0xe   :  { %43 = vrot.lane.b32.xlu0 %v109_v7, %s139_s30  ;;  %49 = vrot.lane.b32.xlu1 %v110_v8, %s140_s2 }
  0x12   :  { %55 = vrot.lane.b32.xlu0 %v111_v9, %s141_s7  ;;  %61 = vrot.lane.b32.xlu1 %v112_v10, %s142_s8 }
  0x16   :  { %67 = vrot.lane.b32.xlu0 %v113_v11, %s143_s13  ;;  %73 = vrot.lane.b32.xlu1 %v114_v12, %s144_s14 }
  0x1a   :  { %79 = vrot.lane.b32.xlu0 %v115_v13, %s145_s19  ;;  %85 = vrot.lane.b32.xlu1 %v116_v14, %s146_s20 }
  0x1e   :  { %91 = vrot.lane.b32.xlu0 %v117_v15, %s147_s0 }
  0x74   :  { %v8_v16 = vpop.permute.xlu0 %7   ;;  %v20_v17 = vpop.permute.xlu1 %19  }
  0x75   :  { %10 = vst.msk [vmem:[#allocation0] sm:$0x1] %vm9_vm1, %v8_v16  }
  0x78   :  { %v14_v18 = vpop.permute.xlu0 %13   ;;  %v26_v19 = vpop.permute.xlu1 %25  }
  0x79   :  { %16 = vst.msk [vmem:[#allocation0] sm:$0x1] %vm15_vm2, %v14_v18  }
  0x7a   :  { %22 = vst.msk [vmem:[#allocation0] sm:$0x1] %vm21_vm3, %v20_v17  }
  0x7b   :  { %28 = vst.msk [vmem:[#allocation0] sm:$0x1] %vm27_vm4, %v26_v19  }
  0x7c   :  { %v32_v20 = vpop.permute.xlu0 %31   ;;  %v38_v21 = vpop.permute.xlu1 %37  }
  0x7d   :  { %34 = vst.msk [vmem:[#allocation0] sm:$0x1] %vm33_vm5, %v32_v20  }
  0x7e   :  { %40 = vst.msk [vmem:[#allocation0] sm:$0x1] %vm39_vm6, %v38_v21  }
  0x80   :  { %v44_v22 = vpop.permute.xlu0 %43   ;;  %v50_v23 = vpop.permute.xlu1 %49  }
  0x81   :  { %46 = vst.msk [vmem:[#allocation0] sm:$0x1] %vm45_vm7, %v44_v22  }
  0x82   :  { %52 = vst.msk [vmem:[#allocation0] sm:$0x1] %vm51_vm8, %v50_v23  }
  0x84   :  { %v56_v24 = vpop.permute.xlu0 %55   ;;  %v62_v25 = vpop.permute.xlu1 %61  }
  0x85   :  { %58 = vst.msk [vmem:[#allocation0] sm:$0x1] %vm57_vm9, %v56_v24  }
  0x86   :  { %64 = vst.msk [vmem:[#allocation0] sm:$0x1] %vm63_vm10, %v62_v25  }
  0x88   :  { %v68_v26 = vpop.permute.xlu0 %67   ;;  %v74_v27 = vpop.permute.xlu1 %73  }
  0x89   :  { %70 = vst.msk [vmem:[#allocation0] sm:$0x1] %vm69_vm11, %v68_v26  }
  0x8a   :  { %76 = vst.msk [vmem:[#allocation0] sm:$0x1] %vm75_vm12, %v74_v27  }
  0x8c   :  { %v80_v28 = vpop.permute.xlu0 %79   ;;  %v86_v29 = vpop.permute.xlu1 %85  }
  0x8d   :  { %82 = vst.msk [vmem:[#allocation0] sm:$0x1] %vm81_vm13, %v80_v28  }
  0x8e   :  { %88 = vst.msk [vmem:[#allocation0] sm:$0x1] %vm87_vm14, %v86_v29  }
  0x90   :  { %v92_v30 = vpop.permute.xlu0 %91  }
  0x91   :  { %94 = vst.msk [vmem:[#allocation0] sm:$0x1] %vm93_vm15, %v92_v30  }
  0x98   :  { %v99_v31 = vld [vmem:[#allocation0] sm:$0x1] }
  0x99   :  { %102 = vst [vmem:[%s210_s1] sm:$0x1] %v99_v31 }

// kernel: a_call__.16
= control target key start
LH: loop header
LB: loop body
LE: loop exit
PB: predicated region body
PF: predicated region fallthrough
CT: control target
= control target key end

     0   :  { %s404_s12 = smov 0   ;;  %s431_s0 = inlined_call_operand.vmem [shape: f32[256,128], index: 0, kind: input, shape index: {}]   ;;  %s432_s1 = inlined_call_operand.vmem [shape: f32[1,128], index: 1, kind: input, shape index: {}]   ;;  %s433_s2 = inlined_call_operand.vmem [shape: f32[1,128], index: 2, kind: input, shape index: {}]   ;;  %s434_s3 = inlined_call_operand.vmem [shape: bf16[256,128], index: 3, kind: output, shape index: {}]  }
   0x1 LB: > { %s316_s13 = sadd.s32 4294967295, %s382_s12   ;;  %p320_p0 = scmp.ge.s32.totalorder %s382_s12, 1  ;;  %s382_s12 = sphi %s404_s12, %s13_s12  }
   0x2   : > { %p138_p1 = scmp.lt.s32.totalorder %s382_s12, 5 }
   0x4   : > { %p139_p2 = pnand %p320_p0, %p138_p1 }
   0x5   : > { %s321_s14 = sshll.u32 (!%p139_p2), %s316_s13, 3 }
   0x6   : > { %142 = sbr.rel (%p139_p2) target bundleno = 27 (0x1b), region = 32  ;;  %p163_p3 = scmp.lt.s32.totalorder (!%p139_p2), %s321_s14, 31 }
   0xb   : > { %s436_s14 = smov (!%p163_p3, %s321_s14), 31  ;;  %v325_v0 = vld [vmem:[%s432_s1] ss:$0 sm:$0xff] }
   0xc   : > { %s322_s15 = sshll.u32 %s436_s14, 3  ;;  %v326_v1 = vld [vmem:[%s433_s2] ss:$0 sm:$0xff]  ;;  %s324_s23 = sshll.u32 %s436_s14, 2 }
   0xd   : > { %s166_s20 = scalar_lea.vmem %s431_s0, %s322_s15  ;;  %s172_s26 = scalar_lea.vmem %s434_s3, %s324_s23 }
   0xe   : > { %v174_v2 = vld [vmem:[%s166_s20] sm:$0xff]  ;;  %v175_v3 = vld [vmem:[%s166_s20 + $0x8] sm:$0xff]  ;;  %v176_v4 = vld [vmem:[%s166_s20 + $0x10] sm:$0xff] }
   0xf   : > { %v189_v5 = vmul.f32 %v325_v0, %v174_v2  ;;  %v190_v6 = vmul.f32 %v325_v0, %v175_v3  ;;  %v177_v7 = vld [vmem:[%s166_s20 + $0x18] sm:$0xff]  ;;  %v191_v8 = vmul.f32 %v325_v0, %v176_v4  ;;  %v178_v9 = vld [vmem:[%s166_s20 + $0x20] sm:$0xff]  ;;  %v179_v10 = vld [vmem:[%s166_s20 + $0x28] sm:$0xff] }
  0x10   : > { %v192_v11 = vmul.f32 %v325_v0, %v177_v7  ;;  %v193_v12 = vmul.f32 %v325_v0, %v178_v9  ;;  %v194_v13 = vmul.f32 %v325_v0, %v179_v10  ;;  %v180_v14 = vld [vmem:[%s166_s20 + $0x30] sm:$0xff]  ;;  %v181_v15 = vld [vmem:[%s166_s20 + $0x38] sm:$0xff] }
  0x11   : > { %v204_v16 = vadd.f32 %v326_v1, %v189_v5  ;;  %v205_v17 = vadd.f32 %v326_v1, %v190_v6  ;;  %v206_v18 = vadd.f32 %v326_v1, %v191_v8  ;;  %v195_v19 = vmul.f32 %v325_v0, %v180_v14 }
  0x12   : > { %v207_v20 = vadd.f32 %v326_v1, %v192_v11  ;;  %v208_v21 = vadd.f32 %v326_v1, %v193_v12  ;;  %v209_v22 = vadd.f32 %v326_v1, %v194_v13  ;;  %v196_v23 = vmul.f32 %v325_v0, %v181_v15 }
  0x13   : > { %v212_v24 = vmax.f32 %v204_v16, 0.0  ;;  %v213_v25 = vmax.f32 %v205_v17, 0.0  ;;  %v214_v26 = vmax.f32 %v206_v18, 0.0  ;;  %v210_v27 = vadd.f32 %v326_v1, %v195_v19 }
  0x14   : > { %v215_v28 = vmax.f32 %v207_v20, 0.0  ;;  %v216_v29 = vmax.f32 %v208_v21, 0.0  ;;  %v217_v30 = vmax.f32 %v209_v22, 0.0  ;;  %v211_v31 = vadd.f32 %v326_v1, %v196_v23 }
  0x15   : > { %v348_v32 = vpack.c.bf16 %v213_v25, %v212_v24  ;;  %v218_v33 = vmax.f32 %v210_v27, 0.0 }
  0x16   : > { %v353_v34 = vpack.c.bf16 %v215_v28, %v214_v26  ;;  %v358_v35 = vpack.c.bf16 %v217_v30, %v216_v29  ;;  %v219_v36 = vmax.f32 %v211_v31, 0.0 }
  0x17   : > { %349 = vst [vmem:[%s172_s26] sm:$0xff] %v348_v32  }
  0x18   : > { %365 = vst [vmem:[%s172_s26 + $0x8] sm:$0xff] %v353_v34   ;;  %366 = vst [vmem:[%s172_s26 + $0x10] sm:$0xff] %v358_v35   ;;  %v363_v37 = vpack.c.bf16 %v219_v36, %v218_v33 }
  0x1a   : > { %367 = vst [vmem:[%s172_s26 + $0x18] sm:$0xff] %v363_v37  }
  0x1b PF: > { %s13_s12 = sadd.s32 1, %s382_s12  }
  0x1c   : > { %p10_p4 = scmp.ge.s32.totalorder %s13_s12, 6  }
  0x1e   :  { %12 = sbr.rel (!%p10_p4) target bundleno = 1 (0x1), region = 62 }

// kernel: a_call__.17
= control target key start
LH: loop header
LB: loop body
LE: loop exit
PB: predicated region body
PF: predicated region fallthrough
CT: control target
= control target key end

     0   :  { %s526_s9 = smov 0   ;;  %s560_s0 = inlined_call_operand.vmem [shape: bf16[3,8], index: 0, kind: input, shape index: {}]   ;;  %s561_s1 = inlined_call_operand.vmem [shape: bf16[4,8,784], index: 1, kind: input, shape index: {}]   ;;  %s562_s2 = inlined_call_operand.vmem [shape: f32[4,3,784], index: 2, kind: output, shape index: {}]  }
   0x1 LB: > { %s436_s10 = sadd.s32 4294967295, %s506_s9   ;;  %p440_p0 = scmp.ge.s32.totalorder %s506_s9, 1  ;;  %s506_s9 = sphi %s526_s9, %s12_s9  }
   0x2   : > { %p112_p1 = scmp.lt.s32.totalorder %s506_s9, 5 }
   0x4   : > { %p113_p2 = pnand %p440_p0, %p112_p1 }
   0x5   : > { %p134_p3 = scmp.lt.s32.totalorder (!%p113_p2), %s436_s10, 3 }
   0x6   : > { %116 = sbr.rel (%p113_p2) target bundleno = 242 (0xf2), region = 28 }
   0xb   : > { %v508_v0 = vmov 0   ;;  %s564_s10 = smov (!%p134_p3, %s436_s10), 3  ;;  %vm172_vm0 = vcmask 1043456   ;;  %v145_v13 = vld [vmem:[%s560_s0] sm:$0x3]  ;;  %vm168_vm1 = vcmask 64512  }
   0xc   : > { %226 = vmatprep.mubr.bf16.mxu0 %v508_v0  ;;  %267 = vmatprep.mubr.bf16.mxu1 %v508_v0  ;;  %s467_s11 = smul.u32 28, %s564_s10  ;;  %v509_v15 = vmov 0.0   ;;  %vm510_vm2 = vmmov 0   ;;  %vm379_vm3 = vcmask 124928  }
   0xe   : > { %s138_s14 = scalar_lea.vmem %s561_s1, %s467_s11  ;;  %s143_s19 = scalar_lea.vmem %s562_s2, %s467_s11 }
   0xf   : > { %v146_v1 = vld [vmem:[%s138_s14] sm:$0xff]  ;;  %v147_v2 = vld [vmem:[%s138_s14 + $0x8] sm:$0xff]  ;;  %v148_v3 = vld [vmem:[%s138_s14 + $0x10] sm:$0xff] }
  0x10   : > { %v444_v4 = vcombine.high %v146_v1, %v146_v1  ;;  %v446_v5 = vcombine.high %v147_v2, %v147_v2  ;;  %v443_v6 = vcombine.low %v146_v1, %v146_v1  ;;  %v445_v7 = vcombine.low %v147_v2, %v147_v2  ;;  %v485_v8 = vld [vmem:[%s138_s14 + $0x18] ss:$0 sps:$4 sm:$0xff]  }
  0x11   : > { %v448_v9 = vcombine.high %v148_v3, %v148_v3  ;;  %v447_v10 = vcombine.low %v148_v3, %v148_v3  ;;  %v192_v16 = vsel %vm172_vm0, %v485_v8, 0 }
  0x12   : > { %450 = vmatprep.subr.msk.bf16.mxu0 %vm172_vm0, %v444_v4  ;;  %452 = vmatprep.subr.msk.bf16.mxu1 %vm172_vm0, %v446_v5  ;;  %v174_v11 = vsel %vm172_vm0, %v443_v6, 0  ;;  %v180_v12 = vsel %vm172_vm0, %v445_v7, 0 }
  0x13   : > { %209 = vmatpush1.bf16.msra.mxu0 %v174_v11  ;;  %250 = vmatpush1.bf16.msra.mxu1 %v180_v12  ;;  %v186_v14 = vsel %vm172_vm0, %v447_v10, 0 }
  0x14   : > { %454 = vmatprep.subr.msk.bf16.mxu0 %vm172_vm0, %v448_v9  ;;  %461 = vmatprep.subr.bf16.mxu1 %v509_v15 }
  0x16   : > { %451 = vmatmul.mubr.msk.bf16.vlgmr.msra.gmra.mxu0 %vm168_vm1, %v145_v13  ;;  %453 = vmatmul.mubr.msk.bf16.vlgmr.msra.gmra.mxu1 %vm168_vm1, %v145_v13 }
  0x17   : > { %291 = vmatpush1.bf16.msra.mxu0 %v186_v14  ;;  %462 = vmatpush3.bf16.msra.mxu1 %v192_v16 }
  0x18   : > { %308 = vmatprep.mubr.bf16.mxu0 %v508_v0  ;;  %463 = vmatprep.mubr.msk.bf16.mxu1 %vm510_vm2, %v509_v15 }
  0x1e   : > { %455 = vmatmul.mubr.msk.bf16.vlgmr.msra.gmra.mxu0 %vm168_vm1, %v145_v13  ;;  %464 = vmatmul.mubr.msk.bf16.vlgmr.msra.gmra.mxu1 %vm168_vm1, %v145_v13 }
  0xd6   : > { %v228_v17 = vpop.f32.mrf.mxu0  ;;  %v269_v18 = vpop.f32.mrf.mxu1 }
  0xd7   : > { %486 = vtanh.f32 %v228_v17 }
  0xd8   : > { %488 = vtanh.f32 %v269_v18  ;;  %v230_v19 = vpop.f32.mrf.mxu0  ;;  %v271_v20 = vpop.f32.mrf.mxu1 }
  0xd9   : > { %490 = vtanh.f32 %v230_v19 }
  0xda   : > { %492 = vtanh.f32 %v271_v20  ;;  %v232_v21 = vpop.f32.mrf.mxu0  ;;  %v273_v22 = vpop.f32.mrf.mxu1 }
  0xdc   : > { %v233_v23 = vpop.f32.mrf.mxu0  ;;  %v274_v24 = vpop.f32.mrf.mxu1 }
  0xde   : > { %v310_v25 = vpop.f32.mrf.mxu0  ;;  %v351_v26 = vpop.f32.mrf.mxu1 }
  0xdf   : > { %494 = vtanh.f32 %v310_v25 }
  0xe0   : > { %496 = vtanh.f32 %v351_v26  ;;  %v312_v27 = vpop.f32.mrf.mxu0  ;;  %v465_v28 = vpop.f32.mrf.mxu1 }
  0xe1   : > { %498 = vtanh.f32 %v312_v27 }
  0xe2   : > { %v314_v29 = vpop.f32.mrf.mxu0  ;;  %v354_v30 = vpop.f32.mrf.mxu1 }
  0xe4   : > { %v487_v31 = vpop.eup %486  ;;  %v315_v32 = vpop.f32.mrf.mxu0 }
  0xe5   : > { %v466_v33 = vpop.f32.mrf.mxu1  ;;  %v489_v34 = vpop.eup %488 }
  0xe6   : > { %v491_v35 = vpop.eup %490 }
  0xe7   : > { %v493_v36 = vpop.eup %492  ;;  %v370_v37 = vcombine.low %v487_v31, %v491_v35 }
  0xe8   : > { %v371_v38 = vcombine.low %v489_v34, %v493_v36 }
  0xe9   : > { %376 = vst [vmem:[%s143_s19] sm:$0x77] %v370_v37 }
  0xea   : > { %377 = vst [vmem:[%s143_s19 + $0x8] sm:$0x77] %v371_v38 }
  0xec   : > { %v495_v39 = vpop.eup %494 }
  0xed   : > { %v497_v40 = vpop.eup %496 }
  0xee   : > { %v499_v41 = vpop.eup %498  ;;  %380 = vst.msk [vmem:[%s143_s19 + $0x18] sm:$0x7] %vm379_vm3, %v497_v40 }
  0xef   : > { %v372_v42 = vcombine.low %v495_v39, %v499_v41 }
  0xf1   : > { %378 = vst [vmem:[%s143_s19 + $0x10] sm:$0x77] %v372_v42 }
  0xf2 PF: > { %s12_s9 = sadd.s32 1, %s506_s9  }
  0xf3   : > { %p9_p4 = scmp.ge.s32.totalorder %s12_s9, 6  }
  0xf5   :  { %11 = sbr.rel (!%p9_p4) target bundleno = 1 (0x1), region = 58 }

</bundles_post_ra>
